<compile_context>
chip_gen: v5e
topology: v5e:2x2
jax: 0.10.0
libtpu: 0.0.40
codegen_flags: <defaults>
</compile_context>

<pallas_src>
import functools

import jax
import jax.numpy as jnp
from jax.experimental import pallas as pl
from jax.experimental.pallas import tpu as pltpu

D_IN, D_HID, D_OUT = 512, 256, 768
D_CAT = D_OUT + D_HID          # 1024 = fused (Ws || W1) output width
LN_EPS = 1e-5                  # PyTorch nn.LayerNorm default


def _gelu_exact(x):
    # nn.GELU() default (exact erf formulation), evaluated in f32.
    return 0.5 * x * (1.0 + jax.lax.erf(x * 0.7071067811865475))


def adapter_kernel(x_ref, wcat_ref, bcat_ref, w2_ref, vec_ref, o_ref):
    x = x_ref[...]                                                      # [bm, 512] bf16

    # Fused x-side matmul (Ws || W1): one MXU pass, bf16 in, f32 accumulate.
    h = jnp.dot(x, wcat_ref[...], preferred_element_type=jnp.float32)   # [bm, 1024] f32
    h = _gelu_exact(h + bcat_ref[...])        # GELU applies to both branches

    h_sc = h[:, :D_OUT]                       # shortcut branch         [bm, 768] f32
    h1 = h[:, D_OUT:]                         # adapter hidden          [bm, 256] f32

    stage_into_out = o_ref.dtype == jnp.float32
    if stage_into_out:
        # Stage the shortcut branch into the output block now so its f32 live
        # range does not span the second matmul + LayerNorm (VMEM pressure).
        o_ref[...] = h_sc

    # Adapter up-projection (bf16 MXU, f32 accumulate) + b2.
    h2 = jnp.dot(h1.astype(jnp.bfloat16), w2_ref[...],
                 preferred_element_type=jnp.float32)                    # [bm, 768] f32
    h2 = h2 + vec_ref[0:1, :]                                           # + b2

    # Dropout(0.5) -> identity at inference.

    # One-pass LayerNorm statistics over the last dim (768).  GELU-bounded,
    # roughly zero-mean activations keep the E[x^2]-E[x]^2 form well conditioned.
    mean = jnp.mean(h2, axis=-1, keepdims=True)
    m2 = jnp.mean(h2 * h2, axis=-1, keepdims=True)
    var = m2 - mean * mean
    normed = (h2 - mean) * jax.lax.rsqrt(var + LN_EPS)
    ln = normed * vec_ref[1:2, :] + vec_ref[2:3, :]                     # * gamma + beta

    if stage_into_out:
        o_ref[...] += ln
    else:
        # Non-f32 output: do the final add in f32, cast once on store.
        o_ref[...] = (h_sc + ln).astype(o_ref.dtype)


def _round_up(n, k):
    return (n + k - 1) // k * k


def prepare_params(params):
    """One-time fusion of weights/biases into the layout the kernel consumes.

    Call once and reuse: keeps the concat/cast traffic out of every forward call.
    """
    w_cat = jnp.concatenate([params["ws"], params["w1"]], axis=1).astype(jnp.bfloat16)  # [512,1024]
    b_cat = jnp.concatenate([params["bs"], params["b1"]], axis=1).astype(jnp.float32)   # [1,1024]
    w2 = params["w2"].astype(jnp.bfloat16)                                              # [256,768]
    vecs = jnp.concatenate([params["b2"], params["gamma"], params["beta"]],
                           axis=0).astype(jnp.float32)                                  # [3,768]
    return dict(w_cat=w_cat, b_cat=b_cat, w2=w2, vecs=vecs)


@functools.partial(jax.jit, static_argnames=("block_m", "out_dtype"))
def adapter_forward(x, fused, *, block_m=1024, out_dtype=jnp.float32):
    """x: [..., 512] float-castable.  fused: output of prepare_params().
    Returns [..., 768] in out_dtype (default float32, matching the PyTorch module)."""
    lead_shape = x.shape[:-1]
    m = 1
    for d in lead_shape:
        m *= d

    # Single pre-kernel pass over the input: cast straight to bf16 (MXU operand dtype).
    x2d = x.reshape(m, D_IN).astype(jnp.bfloat16)

    # Row tile: multiple of 16 (bf16 sublane packing), capped by block_m and the
    # (rounded-up) row count.  No host-side padding: the grid uses cdiv and Pallas
    # masks the ragged last block on write.
    bm = min(_round_up(block_m, 16), _round_up(m, 16))
    bm = max(bm, 16)
    # Give both TensorCores work on megacore parts (v7x) when possible.
    if pl.cdiv(m, bm) < 2 and m > 16:
        bm = max(16, _round_up(pl.cdiv(m, 2), 16))
    grid_m = pl.cdiv(m, bm)

    full = lambda i: (0, 0)
    out2d = pl.pallas_call(
        adapter_kernel,
        out_shape=jax.ShapeDtypeStruct((m, D_OUT), out_dtype),
        grid_spec=pltpu.PrefetchScalarGridSpec(
            num_scalar_prefetch=0,
            grid=(grid_m,),
            in_specs=[
                pl.BlockSpec((bm, D_IN), lambda i: (i, 0)),      # x rows (bf16)
                pl.BlockSpec((D_IN, D_CAT), full),               # Ws || W1 (bf16, resident)
                pl.BlockSpec((1, D_CAT), full),                  # bs || b1 (f32)
                pl.BlockSpec((D_HID, D_OUT), full),              # W2 (bf16, resident)
                pl.BlockSpec((3, D_OUT), full),                  # b2, gamma, beta (f32)
            ],
            out_specs=pl.BlockSpec((bm, D_OUT), lambda i: (i, 0)),
        ),
        compiler_params=pltpu.CompilerParams(
            dimension_semantics=("parallel",),
            vmem_limit_bytes=48 * 1024 * 1024),
    )(x2d, fused["w_cat"], fused["b_cat"], fused["w2"], fused["vecs"])

    return out2d.reshape(*lead_shape, D_OUT)


def init_params(key):
    """Deterministic synthetic parameters matching the PyTorch module shapes."""
    ks = jax.random.split(key, 6)

    def lin(k, fan_in, fan_out):
        bound = 1.0 / jnp.sqrt(fan_in)
        kw, kb = jax.random.split(k)
        w = jax.random.uniform(kw, (fan_in, fan_out), jnp.float32, -bound, bound)
        b = jax.random.uniform(kb, (1, fan_out), jnp.float32, -bound, bound)
        return w, b

    ws, bs = lin(ks[0], D_IN, D_OUT)    # shortcut Linear(512, 768)
    w1, b1 = lin(ks[1], D_IN, D_HID)    # adapt   Linear(512, 256)
    w2, b2 = lin(ks[2], D_HID, D_OUT)   # adapt   Linear(256, 768)
    gamma = jnp.ones((1, D_OUT), jnp.float32)   # LayerNorm weight
    beta = jnp.zeros((1, D_OUT), jnp.float32)   # LayerNorm bias
    return dict(ws=ws, bs=bs, w1=w1, b1=b1, w2=w2, b2=b2, gamma=gamma, beta=beta)


if __name__ == "__main__":
    key = jax.random.PRNGKey(0)
    kx, kp = jax.random.split(key)

    B, S = 2, 8                                   # small batch / seq
    x = jax.random.normal(kx, (B, S, D_IN), jnp.float32)
    params = init_params(kp)
    fused = prepare_params(params)                # one-time weight prep (hoisted)

    out = adapter_forward(x, fused)
    out = jax.block_until_ready(out)
    assert out.shape == (B, S, D_OUT) and out.dtype == jnp.float32

    # Pure-JAX reference with matching numerics (bf16 MXU operands, f32 accumulate,
    # f32 elementwise; inference-mode dropout = identity).
    def ref(x, p):
        xf = x.astype(jnp.float32)

        def mm(a, w):
            return jnp.dot(a.astype(jnp.bfloat16), w.astype(jnp.bfloat16),
                           preferred_element_type=jnp.float32)

        g = lambda v: 0.5 * v * (1.0 + jax.lax.erf(v * 0.7071067811865475))
        sc = g(mm(xf, p["ws"]) + p["bs"][0])
        h = g(mm(xf, p["w1"]) + p["b1"][0])
        h = mm(h, p["w2"]) + p["b2"][0]
        mu = jnp.mean(h, -1, keepdims=True)
        var = jnp.mean((h - mu) ** 2, -1, keepdims=True)
        ln = (h - mu) * jax.lax.rsqrt(var + LN_EPS) * p["gamma"][0] + p["beta"][0]
        return sc + ln

    ref_out = ref(x, params)
    assert jnp.allclose(out, ref_out, atol=5e-3, rtol=5e-3), (
        float(jnp.max(jnp.abs(out - ref_out))))

    print("KERNEL_OK")
</pallas_src>

<mosaic_0001>
module attributes {stable_mosaic.version = 11 : i64} {
  func.func @adapter_kernel(%arg0: i32, %arg1: memref<16x512xbf16, #tpu.memory_space<vmem>>, %arg2: memref<512x1024xbf16, #tpu.memory_space<vmem>>, %arg3: memref<1x1024xf32, #tpu.memory_space<vmem>>, %arg4: memref<256x768xbf16, #tpu.memory_space<vmem>>, %arg5: memref<3x768xf32, #tpu.memory_space<vmem>>, %arg6: memref<16x768xf32, #tpu.memory_space<vmem>>) attributes {dimension_semantics = [#tpu.dimension_semantics<parallel>], iteration_bounds = array<i64: 1>, scalar_prefetch = 0 : i64, scratch_operands = 0 : i64, tpu.core_type = #tpu.core_type<tc>, window_params = [{transform_indices = @transform_0, window_bounds = array<i64: 16, 512>}, {pipeline_mode = #tpu.pipeline_mode<synchronous>, transform_indices = @transform_1, window_bounds = array<i64: 512, 1024>}, {pipeline_mode = #tpu.pipeline_mode<synchronous>, transform_indices = @transform_2, window_bounds = array<i64: 1, 1024>}, {pipeline_mode = #tpu.pipeline_mode<synchronous>, transform_indices = @transform_3, window_bounds = array<i64: 256, 768>}, {pipeline_mode = #tpu.pipeline_mode<synchronous>, transform_indices = @transform_4, window_bounds = array<i64: 3, 768>}, {transform_indices = @transform_5, window_bounds = array<i64: 16, 768>}]} {
    %c0 = arith.constant 0 : index
    %c0_0 = arith.constant 0 : index
    %0 = vector.load %arg1[%c0, %c0_0] : memref<16x512xbf16, #tpu.memory_space<vmem>>, vector<16x512xbf16>
    %c0_1 = arith.constant 0 : index
    %c0_2 = arith.constant 0 : index
    %1 = vector.load %arg2[%c0_1, %c0_2] : memref<512x1024xbf16, #tpu.memory_space<vmem>>, vector<512x1024xbf16>
    %cst = arith.constant dense<0.000000e+00> : vector<16x1024xf32>
    %2 = tpu.matmul %0, %1, %cst {dimension_numbers = #tpu.dot_dimension_numbers<[1], [0], [0], [1], [0, 0, 1, 1], [], []>} : vector<16x512xbf16>, vector<512x1024xbf16>, vector<16x1024xf32> -> vector<16x1024xf32>
    %c0_3 = arith.constant 0 : index
    %c0_4 = arith.constant 0 : index
    %3 = vector.load %arg3[%c0_3, %c0_4] : memref<1x1024xf32, #tpu.memory_space<vmem>>, vector<1x1024xf32>
    %4 = vector.broadcast %3 : vector<1x1024xf32> to vector<16x1024xf32>
    %5 = arith.addf %2, %4 : vector<16x1024xf32>
    %cst_5 = arith.constant 5.000000e-01 : f32
    %6 = vector.broadcast %cst_5 : f32 to vector<16x1024xf32>
    %7 = arith.mulf %6, %5 : vector<16x1024xf32>
    %cst_6 = arith.constant 0.707106769 : f32
    %8 = vector.broadcast %cst_6 : f32 to vector<16x1024xf32>
    %9 = arith.mulf %5, %8 : vector<16x1024xf32>
    %10 = math.erf %9 : vector<16x1024xf32>
    %cst_7 = arith.constant 1.000000e+00 : f32
    %11 = vector.broadcast %cst_7 : f32 to vector<16x1024xf32>
    %12 = arith.addf %11, %10 : vector<16x1024xf32>
    %13 = arith.mulf %7, %12 : vector<16x1024xf32>
    %14 = vector.extract_strided_slice %13 {offsets = [0, 0], sizes = [16, 768], strides = [1, 1]} : vector<16x1024xf32> to vector<16x768xf32>
    %15 = vector.extract_strided_slice %13 {offsets = [0, 768], sizes = [16, 256], strides = [1, 1]} : vector<16x1024xf32> to vector<16x256xf32>
    %c0_8 = arith.constant 0 : index
    %c0_9 = arith.constant 0 : index
    %16 = vector.load %arg6[%c0_8, %c0_9] : memref<16x768xf32, #tpu.memory_space<vmem>>, vector<16x768xf32>
    tpu.vector_store %arg6[%c0_8, %c0_9], %14 {strides = array<i32>} : memref<16x768xf32, #tpu.memory_space<vmem>>, vector<16x768xf32>,
    %17 = arith.truncf %15 : vector<16x256xf32> to vector<16x256xbf16>
    %c0_10 = arith.constant 0 : index
    %c0_11 = arith.constant 0 : index
    %18 = vector.load %arg4[%c0_10, %c0_11] : memref<256x768xbf16, #tpu.memory_space<vmem>>, vector<256x768xbf16>
    %cst_12 = arith.constant dense<0.000000e+00> : vector<16x768xf32>
    %19 = tpu.matmul %17, %18, %cst_12 {dimension_numbers = #tpu.dot_dimension_numbers<[1], [0], [0], [1], [0, 0, 1, 1], [], []>} : vector<16x256xbf16>, vector<256x768xbf16>, vector<16x768xf32> -> vector<16x768xf32>
    %c0_13 = arith.constant 0 : index
    %c0_14 = arith.constant 0 : index
    %20 = vector.load %arg5[%c0_13, %c0_14] : memref<3x768xf32, #tpu.memory_space<vmem>>, vector<1x768xf32>
    %21 = vector.broadcast %20 : vector<1x768xf32> to vector<16x768xf32>
    %22 = arith.addf %19, %21 : vector<16x768xf32>
    %cst_15 = arith.constant dense<0.000000e+00> : vector<16xf32>
    %23 = vector.multi_reduction <add>, %22, %cst_15 [1] : vector<16x768xf32> to vector<16xf32>
    %24 = vector.shape_cast %23 : vector<16xf32> to vector<16x1xf32>
    %cst_16 = arith.constant 7.680000e+02 : f32
    %25 = vector.broadcast %cst_16 : f32 to vector<16x1xf32>
    %26 = arith.divf %24, %25 : vector<16x1xf32>
    %27 = arith.mulf %22, %22 : vector<16x768xf32>
    %cst_17 = arith.constant dense<0.000000e+00> : vector<16xf32>
    %28 = vector.multi_reduction <add>, %27, %cst_17 [1] : vector<16x768xf32> to vector<16xf32>
    %29 = vector.shape_cast %28 : vector<16xf32> to vector<16x1xf32>
    %cst_18 = arith.constant 7.680000e+02 : f32
    %30 = vector.broadcast %cst_18 : f32 to vector<16x1xf32>
    %31 = arith.divf %29, %30 : vector<16x1xf32>
    %32 = arith.mulf %26, %26 : vector<16x1xf32>
    %33 = arith.subf %31, %32 : vector<16x1xf32>
    %34 = vector.broadcast %26 : vector<16x1xf32> to vector<16x768xf32>
    %35 = arith.subf %22, %34 : vector<16x768xf32>
    %cst_19 = arith.constant 9.99999974E-6 : f32
    %36 = vector.broadcast %cst_19 : f32 to vector<16x1xf32>
    %37 = arith.addf %33, %36 : vector<16x1xf32>
    %38 = math.rsqrt %37 : vector<16x1xf32>
    %39 = vector.broadcast %38 : vector<16x1xf32> to vector<16x768xf32>
    %40 = arith.mulf %35, %39 : vector<16x768xf32>
    %c1 = arith.constant 1 : index
    %c0_20 = arith.constant 0 : index
    %41 = vector.load %arg5[%c1, %c0_20] : memref<3x768xf32, #tpu.memory_space<vmem>>, vector<1x768xf32>
    %42 = vector.broadcast %41 : vector<1x768xf32> to vector<16x768xf32>
    %43 = arith.mulf %40, %42 : vector<16x768xf32>
    %c2 = arith.constant 2 : index
    %c0_21 = arith.constant 0 : index
    %44 = vector.load %arg5[%c2, %c0_21] : memref<3x768xf32, #tpu.memory_space<vmem>>, vector<1x768xf32>
    %45 = vector.broadcast %44 : vector<1x768xf32> to vector<16x768xf32>
    %46 = arith.addf %43, %45 : vector<16x768xf32>
    %c0_22 = arith.constant 0 : index
    %c0_23 = arith.constant 0 : index
    %47 = vector.load %arg6[%c0_22, %c0_23] : memref<16x768xf32, #tpu.memory_space<vmem>>, vector<16x768xf32>
    %48 = arith.addf %47, %46 : vector<16x768xf32>
    %c0_24 = arith.constant 0 : index
    %c0_25 = arith.constant 0 : index
    %49 = vector.load %arg6[%c0_24, %c0_25] : memref<16x768xf32, #tpu.memory_space<vmem>>, vector<16x768xf32>
    tpu.vector_store %arg6[%c0_24, %c0_25], %48 {strides = array<i32>} : memref<16x768xf32, #tpu.memory_space<vmem>>, vector<16x768xf32>,
    return
  }
  func.func @transform_0(%arg0: i32) -> (i32, i32) {
    %c0_i32 = arith.constant 0 : i32
    %c0_i32_0 = arith.constant 0 : i32
    return %arg0, %c0_i32 : i32, i32
  }
  func.func @transform_1(%arg0: i32) -> (i32, i32) {
    %c0_i32 = arith.constant 0 : i32
    %c0_i32_0 = arith.constant 0 : i32
    %c0_i32_1 = arith.constant 0 : i32
    return %c0_i32, %c0_i32_0 : i32, i32
  }
  func.func @transform_2(%arg0: i32) -> (i32, i32) {
    %c0_i32 = arith.constant 0 : i32
    %c0_i32_0 = arith.constant 0 : i32
    %c0_i32_1 = arith.constant 0 : i32
    return %c0_i32, %c0_i32_0 : i32, i32
  }
  func.func @transform_3(%arg0: i32) -> (i32, i32) {
    %c0_i32 = arith.constant 0 : i32
    %c0_i32_0 = arith.constant 0 : i32
    %c0_i32_1 = arith.constant 0 : i32
    return %c0_i32, %c0_i32_0 : i32, i32
  }
  func.func @transform_4(%arg0: i32) -> (i32, i32) {
    %c0_i32 = arith.constant 0 : i32
    %c0_i32_0 = arith.constant 0 : i32
    %c0_i32_1 = arith.constant 0 : i32
    return %c0_i32, %c0_i32_0 : i32, i32
  }
  func.func @transform_5(%arg0: i32) -> (i32, i32) {
    %c0_i32 = arith.constant 0 : i32
    %c0_i32_0 = arith.constant 0 : i32
    return %arg0, %c0_i32 : i32, i32
  }
}

</mosaic_0001>

<bundles_post_ra>
// kernel: adapter_forward.1
= control target key start
LH: loop header
LB: loop body
LE: loop exit
PB: predicated region body
PF: predicated region fallthrough
CT: control target
= control target key end

     0   :  { %10 = vsyncpa [#allocation3], 0  ;;  %s6925_s0 = inlined_call_operand.vmem [shape: bf16[16,512], index: 0, kind: input, shape index: {}]   ;;  %s6926_s1 = inlined_call_operand.hbm [shape: bf16[512,1024], index: 1, kind: input, shape index: {}]   ;;  %s6927_s2 = inlined_call_operand.vmem [shape: f32[1,1024], index: 2, kind: input, shape index: {}]   ;;  %s6928_s3 = inlined_call_operand.hbm [shape: bf16[256,768], index: 3, kind: input, shape index: {}]   ;;  %s6929_s4 = inlined_call_operand.vmem [shape: f32[3,768], index: 4, kind: input, shape index: {}]   ;;  %s6930_s5 = inlined_call_operand.hbm [shape: f32[16,768], index: 5, kind: output, shape index: {}]  }
   0x1   :  { %11 = vsyncpa [#allocation6], 0 }
   0x2   :  { %12 = vsyncpa [#allocation4], 0  ;;  %s19_s20 = sshll.u32 %s6926_s1, 4  ;;  %s5691_s21 = smov [#allocation2]   ;;  %s20_s20 = int_to_ptr.hbm [resolvable:$true] %s19_s20 }
   0x3   :  { %s21_s22 = sshll.u32 %s5691_s21, 4  ;;  %s34_s25 = sshll.u32 %s6928_s3, 4  ;;  %s22_s22 = int_to_ptr.vmem [resolvable:$true] %s21_s22  ;;  %s35_s25 = int_to_ptr.hbm [resolvable:$true] %s34_s25 }
   0x4   :  { %s5692_s26 = smov 512   ;;  %s5693_s27 = smov 32  }
   0x5   :  { %27 = dma.hbm_to_vmem [thread:$0]  %s20_s20, 32768, %s22_s22, [#allocation3], %s5692_s26, %s5692_s26, %s5693_s27  }
   0x6   :  { %s5694_s28 = smov [#allocation5]   ;;  %s5695_s30 = smov 384  }
   0x7   :  { %s36_s29 = sshll.u32 %s5694_s28, 4  ;;  %s5696_s6 = smov 24   ;;  %s37_s29 = int_to_ptr.vmem [resolvable:$true] %s36_s29 }
   0x8   :  { %42 = dma.hbm_to_vmem [thread:$0]  %s35_s25, 12288, %s37_s29, [#allocation6], %s5695_s30, %s5695_s30, %s5696_s6  }
   0x9   :  { %5685 = dma.done.wait [#allocation3], 32768  }
   0xa   :  { %5686 = vsyncadd [#allocation3], 4294934528 }
   0xb   :  { %5687 = dma.done.wait [#allocation6], 12288  }
   0xc   :  { %5688 = vsyncadd [#allocation6], 4294955008  ;;  %v4008_v0 = vld [vmem:[#allocation2 + $0x1c0] sm:$0xf]  ;;  %s3752_s1 = sshll.u32 %s6930_s5, 4  ;;  %s5699_s3 = smov 768   ;;  %s3753_s1 = int_to_ptr.hbm [resolvable:$true] %s3752_s1 }
   0xd   :  { %v5272_v1 = vld [vmem:[#allocation2 + $0x1dc] sm:$0xf0]  ;;  %s5700_s7 = smov 48  }
   0xe   :  { %v4264_v2 = vld [vmem:[#allocation2 + $0x3c0] sm:$0xf]  ;;  %v4009_v3 = vor.u32 %v5272_v1, %v4008_v0 }
   0xf   :  { %v5336_v4 = vld [vmem:[#allocation2 + $0x3dc] sm:$0xf0] }
  0x10   :  { %v4520_v5 = vld [vmem:[#allocation2 + $0x5c0] sm:$0xf]  ;;  %v4265_v7 = vor.u32 %v5336_v4, %v4264_v2  ;;  %1631 = vmatpush.bf16.msra.mxu0 %v4009_v3 }
  0x11   :  { %v5400_v6 = vld [vmem:[#allocation2 + $0x5dc] sm:$0xf0] }
  0x12   :  { %v4521_v8 = vor.u32 %v5400_v6, %v4520_v5  ;;  %v4776_v9 = vld [vmem:[#allocation2 + $0x7c0] sm:$0xf]  ;;  %1645 = vmatpush.bf16.msra.mxu1 %v4265_v7 }
  0x13   :  { %v5464_v10 = vld [vmem:[#allocation2 + $0x7dc] sm:$0xf0] }
  0x14   :  { %v3976_v11 = vld [vmem:[#allocation2 + $0x180] sm:$0xf]  ;;  %v4777_v12 = vor.u32 %v5464_v10, %v4776_v9  ;;  %1659 = vmatpush.bf16.msra.mxu2 %v4521_v8 }
  0x15   :  { %v5264_v13 = vld [vmem:[#allocation2 + $0x19c] sm:$0xf0] }
  0x16   :  { %v4232_v14 = vld [vmem:[#allocation2 + $0x380] sm:$0xf]  ;;  %v3977_v16 = vor.u32 %v5264_v13, %v3976_v11  ;;  %1673 = vmatpush.bf16.msra.mxu3 %v4777_v12 }
  0x17   :  { %v5328_v15 = vld [vmem:[#allocation2 + $0x39c] sm:$0xf0] }
  0x18   :  { %v4233_v17 = vor.u32 %v5328_v15, %v4232_v14  ;;  %v4488_v18 = vld [vmem:[#allocation2 + $0x580] sm:$0xf]  ;;  %1632 = vmatpush.bf16.msra.mxu0 %v3977_v16 }
  0x19   :  { %v5392_v19 = vld [vmem:[#allocation2 + $0x59c] sm:$0xf0] }
  0x1a   :  { %v4744_v20 = vld [vmem:[#allocation2 + $0x780] sm:$0xf]  ;;  %v4489_v21 = vor.u32 %v5392_v19, %v4488_v18  ;;  %1646 = vmatpush.bf16.msra.mxu1 %v4233_v17 }
  0x1b   :  { %v5456_v22 = vld [vmem:[#allocation2 + $0x79c] sm:$0xf0] }
  0x1c   :  { %v3944_v23 = vld [vmem:[#allocation2 + $0x140] sm:$0xf]  ;;  %v4745_v25 = vor.u32 %v5456_v22, %v4744_v20  ;;  %1660 = vmatpush.bf16.msra.mxu2 %v4489_v21 }
  0x1d   :  { %v5256_v24 = vld [vmem:[#allocation2 + $0x15c] sm:$0xf0] }
  0x1e   :  { %v4200_v26 = vld [vmem:[#allocation2 + $0x340] sm:$0xf]  ;;  %v3945_v29 = vor.u32 %v5256_v24, %v3944_v23  ;;  %1674 = vmatpush.bf16.msra.mxu3 %v4745_v25 }
  0x1f   :  { %v5320_v27 = vld [vmem:[#allocation2 + $0x35c] sm:$0xf0] }
  0x20   :  { %v4456_v28 = vld [vmem:[#allocation2 + $0x540] sm:$0xf]  ;;  %v4201_v33 = vor.u32 %v5320_v27, %v4200_v26  ;;  %1633 = vmatpush.bf16.msra.mxu0 %v3945_v29  ;;  %v5268_v27 = vld [vmem:[#allocation2 + $0x1c4] sm:$0xf] }
  0x21   :  { %v5384_v30 = vld [vmem:[#allocation2 + $0x55c] sm:$0xf0]  ;;  %v4010_v29 = vld [vmem:[#allocation2 + $0x1e0] sm:$0xf0] }
  0x22   :  { %v4712_v31 = vld [vmem:[#allocation2 + $0x740] sm:$0xf]  ;;  %v4457_v34 = vor.u32 %v5384_v30, %v4456_v28  ;;  %1647 = vmatpush.bf16.msra.mxu1 %v4201_v33  ;;  %v5332_v30 = vld [vmem:[#allocation2 + $0x3c4] sm:$0xf] }
  0x23   :  { %v5448_v32 = vld [vmem:[#allocation2 + $0x75c] sm:$0xf0]  ;;  %v4522_v33 = vld [vmem:[#allocation2 + $0x5e0] sm:$0xf0] }
  0x24   :  { %v3912_v35 = vld [vmem:[#allocation2 + $0x100] sm:$0xf]  ;;  %v4713_v38 = vor.u32 %v5448_v32, %v4712_v31  ;;  %1661 = vmatpush.bf16.msra.mxu2 %v4457_v34  ;;  %v4266_v31 = vld [vmem:[#allocation2 + $0x3e0] sm:$0xf0] }
  0x25   :  { %v5248_v36 = vld [vmem:[#allocation2 + $0x11c] sm:$0xf0]  ;;  %v5396_v32 = vld [vmem:[#allocation2 + $0x5c4] sm:$0xf] }
  0x26   :  { %v4168_v37 = vld [vmem:[#allocation2 + $0x300] sm:$0xf]  ;;  %v3913_v44 = vor.u32 %v5248_v36, %v3912_v35  ;;  %1675 = vmatpush.bf16.msra.mxu3 %v4713_v38  ;;  %v5460_v34 = vld [vmem:[#allocation2 + $0x7c4] sm:$0xf]  ;;  %v5211_v38 = vld [vmem:[%s6925_s0 + $0x14] sm:$0xf0] }
  0x27   :  { %v5312_v39 = vld [vmem:[#allocation2 + $0x31c] sm:$0xf0]  ;;  %v4778_v36 = vld [vmem:[#allocation2 + $0x7e0] sm:$0xf0] }
  0x28   :  { %v4424_v40 = vld [vmem:[#allocation2 + $0x500] sm:$0xf]  ;;  %v4169_v45 = vor.u32 %v5312_v39, %v4168_v37  ;;  %1634 = vmatpush.bf16.msra.mxu0 %v3913_v44  ;;  %v3776_v37 = vld [vmem:[%s6925_s0 + $0x8] sm:$0xf] }
  0x29   :  { %v5376_v41 = vld [vmem:[#allocation2 + $0x51c] sm:$0xf0] }
  0x2a   :  { %v4680_v42 = vld [vmem:[#allocation2 + $0x700] sm:$0xf]  ;;  %v4425_v46 = vor.u32 %v5376_v41, %v4424_v40  ;;  %1648 = vmatpush.bf16.msra.mxu1 %v4169_v45  ;;  %v4013_v45 = vor.u32 %v5268_v27, %v4010_v29  ;;  %v5236_v27 = vld [vmem:[#allocation2 + $0xc4] sm:$0xf] }
  0x2b   :  { %v5440_v43 = vld [vmem:[#allocation2 + $0x71c] sm:$0xf0]  ;;  %v5300_v29 = vld [vmem:[#allocation2 + $0x2c4] sm:$0xf] }
  0x2c   :  { %v3880_v47 = vld [vmem:[#allocation2 + $0xc0] sm:$0xf]  ;;  %v4681_v50 = vor.u32 %v5440_v43, %v4680_v42  ;;  %1662 = vmatpush.bf16.msra.mxu2 %v4425_v46  ;;  %v5210_v42 = vld [vmem:[%s6925_s0 + $0xc] sm:$0xf0]  ;;  %v5209_v43 = vld [vmem:[%s6925_s0 + $0xc] sm:$0xf] }
  0x2d   :  { %v5240_v48 = vld [vmem:[#allocation2 + $0xdc] sm:$0xf0]  ;;  %v3778_v46 = vld [vmem:[%s6925_s0 + $0x18] sm:$0xf0] }
  0x2e   :  { %v4136_v49 = vld [vmem:[#allocation2 + $0x2c0] sm:$0xf]  ;;  %v3881_v56 = vor.u32 %v5240_v48, %v3880_v47  ;;  %1676 = vmatpush.bf16.msra.mxu3 %v4681_v50  ;;  %v5260_v47 = vld [vmem:[#allocation2 + $0x184] sm:$0xf]  ;;  %v4525_v50 = vor.u32 %v5396_v32, %v4522_v33 }
  0x2f   :  { %v5304_v51 = vld [vmem:[#allocation2 + $0x2dc] sm:$0xf0]  ;;  %v3978_v48 = vld [vmem:[#allocation2 + $0x1a0] sm:$0xf0] }
  0x30   :  { %v4392_v52 = vld [vmem:[#allocation2 + $0x4c0] sm:$0xf]  ;;  %v4137_v57 = vor.u32 %v5304_v51, %v4136_v49  ;;  %1635 = vmatpush.bf16.msra.mxu0 %v3881_v56  ;;  %v4269_v49 = vor.u32 %v5332_v30, %v4266_v31  ;;  %v5324_v51 = vld [vmem:[#allocation2 + $0x384] sm:$0xf] }
  0x31   :  { %v5368_v53 = vld [vmem:[#allocation2 + $0x4dc] sm:$0xf0]  ;;  %v4234_v56 = vld [vmem:[#allocation2 + $0x3a0] sm:$0xf0] }
  0x32   :  { %v4648_v54 = vld [vmem:[#allocation2 + $0x6c0] sm:$0xf]  ;;  %v4393_v58 = vor.u32 %v5368_v53, %v4392_v52  ;;  %1649 = vmatpush.bf16.msra.mxu1 %v4137_v57  ;;  %v5208_v52 = vld [vmem:[%s6925_s0 + $0x4] sm:$0xf]  ;;  %v3770_v53 = vld [vmem:[%s6925_s0 + $0x10] sm:$0xf0] }
  0x33   :  { %v5432_v55 = vld [vmem:[#allocation2 + $0x6dc] sm:$0xf0]  ;;  %v5388_v57 = vld [vmem:[#allocation2 + $0x584] sm:$0xf] }
  0x34   :  { %v3848_v59 = vld [vmem:[#allocation2 + $0x80] sm:$0xf]  ;;  %v4649_v62 = vor.u32 %v5432_v55, %v4648_v54  ;;  %1663 = vmatpush.bf16.msra.mxu2 %v4393_v58  ;;  %v4781_v54 = vor.u32 %v5460_v34, %v4778_v36  ;;  %v5761_v55 = vor.u32 %v5211_v38, %v3776_v37  ;;  %v4490_v58 = vld [vmem:[#allocation2 + $0x5a0] sm:$0xf0] }
  0x35   :  { %v5232_v60 = vld [vmem:[#allocation2 + $0x9c] sm:$0xf0]  ;;  %v4138_v31 = vld [vmem:[#allocation2 + $0x2e0] sm:$0xf0] }
  0x36   :  { %v4104_v61 = vld [vmem:[#allocation2 + $0x280] sm:$0xf]  ;;  %v3849_v4 = vor.u32 %v5232_v60, %v3848_v59  ;;  %1677 = vmatpush.bf16.msra.mxu3 %v4649_v62  ;;  %v5765_v60 = vor.u32 %v5209_v43, %v3778_v46  ;;  %v4746_v62 = vld [vmem:[#allocation2 + $0x7a0] sm:$0xf0]  ;;  %v4141_v37 = vor.u32 %v5300_v29, %v4138_v31  ;;  %v4240_v29 = vld [vmem:[#allocation2 + $0x388] sm:$0xf] }
  0x37   :  { %v5296_v63 = vld [vmem:[#allocation2 + $0x29c] sm:$0xf0]  ;;  %v5364_v32 = vld [vmem:[#allocation2 + $0x4c4] sm:$0xf]  ;;  %v5329_v31 = vld [vmem:[#allocation2 + $0x3a4] sm:$0xf0] }
  0x38   :  { %v4360_v0 = vld [vmem:[#allocation2 + $0x480] sm:$0xf]  ;;  %v4105_v6 = vor.u32 %v5296_v63, %v4104_v61  ;;  %1636 = vmatpush.bf16.msra.mxu0 %v3849_v4  ;;  %v5452_v61 = vld [vmem:[#allocation2 + $0x784] sm:$0xf]  ;;  %v3981_v63 = vor.u32 %v5260_v47, %v3978_v48 }
  0x39   :  { %v5360_v1 = vld [vmem:[#allocation2 + $0x49c] sm:$0xf0]  ;;  %v3946_v4 = vld [vmem:[#allocation2 + $0x160] sm:$0xf0] }
  0x3a   :  { %v4616_v2 = vld [vmem:[#allocation2 + $0x680] sm:$0xf]  ;;  %v4361_v7 = vor.u32 %v5360_v1, %v4360_v0  ;;  %1650 = vmatpush.bf16.msra.mxu1 %v4105_v6  ;;  %v5767_v0 = vor.u32 %v5208_v52, %v3770_v53  ;;  %v4237_v1 = vor.u32 %v5324_v51, %v4234_v56  ;;  %v4749_v6 = vor.u32 %v5452_v61, %v4746_v62  ;;  %v4394_v33 = vld [vmem:[#allocation2 + $0x4e0] sm:$0xf0] }
  0x3b   :  { %v5424_v3 = vld [vmem:[#allocation2 + $0x69c] sm:$0xf0]  ;;  %v5428_v34 = vld [vmem:[#allocation2 + $0x6c4] sm:$0xf]  ;;  %v4397_v38 = vor.u32 %v5364_v32, %v4394_v33  ;;  %v4496_v32 = vld [vmem:[#allocation2 + $0x588] sm:$0xf] }
  0x3c   :  { %v3816_v5 = vld [vmem:[#allocation2 + $0x40] sm:$0xf]  ;;  %v4617_v11 = vor.u32 %v5424_v3, %v4616_v2  ;;  %1664 = vmatpush.bf16.msra.mxu2 %v4361_v7  ;;  %v4493_v2 = vor.u32 %v5388_v57, %v4490_v58  ;;  %v5252_v3 = vld [vmem:[#allocation2 + $0x144] sm:$0xf]  ;;  %v5393_v33 = vld [vmem:[#allocation2 + $0x5a4] sm:$0xf0] }
  0x3d   :  { %v5224_v8 = vld [vmem:[#allocation2 + $0x5c] sm:$0xf0]  ;;  %v4202_v7 = vld [vmem:[#allocation2 + $0x360] sm:$0xf0] }
  0x3e   :  { %v4072_v9 = vld [vmem:[#allocation2 + $0x240] sm:$0xf]  ;;  %v3817_v18 = vor.u32 %v5224_v8, %v3816_v5  ;;  %1678 = vmatpush.bf16.msra.mxu3 %v4617_v11  ;;  %v5316_v5 = vld [vmem:[#allocation2 + $0x344] sm:$0xf] }
  0x3f   :  { %v5288_v10 = vld [vmem:[#allocation2 + $0x25c] sm:$0xf0]  ;;  %v5380_v8 = vld [vmem:[#allocation2 + $0x544] sm:$0xf] }
  0x40   :  { %v4328_v12 = vld [vmem:[#allocation2 + $0x440] sm:$0xf]  ;;  %v4073_v23 = vor.u32 %v5288_v10, %v4072_v9  ;;  %1637 = vmatpush.bf16.msra.mxu0 %v3817_v18  ;;  %v4458_v9 = vld [vmem:[#allocation2 + $0x560] sm:$0xf0] }
  0x41   :  { %v5352_v13 = vld [vmem:[#allocation2 + $0x45c] sm:$0xf0]  ;;  %v5444_v10 = vld [vmem:[#allocation2 + $0x744] sm:$0xf] }
  0x42   :  { %v4584_v14 = vld [vmem:[#allocation2 + $0x640] sm:$0xf]  ;;  %v4329_v24 = vor.u32 %v5352_v13, %v4328_v12  ;;  %1651 = vmatpush.bf16.msra.mxu1 %v4073_v23  ;;  %v4714_v11 = vld [vmem:[#allocation2 + $0x760] sm:$0xf0]  ;;  %v3949_v12 = vor.u32 %v5252_v3, %v3946_v4  ;;  %v4205_v13 = vor.u32 %v5316_v5, %v4202_v7 }
  0x43   :  { %v5416_v15 = vld [vmem:[#allocation2 + $0x65c] sm:$0xf0]  ;;  %v4717_v18 = vor.u32 %v5444_v10, %v4714_v11  ;;  %v4682_v23 = vld [vmem:[#allocation2 + $0x720] sm:$0xf0] }
  0x44   :  { %v3784_v16 = vld [vmem:[#allocation2] sm:$0xf]  ;;  %v4585_v28 = vor.u32 %v5416_v15, %v4584_v14  ;;  %1665 = vmatpush.bf16.msra.mxu2 %v4329_v24  ;;  %v4461_v14 = vor.u32 %v5380_v8, %v4458_v9  ;;  %v5244_v15 = vld [vmem:[#allocation2 + $0x104] sm:$0xf] }
  0x45   :  { %v5216_v17 = vld [vmem:[#allocation2 + $0x1c] sm:$0xf0]  ;;  %v4106_v43 = vld [vmem:[#allocation2 + $0x2a0] sm:$0xf0] }
  0x46   :  { %v4040_v19 = vld [vmem:[#allocation2 + $0x200] sm:$0xf]  ;;  %v3785_v35 = vor.u32 %v5216_v17, %v3784_v16  ;;  %1679 = vmatpush.bf16.msra.mxu3 %v4585_v28  ;;  %v3914_v16 = vld [vmem:[#allocation2 + $0x120] sm:$0xf0] }
  0x47   :  { %v5280_v20 = vld [vmem:[#allocation2 + $0x21c] sm:$0xf0]  ;;  %v5308_v17 = vld [vmem:[#allocation2 + $0x304] sm:$0xf]  ;;  %v3917_v24 = vor.u32 %v5244_v15, %v3914_v16  ;;  %v5337_v16 = vld [vmem:[#allocation2 + $0x3e4] sm:$0xf0] }
  0x48   :  { %v4296_v21 = vld [vmem:[#allocation2 + $0x400] sm:$0xf]  ;;  %v4041_v39 = vor.u32 %v5280_v20, %v4040_v19  ;;  %1638 = vmatpush.bf16.msra.mxu0 %v3785_v35  ;;  %v4170_v19 = vld [vmem:[#allocation2 + $0x320] sm:$0xf0] }
  0x49   :  { %v5344_v22 = vld [vmem:[#allocation2 + $0x41c] sm:$0xf0]  ;;  %v5372_v20 = vld [vmem:[#allocation2 + $0x504] sm:$0xf] }
  0x4a   :  { %v4552_v25 = vld [vmem:[#allocation2 + $0x600] sm:$0xf]  ;;  %v4297_v40 = vor.u32 %v5344_v22, %v4296_v21  ;;  %1652 = vmatpush.bf16.msra.mxu1 %v4041_v39  ;;  %v4426_v21 = vld [vmem:[#allocation2 + $0x520] sm:$0xf0] }
  0x4b   :  { %v5408_v26 = vld [vmem:[#allocation2 + $0x61c] sm:$0xf0]  ;;  %v5436_v22 = vld [vmem:[#allocation2 + $0x704] sm:$0xf] }
  0x4c   :  { %v3768_v41 = vld [vmem:[%s6925_s0] sm:$0xf]  ;;  %v4553_v44 = vor.u32 %v5408_v26, %v4552_v25  ;;  %1666 = vmatpush.bf16.msra.mxu2 %v4297_v40  ;;  %1687 = vmatpush.bf16.msrb.mxu0 %v4013_v45  ;;  %v4173_v25 = vor.u32 %v5308_v17, %v4170_v19  ;;  %v4429_v26 = vor.u32 %v5372_v20, %v4426_v21  ;;  %v3882_v28 = vld [vmem:[#allocation2 + $0xe0] sm:$0xf0]  ;;  %v4528_v17 = vld [vmem:[#allocation2 + $0x5c8] sm:$0xf] }
  0x4d   :  { %v5763_v59 = vor.u32 %v5210_v42, %v3768_v41  ;;  %1653 = vmatmul.bf16.vlgmr.msra.gmra.mxu1 %v5767_v0  ;;  %v4685_v30 = vor.u32 %v5436_v22, %v4682_v23  ;;  %v4650_v35 = vld [vmem:[#allocation2 + $0x6e0] sm:$0xf0]  ;;  %v3885_v36 = vor.u32 %v5236_v27, %v3882_v28  ;;  %v4784_v21 = vld [vmem:[#allocation2 + $0x7c8] sm:$0xf] }
  0x4e   :  { %1680 = vmatpush.bf16.msra.mxu3 %v4553_v44  ;;  %1701 = vmatpush.bf16.msrb.mxu1 %v4269_v49  ;;  %v5228_v39 = vld [vmem:[#allocation2 + $0x84] sm:$0xf]  ;;  %v4653_v42 = vor.u32 %v5428_v34, %v4650_v35  ;;  %v5465_v22 = vld [vmem:[#allocation2 + $0x7e4] sm:$0xf0] }
  0x4f   :  { %1667 = vmatmul.bf16.vlgmr.msra.gmra.mxu2 %v5761_v55  ;;  %1639 = vmatmul.bf16.vlgmr.msra.gmra.mxu0 %v5763_v59  ;;  %v3850_v40 = vld [vmem:[#allocation2 + $0xa0] sm:$0xf0]  ;;  %v3984_v27 = vld [vmem:[#allocation2 + $0x188] sm:$0xf] }
  0x50   :  { %1715 = vmatpush.bf16.msrb.mxu2 %v4525_v50  ;;  %1688 = vmatpush.bf16.msrb.mxu0 %v3981_v63  ;;  %v5292_v41 = vld [vmem:[#allocation2 + $0x284] sm:$0xf]  ;;  %v3853_v48 = vor.u32 %v5228_v39, %v3850_v40  ;;  %v5265_v28 = vld [vmem:[#allocation2 + $0x1a4] sm:$0xf0] }
  0x51   :  { %1681 = vmatmul.bf16.vlgmr.msra.gmra.mxu3 %v5765_v60  ;;  %v5356_v44 = vld [vmem:[#allocation2 + $0x484] sm:$0xf]  ;;  %v4109_v49 = vor.u32 %v5292_v41, %v4106_v43  ;;  %v4752_v34 = vld [vmem:[#allocation2 + $0x788] sm:$0xf] }
  0x52   :  { %1729 = vmatpush.bf16.msrb.mxu3 %v4781_v54  ;;  %1702 = vmatpush.bf16.msrb.mxu1 %v4237_v1  ;;  %v4362_v45 = vld [vmem:[#allocation2 + $0x4a0] sm:$0xf0]  ;;  %v5457_v35 = vld [vmem:[#allocation2 + $0x7a4] sm:$0xf0] }
  0x53   :  { %v5420_v46 = vld [vmem:[#allocation2 + $0x684] sm:$0xf]  ;;  %v4365_v50 = vor.u32 %v5356_v44, %v4362_v45  ;;  %v3952_v39 = vld [vmem:[#allocation2 + $0x148] sm:$0xf] }
  0x54   :  { %1716 = vmatpush.bf16.msrb.mxu2 %v4493_v2  ;;  %1689 = vmatpush.bf16.msrb.mxu0 %v3949_v12  ;;  %v4618_v47 = vld [vmem:[#allocation2 + $0x6a0] sm:$0xf0]  ;;  %v4016_v12 = vld [vmem:[#allocation2 + $0x1c8] sm:$0xf] }
  0x55   :  { %v5220_v51 = vld [vmem:[#allocation2 + $0x44] sm:$0xf]  ;;  %v4621_v54 = vor.u32 %v5420_v46, %v4618_v47  ;;  %v5257_v40 = vld [vmem:[#allocation2 + $0x164] sm:$0xf0] }
  0x56   :  { %1730 = vmatpush.bf16.msrb.mxu3 %v4749_v6  ;;  %1703 = vmatpush.bf16.msrb.mxu1 %v4205_v13  ;;  %v3818_v52 = vld [vmem:[#allocation2 + $0x60] sm:$0xf0]  ;;  %v5273_v13 = vld [vmem:[#allocation2 + $0x1e4] sm:$0xf0] }
  0x57   :  { %v5284_v53 = vld [vmem:[#allocation2 + $0x244] sm:$0xf]  ;;  %v3821_v63 = vor.u32 %v5220_v51, %v3818_v52  ;;  %v4208_v41 = vld [vmem:[#allocation2 + $0x348] sm:$0xf] }
  0x58   :  { %1717 = vmatpush.bf16.msrb.mxu2 %v4461_v14  ;;  %1690 = vmatpush.bf16.msrb.mxu0 %v3917_v24  ;;  %v4074_v56 = vld [vmem:[#allocation2 + $0x260] sm:$0xf0]  ;;  %v4272_v14 = vld [vmem:[#allocation2 + $0x3c8] sm:$0xf]  ;;  %v4017_v24 = vor.u32 %v5273_v13, %v4016_v12 }
  0x59   :  { %v5348_v57 = vld [vmem:[#allocation2 + $0x444] sm:$0xf]  ;;  %v4077_v3 = vor.u32 %v5284_v53, %v4074_v56  ;;  %v5321_v43 = vld [vmem:[#allocation2 + $0x364] sm:$0xf0] }
  0x5a   :  { %1731 = vmatpush.bf16.msrb.mxu3 %v4717_v18  ;;  %1704 = vmatpush.bf16.msrb.mxu1 %v4173_v25  ;;  %v4330_v58 = vld [vmem:[#allocation2 + $0x460] sm:$0xf0]  ;;  %v5401_v18 = vld [vmem:[#allocation2 + $0x5e4] sm:$0xf0]  ;;  %v4273_v25 = vor.u32 %v5337_v16, %v4272_v14 }
  0x5b   :  { %v5412_v61 = vld [vmem:[#allocation2 + $0x644] sm:$0xf]  ;;  %v4333_v4 = vor.u32 %v5348_v57, %v4330_v58  ;;  %v4464_v44 = vld [vmem:[#allocation2 + $0x548] sm:$0xf] }
  0x5c   :  { %1718 = vmatpush.bf16.msrb.mxu2 %v4429_v26  ;;  %1691 = vmatpush.bf16.msrb.mxu0 %v3885_v36  ;;  %v4586_v62 = vld [vmem:[#allocation2 + $0x660] sm:$0xf0]  ;;  %v4529_v26 = vor.u32 %v5401_v18, %v4528_v17  ;;  %v3985_v36 = vor.u32 %v5265_v28, %v3984_v27  ;;  %v5385_v45 = vld [vmem:[#allocation2 + $0x564] sm:$0xf0] }
  0x5d   :  { %v5212_v1 = vld [vmem:[#allocation2 + $0x4] sm:$0xf]  ;;  %v4589_v8 = vor.u32 %v5412_v61, %v4586_v62  ;;  %v4720_v46 = vld [vmem:[#allocation2 + $0x748] sm:$0xf] }
  0x5e   :  { %1732 = vmatpush.bf16.msrb.mxu3 %v4685_v30  ;;  %1705 = vmatpush.bf16.msrb.mxu1 %v4141_v37  ;;  %v3786_v2 = vld [vmem:[#allocation2 + $0x20] sm:$0xf0]  ;;  %v4785_v30 = vor.u32 %v5465_v22, %v4784_v21  ;;  %v4241_v37 = vor.u32 %v5329_v31, %v4240_v29  ;;  %v5449_v47 = vld [vmem:[#allocation2 + $0x764] sm:$0xf0] }
  0x5f   :  { %v5276_v5 = vld [vmem:[#allocation2 + $0x204] sm:$0xf]  ;;  %v3789_v15 = vor.u32 %v5212_v1, %v3786_v2  ;;  %v3920_v51 = vld [vmem:[#allocation2 + $0x108] sm:$0xf] }
  0x60   :  { %1719 = vmatpush.bf16.msrb.mxu2 %v4397_v38  ;;  %1692 = vmatpush.bf16.msrb.mxu0 %v3853_v48  ;;  %v4042_v6 = vld [vmem:[#allocation2 + $0x220] sm:$0xf0]  ;;  %v4497_v38 = vor.u32 %v5393_v33, %v4496_v32  ;;  %v3953_v48 = vor.u32 %v5257_v40, %v3952_v39  ;;  %v5249_v52 = vld [vmem:[#allocation2 + $0x124] sm:$0xf0] }
  0x61   :  { %v5340_v7 = vld [vmem:[#allocation2 + $0x404] sm:$0xf]  ;;  %v4045_v19 = vor.u32 %v5276_v5, %v4042_v6  ;;  %v4176_v53 = vld [vmem:[#allocation2 + $0x308] sm:$0xf] }
  0x62   :  { %1733 = vmatpush.bf16.msrb.mxu3 %v4653_v42  ;;  %1706 = vmatpush.bf16.msrb.mxu1 %v4109_v49  ;;  %v4298_v9 = vld [vmem:[#allocation2 + $0x420] sm:$0xf0]  ;;  %v4753_v42 = vor.u32 %v5457_v35, %v4752_v34  ;;  %v4209_v49 = vor.u32 %v5321_v43, %v4208_v41  ;;  %v5313_v56 = vld [vmem:[#allocation2 + $0x324] sm:$0xf0] }
  0x63   :  { %v5404_v10 = vld [vmem:[#allocation2 + $0x604] sm:$0xf]  ;;  %v4301_v20 = vor.u32 %v5340_v7, %v4298_v9  ;;  %v4432_v57 = vld [vmem:[#allocation2 + $0x508] sm:$0xf]  ;;  %v4177_v1 = vor.u32 %v5313_v56, %v4176_v53  ;;  %v5397_v53 = vld [vmem:[#allocation2 + $0x5cc] sm:$0xf] }
  0x64   :  { %1720 = vmatpush.bf16.msrb.mxu2 %v4365_v50  ;;  %v4554_v11 = vld [vmem:[#allocation2 + $0x620] sm:$0xf0]  ;;  %1693 = vmatpush.bf16.msrb.mxu0 %v3821_v63  ;;  %v4465_v50 = vor.u32 %v5385_v45, %v4464_v44  ;;  %v5377_v58 = vld [vmem:[#allocation2 + $0x524] sm:$0xf0]  ;;  %v3921_v63 = vor.u32 %v5249_v52, %v3920_v51  ;;  %v4274_v52 = vld [vmem:[#allocation2 + $0x3e8] sm:$0xf0] }
  0x65   :  { %v4557_v23 = vor.u32 %v5404_v10, %v4554_v11  ;;  %v4688_v61 = vld [vmem:[#allocation2 + $0x708] sm:$0xf]  ;;  %v4433_v2 = vor.u32 %v5377_v58, %v4432_v57  ;;  %v5461_v58 = vld [vmem:[#allocation2 + $0x7cc] sm:$0xf] }
  0x66   :  { %1734 = vmatpush.bf16.msrb.mxu3 %v4621_v54  ;;  %1707 = vmatpush.bf16.msrb.mxu1 %v4077_v3  ;;  %v4721_v54 = vor.u32 %v5449_v47, %v4720_v46  ;;  %v5441_v62 = vld [vmem:[#allocation2 + $0x724] sm:$0xf0] }
  0x67   :  { %v3888_v3 = vld [vmem:[#allocation2 + $0xc8] sm:$0xf]  ;;  %v4689_v6 = vor.u32 %v5441_v62, %v4688_v61  ;;  %v4786_v61 = vld [vmem:[#allocation2 + $0x7e8] sm:$0xf0] }
  0x68   :  { %1721 = vmatpush.bf16.msrb.mxu2 %v4333_v4  ;;  %1694 = vmatpush.bf16.msrb.mxu0 %v3789_v15  ;;  %v5241_v4 = vld [vmem:[#allocation2 + $0xe4] sm:$0xf0] }
  0x69   :  { %v4144_v5 = vld [vmem:[#allocation2 + $0x2c8] sm:$0xf]  ;;  %v3889_v12 = vor.u32 %v5241_v4, %v3888_v3  ;;  %v5261_v3 = vld [vmem:[#allocation2 + $0x18c] sm:$0xf] }
  0x6a   :  { %1735 = vmatpush.bf16.msrb.mxu3 %v4589_v8  ;;  %1708 = vmatpush.bf16.msrb.mxu1 %v4045_v19  ;;  %v5305_v7 = vld [vmem:[#allocation2 + $0x2e4] sm:$0xf0]  ;;  %v3986_v4 = vld [vmem:[#allocation2 + $0x1a8] sm:$0xf0] }
  0x6b   :  { %1695 = vmatmul.bf16.vlgmr.msrb.gmra.mxu0 %v5763_v59  ;;  %v4400_v8 = vld [vmem:[#allocation2 + $0x4c8] sm:$0xf]  ;;  %v4145_v13 = vor.u32 %v5305_v7, %v4144_v5  ;;  %v5325_v5 = vld [vmem:[#allocation2 + $0x38c] sm:$0xf] }
  0x6c   :  { %1722 = vmatpush.bf16.msrb.mxu2 %v4301_v20  ;;  %1743 = vmatpush.bf16.msra.mxu0 %v4017_v24  ;;  %v5369_v9 = vld [vmem:[#allocation2 + $0x4e4] sm:$0xf0]  ;;  %v4242_v7 = vld [vmem:[#allocation2 + $0x3a8] sm:$0xf0] }
  0x6d   :  { %1709 = vmatmul.bf16.vlgmr.msrb.gmra.mxu1 %v5767_v0  ;;  %v4656_v10 = vld [vmem:[#allocation2 + $0x6c8] sm:$0xf]  ;;  %v4401_v14 = vor.u32 %v5369_v9, %v4400_v8  ;;  %v5389_v8 = vld [vmem:[#allocation2 + $0x58c] sm:$0xf] }
  0x6e   :  { %1736 = vmatpush.bf16.msrb.mxu3 %v4557_v23  ;;  %1757 = vmatpush.bf16.msra.mxu1 %v4273_v25  ;;  %v5433_v11 = vld [vmem:[#allocation2 + $0x6e4] sm:$0xf0]  ;;  %v4498_v9 = vld [vmem:[#allocation2 + $0x5a8] sm:$0xf0] }
  0x6f   :  { %1723 = vmatmul.bf16.vlgmr.msrb.gmra.mxu2 %v5761_v55  ;;  %v3856_v15 = vld [vmem:[#allocation2 + $0x88] sm:$0xf]  ;;  %v4657_v18 = vor.u32 %v5433_v11, %v4656_v10  ;;  %v5453_v10 = vld [vmem:[#allocation2 + $0x78c] sm:$0xf] }
  0x70   :  { %1771 = vmatpush.bf16.msra.mxu2 %v4529_v26  ;;  %1744 = vmatpush.bf16.msra.mxu0 %v3985_v36  ;;  %v5233_v16 = vld [vmem:[#allocation2 + $0xa4] sm:$0xf0]  ;;  %v4754_v11 = vld [vmem:[#allocation2 + $0x7a8] sm:$0xf0] }
  0x71   :  { %1737 = vmatmul.bf16.vlgmr.msrb.gmra.mxu3 %v5765_v60  ;;  %v4112_v17 = vld [vmem:[#allocation2 + $0x288] sm:$0xf]  ;;  %v3857_v24 = vor.u32 %v5233_v16, %v3856_v15  ;;  %v5253_v15 = vld [vmem:[#allocation2 + $0x14c] sm:$0xf] }
  0x72   :  { %1785 = vmatpush.bf16.msra.mxu3 %v4785_v30  ;;  %1758 = vmatpush.bf16.msra.mxu1 %v4241_v37  ;;  %v5297_v19 = vld [vmem:[#allocation2 + $0x2a4] sm:$0xf0]  ;;  %v3954_v16 = vld [vmem:[#allocation2 + $0x168] sm:$0xf0] }
  0x73   :  { %v4368_v20 = vld [vmem:[#allocation2 + $0x488] sm:$0xf]  ;;  %v4113_v25 = vor.u32 %v5297_v19, %v4112_v17  ;;  %v5317_v17 = vld [vmem:[#allocation2 + $0x34c] sm:$0xf] }
  0x74   :  { %1772 = vmatpush.bf16.msra.mxu2 %v4497_v38  ;;  %1745 = vmatpush.bf16.msra.mxu0 %v3953_v48  ;;  %v5361_v21 = vld [vmem:[#allocation2 + $0x4a4] sm:$0xf0]  ;;  %v5269_v48 = vld [vmem:[#allocation2 + $0x1cc] sm:$0xf] }
  0x75   :  { %v4624_v22 = vld [vmem:[#allocation2 + $0x688] sm:$0xf]  ;;  %v4369_v26 = vor.u32 %v5361_v21, %v4368_v20  ;;  %v4210_v19 = vld [vmem:[#allocation2 + $0x368] sm:$0xf0] }
  0x76   :  { %1786 = vmatpush.bf16.msra.mxu3 %v4753_v42  ;;  %1759 = vmatpush.bf16.msra.mxu1 %v4209_v49  ;;  %v5425_v23 = vld [vmem:[#allocation2 + $0x6a4] sm:$0xf0]  ;;  %v4018_v49 = vld [vmem:[#allocation2 + $0x1e8] sm:$0xf0] }
  0x77   :  { %v3824_v27 = vld [vmem:[#allocation2 + $0x48] sm:$0xf]  ;;  %v4625_v30 = vor.u32 %v5425_v23, %v4624_v22  ;;  %v5381_v20 = vld [vmem:[#allocation2 + $0x54c] sm:$0xf] }
  0x78   :  { %1773 = vmatpush.bf16.msra.mxu2 %v4465_v50  ;;  %1746 = vmatpush.bf16.msra.mxu0 %v3921_v63  ;;  %v5225_v28 = vld [vmem:[#allocation2 + $0x64] sm:$0xf0]  ;;  %v5333_v50 = vld [vmem:[#allocation2 + $0x3cc] sm:$0xf]  ;;  %v4021_v63 = vor.u32 %v5269_v48, %v4018_v49 }
  0x79   :  { %v4080_v29 = vld [vmem:[#allocation2 + $0x248] sm:$0xf]  ;;  %v3825_v36 = vor.u32 %v5225_v28, %v3824_v27  ;;  %v4466_v21 = vld [vmem:[#allocation2 + $0x568] sm:$0xf0] }
  0x7a   :  { %1787 = vmatpush.bf16.msra.mxu3 %v4721_v54  ;;  %1760 = vmatpush.bf16.msra.mxu1 %v4177_v1  ;;  %v5289_v31 = vld [vmem:[#allocation2 + $0x264] sm:$0xf0]  ;;  %v4530_v54 = vld [vmem:[#allocation2 + $0x5e8] sm:$0xf0]  ;;  %v4277_v1 = vor.u32 %v5333_v50, %v4274_v52 }
  0x7b   :  { %v4336_v32 = vld [vmem:[#allocation2 + $0x448] sm:$0xf]  ;;  %v4081_v39 = vor.u32 %v5289_v31, %v4080_v29  ;;  %v5445_v22 = vld [vmem:[#allocation2 + $0x74c] sm:$0xf] }
  0x7c   :  { %1774 = vmatpush.bf16.msra.mxu2 %v4433_v2  ;;  %1747 = vmatpush.bf16.msra.mxu0 %v3889_v12  ;;  %v5353_v33 = vld [vmem:[#allocation2 + $0x464] sm:$0xf0]  ;;  %v4533_v2 = vor.u32 %v5397_v53, %v4530_v54  ;;  %v3989_v12 = vor.u32 %v5261_v3, %v3986_v4  ;;  %v4722_v23 = vld [vmem:[#allocation2 + $0x768] sm:$0xf0] }
  0x7d   :  { %v4592_v34 = vld [vmem:[#allocation2 + $0x648] sm:$0xf]  ;;  %v4337_v40 = vor.u32 %v5353_v33, %v4336_v32  ;;  %v5245_v27 = vld [vmem:[#allocation2 + $0x10c] sm:$0xf] }
  0x7e   :  { %1788 = vmatpush.bf16.msra.mxu3 %v4689_v6  ;;  %1761 = vmatpush.bf16.msra.mxu1 %v4145_v13  ;;  %v5417_v35 = vld [vmem:[#allocation2 + $0x664] sm:$0xf0]  ;;  %v4789_v6 = vor.u32 %v5461_v58, %v4786_v61  ;;  %v4245_v13 = vor.u32 %v5325_v5, %v4242_v7  ;;  %v3922_v28 = vld [vmem:[#allocation2 + $0x128] sm:$0xf0] }
  0x7f   :  { %v3792_v37 = vld [vmem:[#allocation2 + $0x8] sm:$0xf]  ;;  %v4593_v44 = vor.u32 %v5417_v35, %v4592_v34  ;;  %v5309_v29 = vld [vmem:[#allocation2 + $0x30c] sm:$0xf] }
  0x80   :  { %1775 = vmatpush.bf16.msra.mxu2 %v4401_v14  ;;  %1748 = vmatpush.bf16.msra.mxu0 %v3857_v24  ;;  %v5217_v38 = vld [vmem:[#allocation2 + $0x24] sm:$0xf0]  ;;  %v4501_v14 = vor.u32 %v5389_v8, %v4498_v9  ;;  %v3957_v24 = vor.u32 %v5253_v15, %v3954_v16  ;;  %v4178_v31 = vld [vmem:[#allocation2 + $0x328] sm:$0xf0] }
  0x81   :  { %v4048_v41 = vld [vmem:[#allocation2 + $0x208] sm:$0xf]  ;;  %v3793_v51 = vor.u32 %v5217_v38, %v3792_v37  ;;  %v5373_v32 = vld [vmem:[#allocation2 + $0x50c] sm:$0xf]  ;;  %v4181_v37 = vor.u32 %v5309_v29, %v4178_v31  ;;  %v4536_v29 = vld [vmem:[#allocation2 + $0x5d0] sm:$0xf] }
  0x82   :  { %1789 = vmatpush.bf16.msra.mxu3 %v4657_v18  ;;  %1762 = vmatpush.bf16.msra.mxu1 %v4113_v25  ;;  %v5281_v42 = vld [vmem:[#allocation2 + $0x224] sm:$0xf0]  ;;  %v4757_v18 = vor.u32 %v5453_v10, %v4754_v11  ;;  %v4213_v25 = vor.u32 %v5317_v17, %v4210_v19  ;;  %v4434_v33 = vld [vmem:[#allocation2 + $0x528] sm:$0xf0] }
  0x83   :  { %v4304_v43 = vld [vmem:[#allocation2 + $0x408] sm:$0xf]  ;;  %v4049_v56 = vor.u32 %v5281_v42, %v4048_v41  ;;  %v5437_v34 = vld [vmem:[#allocation2 + $0x70c] sm:$0xf]  ;;  %v4437_v38 = vor.u32 %v5373_v32, %v4434_v33  ;;  %v4792_v33 = vld [vmem:[#allocation2 + $0x7d0] sm:$0xf] }
  0x84   :  { %1776 = vmatpush.bf16.msra.mxu2 %v4369_v26  ;;  %v5345_v45 = vld [vmem:[#allocation2 + $0x424] sm:$0xf0]  ;;  %1749 = vmatpush.bf16.msra.mxu0 %v3825_v36  ;;  %v4469_v26 = vor.u32 %v5381_v20, %v4466_v21  ;;  %v4690_v35 = vld [vmem:[#allocation2 + $0x728] sm:$0xf0]  ;;  %v3925_v36 = vor.u32 %v5245_v27, %v3922_v28  ;;  %v5338_v28 = vld [vmem:[#allocation2 + $0x3ec] sm:$0xf0] }
  0x85   :  { %v4560_v46 = vld [vmem:[#allocation2 + $0x608] sm:$0xf]  ;;  %v4305_v57 = vor.u32 %v5345_v45, %v4304_v43  ;;  %v5301_v41 = vld [vmem:[#allocation2 + $0x2cc] sm:$0xf]  ;;  %v4693_v42 = vor.u32 %v5437_v34, %v4690_v35  ;;  %v5466_v34 = vld [vmem:[#allocation2 + $0x7ec] sm:$0xf0] }
  0x86   :  { %1790 = vmatpush.bf16.msra.mxu3 %v4625_v30  ;;  %v5409_v47 = vld [vmem:[#allocation2 + $0x624] sm:$0xf0]  ;;  %1763 = vmatpush.bf16.msra.mxu1 %v4081_v39  ;;  %v4725_v30 = vor.u32 %v5445_v22, %v4722_v23  ;;  %v5237_v39 = vld [vmem:[#allocation2 + $0xcc] sm:$0xf] }
  0x87   :  { %v4561_v62 = vor.u32 %v5409_v47, %v4560_v46  ;;  %v4146_v43 = vld [vmem:[#allocation2 + $0x2e8] sm:$0xf0] }
  0x88   :  { %1777 = vmatpush.bf16.msra.mxu2 %v4337_v40  ;;  %1750 = vmatpush.bf16.msra.mxu0 %v3793_v51  ;;  %v3890_v40 = vld [vmem:[#allocation2 + $0xe8] sm:$0xf0]  ;;  %v4149_v49 = vor.u32 %v5301_v41, %v4146_v43  ;;  %v4248_v41 = vld [vmem:[#allocation2 + $0x390] sm:$0xf] }
  0x89   :  { %v4402_v45 = vld [vmem:[#allocation2 + $0x4e8] sm:$0xf0]  ;;  %v3893_v48 = vor.u32 %v5237_v39, %v3890_v40  ;;  %v3992_v39 = vld [vmem:[#allocation2 + $0x190] sm:$0xf] }
  0x8a   :  { %1791 = vmatpush.bf16.msra.mxu3 %v4593_v44  ;;  %1764 = vmatpush.bf16.msra.mxu1 %v4049_v56  ;;  %v5365_v44 = vld [vmem:[#allocation2 + $0x4cc] sm:$0xf]  ;;  %v5266_v40 = vld [vmem:[#allocation2 + $0x1ac] sm:$0xf0] }
  0x8b   :  { %1751 = vmatmul.bf16.vlgmr.msra.gmra.mxu0 %v5763_v59  ;;  %v5429_v46 = vld [vmem:[#allocation2 + $0x6cc] sm:$0xf]  ;;  %v4405_v50 = vor.u32 %v5365_v44, %v4402_v45  ;;  %v5330_v43 = vld [vmem:[#allocation2 + $0x3ac] sm:$0xf0] }
  0x8c   :  { %1778 = vmatpush.bf16.msra.mxu2 %v4305_v57  ;;  %1799 = vmatpush.bf16.msrb.mxu0 %v4021_v63  ;;  %v4658_v47 = vld [vmem:[#allocation2 + $0x6e8] sm:$0xf0]  ;;  %v4504_v44 = vld [vmem:[#allocation2 + $0x590] sm:$0xf] }
  0x8d   :  { %1765 = vmatmul.bf16.vlgmr.msra.gmra.mxu1 %v5767_v0  ;;  %v5229_v51 = vld [vmem:[#allocation2 + $0x8c] sm:$0xf]  ;;  %v4661_v54 = vor.u32 %v5429_v46, %v4658_v47  ;;  %v5394_v45 = vld [vmem:[#allocation2 + $0x5ac] sm:$0xf0] }
  0x8e   :  { %1792 = vmatpush.bf16.msra.mxu3 %v4561_v62  ;;  %1813 = vmatpush.bf16.msrb.mxu1 %v4277_v1  ;;  %v3858_v52 = vld [vmem:[#allocation2 + $0xa8] sm:$0xf0]  ;;  %v4760_v46 = vld [vmem:[#allocation2 + $0x790] sm:$0xf] }
  0x8f   :  { %1779 = vmatmul.bf16.vlgmr.msra.gmra.mxu2 %v5761_v55  ;;  %v5293_v53 = vld [vmem:[#allocation2 + $0x28c] sm:$0xf]  ;;  %v3861_v63 = vor.u32 %v5229_v51, %v3858_v52  ;;  %v5458_v47 = vld [vmem:[#allocation2 + $0x7ac] sm:$0xf0] }
  0x90   :  { %1827 = vmatpush.bf16.msrb.mxu2 %v4533_v2  ;;  %1800 = vmatpush.bf16.msrb.mxu0 %v3989_v12  ;;  %v4114_v56 = vld [vmem:[#allocation2 + $0x2a8] sm:$0xf0]  ;;  %v3960_v51 = vld [vmem:[#allocation2 + $0x150] sm:$0xf] }
  0x91   :  { %1793 = vmatmul.bf16.vlgmr.msra.gmra.mxu3 %v5765_v60  ;;  %v5357_v57 = vld [vmem:[#allocation2 + $0x48c] sm:$0xf]  ;;  %v4117_v1 = vor.u32 %v5293_v53, %v4114_v56  ;;  %v5258_v52 = vld [vmem:[#allocation2 + $0x16c] sm:$0xf0] }
  0x92   :  { %1841 = vmatpush.bf16.msrb.mxu3 %v4789_v6  ;;  %1814 = vmatpush.bf16.msrb.mxu1 %v4245_v13  ;;  %v4370_v58 = vld [vmem:[#allocation2 + $0x4a8] sm:$0xf0]  ;;  %v4216_v53 = vld [vmem:[#allocation2 + $0x350] sm:$0xf] }
  0x93   :  { %v5421_v61 = vld [vmem:[#allocation2 + $0x68c] sm:$0xf]  ;;  %v4373_v2 = vor.u32 %v5357_v57, %v4370_v58  ;;  %v5322_v56 = vld [vmem:[#allocation2 + $0x36c] sm:$0xf0] }
  0x94   :  { %1828 = vmatpush.bf16.msrb.mxu2 %v4501_v14  ;;  %1801 = vmatpush.bf16.msrb.mxu0 %v3957_v24  ;;  %v4626_v62 = vld [vmem:[#allocation2 + $0x6a8] sm:$0xf0]  ;;  %v4024_v24 = vld [vmem:[#allocation2 + $0x1d0] sm:$0xf] }
  0x95   :  { %v5221_v3 = vld [vmem:[#allocation2 + $0x4c] sm:$0xf]  ;;  %v4629_v6 = vor.u32 %v5421_v61, %v4626_v62  ;;  %v4472_v57 = vld [vmem:[#allocation2 + $0x550] sm:$0xf] }
  0x96   :  { %1842 = vmatpush.bf16.msrb.mxu3 %v4757_v18  ;;  %1815 = vmatpush.bf16.msrb.mxu1 %v4213_v25  ;;  %v3826_v4 = vld [vmem:[#allocation2 + $0x68] sm:$0xf0]  ;;  %v5274_v25 = vld [vmem:[#allocation2 + $0x1ec] sm:$0xf0] }
  0x97   :  { %v5285_v5 = vld [vmem:[#allocation2 + $0x24c] sm:$0xf]  ;;  %v3829_v12 = vor.u32 %v5221_v3, %v3826_v4  ;;  %v5386_v58 = vld [vmem:[#allocation2 + $0x56c] sm:$0xf0] }
  0x98   :  { %1829 = vmatpush.bf16.msrb.mxu2 %v4469_v26  ;;  %1802 = vmatpush.bf16.msrb.mxu0 %v3925_v36  ;;  %v4082_v7 = vld [vmem:[#allocation2 + $0x268] sm:$0xf0]  ;;  %v4280_v26 = vld [vmem:[#allocation2 + $0x3d0] sm:$0xf]  ;;  %v4025_v36 = vor.u32 %v5274_v25, %v4024_v24 }
  0x99   :  { %v5349_v8 = vld [vmem:[#allocation2 + $0x44c] sm:$0xf]  ;;  %v4085_v15 = vor.u32 %v5285_v5, %v4082_v7  ;;  %v4728_v61 = vld [vmem:[#allocation2 + $0x750] sm:$0xf] }
  0x9a   :  { %1843 = vmatpush.bf16.msrb.mxu3 %v4725_v30  ;;  %1816 = vmatpush.bf16.msrb.mxu1 %v4181_v37  ;;  %v4338_v9 = vld [vmem:[#allocation2 + $0x468] sm:$0xf0]  ;;  %v5402_v30 = vld [vmem:[#allocation2 + $0x5ec] sm:$0xf0]  ;;  %v4281_v37 = vor.u32 %v5338_v28, %v4280_v26 }
  0x9b   :  { %v5413_v10 = vld [vmem:[#allocation2 + $0x64c] sm:$0xf]  ;;  %v4341_v16 = vor.u32 %v5349_v8, %v4338_v9  ;;  %v5450_v62 = vld [vmem:[#allocation2 + $0x76c] sm:$0xf0] }
  0x9c   :  { %1830 = vmatpush.bf16.msrb.mxu2 %v4437_v38  ;;  %1803 = vmatpush.bf16.msrb.mxu0 %v3893_v48  ;;  %v4594_v11 = vld [vmem:[#allocation2 + $0x668] sm:$0xf0]  ;;  %v4537_v38 = vor.u32 %v5402_v30, %v4536_v29  ;;  %v3993_v48 = vor.u32 %v5266_v40, %v3992_v39  ;;  %v3928_v3 = vld [vmem:[#allocation2 + $0x110] sm:$0xf] }
  0x9d   :  { %v5213_v13 = vld [vmem:[#allocation2 + $0xc] sm:$0xf]  ;;  %v4597_v20 = vor.u32 %v5413_v10, %v4594_v11  ;;  %v5250_v4 = vld [vmem:[#allocation2 + $0x12c] sm:$0xf0] }
  0x9e   :  { %1844 = vmatpush.bf16.msrb.mxu3 %v4693_v42  ;;  %1817 = vmatpush.bf16.msrb.mxu1 %v4149_v49  ;;  %v3794_v14 = vld [vmem:[#allocation2 + $0x28] sm:$0xf0]  ;;  %v4793_v42 = vor.u32 %v5466_v34, %v4792_v33  ;;  %v4249_v49 = vor.u32 %v5330_v43, %v4248_v41  ;;  %v4184_v5 = vld [vmem:[#allocation2 + $0x310] sm:$0xf] }
  0x9f   :  { %v5277_v17 = vld [vmem:[#allocation2 + $0x20c] sm:$0xf]  ;;  %v3797_v27 = vor.u32 %v5213_v13, %v3794_v14  ;;  %v5314_v7 = vld [vmem:[#allocation2 + $0x32c] sm:$0xf0] }
  0xa0   :  { %1831 = vmatpush.bf16.msrb.mxu2 %v4405_v50  ;;  %1804 = vmatpush.bf16.msrb.mxu0 %v3861_v63  ;;  %v4050_v18 = vld [vmem:[#allocation2 + $0x228] sm:$0xf0]  ;;  %v4505_v50 = vor.u32 %v5394_v45, %v4504_v44  ;;  %v3961_v63 = vor.u32 %v5258_v52, %v3960_v51  ;;  %v4440_v8 = vld [vmem:[#allocation2 + $0x510] sm:$0xf]  ;;  %v4185_v13 = vor.u32 %v5314_v7, %v4184_v5  ;;  %v5398_v5 = vld [vmem:[#allocation2 + $0x5d4] sm:$0xf] }
  0xa1   :  { %v5341_v19 = vld [vmem:[#allocation2 + $0x40c] sm:$0xf]  ;;  %v4053_v31 = vor.u32 %v5277_v17, %v4050_v18  ;;  %v5378_v9 = vld [vmem:[#allocation2 + $0x52c] sm:$0xf0] }
  0xa2   :  { %1845 = vmatpush.bf16.msrb.mxu3 %v4661_v54  ;;  %1818 = vmatpush.bf16.msrb.mxu1 %v4117_v1  ;;  %v4306_v21 = vld [vmem:[#allocation2 + $0x428] sm:$0xf0]  ;;  %v4761_v54 = vor.u32 %v5458_v47, %v4760_v46  ;;  %v4217_v1 = vor.u32 %v5322_v56, %v4216_v53  ;;  %v4696_v10 = vld [vmem:[#allocation2 + $0x710] sm:$0xf]  ;;  %v4441_v14 = vor.u32 %v5378_v9, %v4440_v8  ;;  %v5462_v9 = vld [vmem:[#allocation2 + $0x7d4] sm:$0xf] }
  0xa3   :  { %v5405_v22 = vld [vmem:[#allocation2 + $0x60c] sm:$0xf]  ;;  %v4309_v32 = vor.u32 %v5341_v19, %v4306_v21  ;;  %v5442_v11 = vld [vmem:[#allocation2 + $0x72c] sm:$0xf0] }
  0xa4   :  { %1832 = vmatpush.bf16.msrb.mxu2 %v4373_v2  ;;  %v4562_v23 = vld [vmem:[#allocation2 + $0x628] sm:$0xf0]  ;;  %1805 = vmatpush.bf16.msrb.mxu0 %v3829_v12  ;;  %v4473_v2 = vor.u32 %v5386_v58, %v4472_v57  ;;  %v3929_v12 = vor.u32 %v5250_v4, %v3928_v3  ;;  %v4152_v17 = vld [vmem:[#allocation2 + $0x2d0] sm:$0xf]  ;;  %v4697_v18 = vor.u32 %v5442_v11, %v4696_v10  ;;  %v4282_v4 = vld [vmem:[#allocation2 + $0x3f0] sm:$0xf0] }
  0xa5   :  { %v4565_v35 = vor.u32 %v5405_v22, %v4562_v23  ;;  %v5306_v19 = vld [vmem:[#allocation2 + $0x2ec] sm:$0xf0]  ;;  %v4794_v10 = vld [vmem:[#allocation2 + $0x7f0] sm:$0xf0] }
  0xa6   :  { %1846 = vmatpush.bf16.msrb.mxu3 %v4629_v6  ;;  %1819 = vmatpush.bf16.msrb.mxu1 %v4085_v15  ;;  %v4729_v6 = vor.u32 %v5450_v62, %v4728_v61  ;;  %v3896_v15 = vld [vmem:[#allocation2 + $0xd0] sm:$0xf]  ;;  %v4153_v25 = vor.u32 %v5306_v19, %v4152_v17  ;;  %v5326_v17 = vld [vmem:[#allocation2 + $0x394] sm:$0xf] }
  0xa7   :  { %v5370_v21 = vld [vmem:[#allocation2 + $0x4ec] sm:$0xf0]  ;;  %v4250_v19 = vld [vmem:[#allocation2 + $0x3b0] sm:$0xf0] }
  0xa8   :  { %1833 = vmatpush.bf16.msrb.mxu2 %v4341_v16  ;;  %1806 = vmatpush.bf16.msrb.mxu0 %v3797_v27  ;;  %v5242_v16 = vld [vmem:[#allocation2 + $0xec] sm:$0xf0] }
  0xa9   :  { %v4664_v22 = vld [vmem:[#allocation2 + $0x6d0] sm:$0xf]  ;;  %v3897_v24 = vor.u32 %v5242_v16, %v3896_v15  ;;  %v5262_v15 = vld [vmem:[#allocation2 + $0x194] sm:$0xf] }
  0xaa   :  { %1847 = vmatpush.bf16.msrb.mxu3 %v4597_v20  ;;  %1820 = vmatpush.bf16.msrb.mxu1 %v4053_v31  ;;  %v4408_v20 = vld [vmem:[#allocation2 + $0x4d0] sm:$0xf]  ;;  %v3994_v16 = vld [vmem:[#allocation2 + $0x1b0] sm:$0xf0] }
  0xab   :  { %1807 = vmatmul.bf16.vlgmr.msrb.gmra.mxu0 %v5763_v59  ;;  %v5434_v23 = vld [vmem:[#allocation2 + $0x6ec] sm:$0xf0]  ;;  %v4409_v26 = vor.u32 %v5370_v21, %v4408_v20  ;;  %v5390_v20 = vld [vmem:[#allocation2 + $0x594] sm:$0xf] }
  0xac   :  { %1834 = vmatpush.bf16.msrb.mxu2 %v4309_v32  ;;  %1855 = vmatpush.bf16.msra.mxu0 %v4025_v36  ;;  %v3864_v27 = vld [vmem:[#allocation2 + $0x90] sm:$0xf]  ;;  %v4665_v30 = vor.u32 %v5434_v23, %v4664_v22  ;;  %v4506_v21 = vld [vmem:[#allocation2 + $0x5b0] sm:$0xf0] }
  0xad   :  { %1821 = vmatmul.bf16.vlgmr.msrb.gmra.mxu1 %v5767_v0  ;;  %v5234_v28 = vld [vmem:[#allocation2 + $0xac] sm:$0xf0]  ;;  %v5454_v22 = vld [vmem:[#allocation2 + $0x794] sm:$0xf] }
  0xae   :  { %1848 = vmatpush.bf16.msrb.mxu3 %v4565_v35  ;;  %1869 = vmatpush.bf16.msra.mxu1 %v4281_v37  ;;  %v4120_v29 = vld [vmem:[#allocation2 + $0x290] sm:$0xf]  ;;  %v3865_v36 = vor.u32 %v5234_v28, %v3864_v27  ;;  %v4762_v23 = vld [vmem:[#allocation2 + $0x7b0] sm:$0xf0]  ;;  %v4509_v27 = vor.u32 %v5390_v20, %v4506_v21 }
  0xaf   :  { %1835 = vmatmul.bf16.vlgmr.msrb.gmra.mxu2 %v5761_v55  ;;  %v5298_v31 = vld [vmem:[#allocation2 + $0x2ac] sm:$0xf0]  ;;  %v3962_v28 = vld [vmem:[#allocation2 + $0x170] sm:$0xf0] }
  0xb0   :  { %1883 = vmatpush.bf16.msra.mxu2 %v4537_v38  ;;  %1856 = vmatpush.bf16.msra.mxu0 %v3993_v48  ;;  %v4376_v32 = vld [vmem:[#allocation2 + $0x490] sm:$0xf]  ;;  %v4121_v37 = vor.u32 %v5298_v31, %v4120_v29  ;;  %v5318_v29 = vld [vmem:[#allocation2 + $0x354] sm:$0xf]  ;;  %v4765_v31 = vor.u32 %v5454_v22, %v4762_v23 }
  0xb1   :  { %1849 = vmatmul.bf16.vlgmr.msrb.gmra.mxu3 %v5765_v60  ;;  %v5362_v33 = vld [vmem:[#allocation2 + $0x4ac] sm:$0xf0]  ;;  %v4634_v20 = vld [vmem:[#allocation2 + $0x6b0] sm:$0xf0] }
  0xb2   :  { %1897 = vmatpush.bf16.msra.mxu3 %v4793_v42  ;;  %1870 = vmatpush.bf16.msra.mxu1 %v4249_v49  ;;  %v4632_v34 = vld [vmem:[#allocation2 + $0x690] sm:$0xf]  ;;  %v4377_v38 = vor.u32 %v5362_v33, %v4376_v32  ;;  %v5382_v32 = vld [vmem:[#allocation2 + $0x554] sm:$0xf] }
  0xb3   :  { %v5426_v35 = vld [vmem:[#allocation2 + $0x6ac] sm:$0xf0]  ;;  %v4474_v33 = vld [vmem:[#allocation2 + $0x570] sm:$0xf0] }
  0xb4   :  { %1884 = vmatpush.bf16.msra.mxu2 %v4505_v50  ;;  %1857 = vmatpush.bf16.msra.mxu0 %v3961_v63  ;;  %v3832_v39 = vld [vmem:[#allocation2 + $0x50] sm:$0xf]  ;;  %v4633_v42 = vor.u32 %v5426_v35, %v4632_v34  ;;  %v5270_v63 = vld [vmem:[#allocation2 + $0x1d4] sm:$0xf]  ;;  %v5789_v34 = vld [vmem:[%s6927_s2] sm:$0xff] }
  0xb5   :  { %v5226_v40 = vld [vmem:[#allocation2 + $0x6c] sm:$0xf0]  ;;  %6940 = vst [vmem:[#allocation11_spill] sm:$0xff] %v5789_v34  ;;  %v5446_v35 = vld [vmem:[#allocation2 + $0x754] sm:$0xf] }
  0xb6   :  { %1898 = vmatpush.bf16.msra.mxu3 %v4761_v54  ;;  %1871 = vmatpush.bf16.msra.mxu1 %v4217_v1  ;;  %v4088_v41 = vld [vmem:[#allocation2 + $0x250] sm:$0xf]  ;;  %v3833_v48 = vor.u32 %v5226_v40, %v3832_v39  ;;  %v4026_v1 = vld [vmem:[#allocation2 + $0x1f0] sm:$0xf0]  ;;  %v4477_v40 = vor.u32 %v5382_v32, %v4474_v33 }
  0xb7   :  { %v5290_v43 = vld [vmem:[#allocation2 + $0x26c] sm:$0xf0]  ;;  %v5350_v32 = vld [vmem:[#allocation2 + $0x454] sm:$0xf] }
  0xb8   :  { %1885 = vmatpush.bf16.msra.mxu2 %v4473_v2  ;;  %1858 = vmatpush.bf16.msra.mxu0 %v3929_v12  ;;  %v4344_v44 = vld [vmem:[#allocation2 + $0x450] sm:$0xf]  ;;  %v4089_v51 = vor.u32 %v5290_v43, %v4088_v41  ;;  %v5334_v2 = vld [vmem:[#allocation2 + $0x3d4] sm:$0xf]  ;;  %v4029_v12 = vor.u32 %v5270_v63, %v4026_v1  ;;  %v315_v43 = vperm.slane %v5789_v34, 0 }
  0xb9   :  { %v5354_v45 = vld [vmem:[#allocation2 + $0x46c] sm:$0xf0]  ;;  %v3930_v41 = vld [vmem:[#allocation2 + $0x130] sm:$0xf0] }
  0xba   :  { %1899 = vmatpush.bf16.msra.mxu3 %v4729_v6  ;;  %1872 = vmatpush.bf16.msra.mxu1 %v4185_v13  ;;  %v4600_v46 = vld [vmem:[#allocation2 + $0x650] sm:$0xf]  ;;  %v4345_v52 = vor.u32 %v5354_v45, %v4344_v44  ;;  %v4538_v6 = vld [vmem:[#allocation2 + $0x5f0] sm:$0xf0]  ;;  %v4285_v13 = vor.u32 %v5334_v2, %v4282_v4 }
  0xbb   :  { %v5418_v47 = vld [vmem:[#allocation2 + $0x66c] sm:$0xf0]  ;;  %v4186_v45 = vld [vmem:[#allocation2 + $0x330] sm:$0xf0] }
  0xbc   :  { %1886 = vmatpush.bf16.msra.mxu2 %v4441_v14  ;;  %1859 = vmatpush.bf16.msra.mxu0 %v3897_v24  ;;  %v3800_v49 = vld [vmem:[#allocation2 + $0x10] sm:$0xf]  ;;  %v4601_v57 = vor.u32 %v5418_v47, %v4600_v46  ;;  %v4541_v14 = vor.u32 %v5398_v5, %v4538_v6  ;;  %v3997_v24 = vor.u32 %v5262_v15, %v3994_v16  ;;  %v5374_v46 = vld [vmem:[#allocation2 + $0x514] sm:$0xf] }
  0xbd   :  { %v5218_v50 = vld [vmem:[#allocation2 + $0x2c] sm:$0xf0]  ;;  %v4442_v47 = vld [vmem:[#allocation2 + $0x530] sm:$0xf0] }
  0xbe   :  { %1900 = vmatpush.bf16.msra.mxu3 %v4697_v18  ;;  %1873 = vmatpush.bf16.msra.mxu1 %v4153_v25  ;;  %v4056_v53 = vld [vmem:[#allocation2 + $0x210] sm:$0xf]  ;;  %v3801_v3 = vor.u32 %v5218_v50, %v3800_v49  ;;  %v4797_v18 = vor.u32 %v5462_v9, %v4794_v10  ;;  %v5254_v25 = vld [vmem:[#allocation2 + $0x154] sm:$0xf] }
  0xbf   :  { %v5282_v54 = vld [vmem:[#allocation2 + $0x22c] sm:$0xf0]  ;;  %v4698_v49 = vld [vmem:[#allocation2 + $0x730] sm:$0xf0] }
  0xc0   :  { %1887 = vmatpush.bf16.msra.mxu2 %v4409_v26  ;;  %1860 = vmatpush.bf16.msra.mxu0 %v3865_v36  ;;  %v4312_v56 = vld [vmem:[#allocation2 + $0x410] sm:$0xf]  ;;  %v4057_v7 = vor.u32 %v5282_v54, %v4056_v53  ;;  %v4253_v26 = vor.u32 %v5326_v17, %v4250_v19  ;;  %v4730_v36 = vld [vmem:[#allocation2 + $0x770] sm:$0xf0]  ;;  %v4445_v53 = vor.u32 %v5374_v46, %v4442_v47 }
  0xc1   :  { %v5346_v58 = vld [vmem:[#allocation2 + $0x42c] sm:$0xf0]  ;;  %v4733_v44 = vor.u32 %v5446_v35, %v4730_v36  ;;  %v4154_v63 = vld [vmem:[#allocation2 + $0x2f0] sm:$0xf0] }
  0xc2   :  { %1901 = vmatpush.bf16.msra.mxu3 %v4665_v30  ;;  %1874 = vmatpush.bf16.msra.mxu1 %v4121_v37  ;;  %v4568_v61 = vld [vmem:[#allocation2 + $0x610] sm:$0xf]  ;;  %v4313_v8 = vor.u32 %v5346_v58, %v4312_v56  ;;  %v4218_v30 = vld [vmem:[#allocation2 + $0x370] sm:$0xf0]  ;;  %v3965_v37 = vor.u32 %v5254_v25, %v3962_v28 }
  0xc3   :  { %v5410_v62 = vld [vmem:[#allocation2 + $0x62c] sm:$0xf0]  ;;  %v4221_v39 = vor.u32 %v5318_v29, %v4218_v30  ;;  %v3898_v58 = vld [vmem:[#allocation2 + $0xf0] sm:$0xf0] }
  0xc4   :  { %1888 = vmatpush.bf16.msra.mxu2 %v4377_v38  ;;  %1861 = vmatpush.bf16.msra.mxu0 %v3833_v48  ;;  %v4569_v11 = vor.u32 %v5410_v62, %v4568_v61  ;;  %v5246_v38 = vld [vmem:[#allocation2 + $0x114] sm:$0xf] }
  0xc5   :  { %v5438_v48 = vld [vmem:[#allocation2 + $0x714] sm:$0xf]  ;;  %v3933_v50 = vor.u32 %v5246_v38, %v3930_v41 }
  0xc6   :  { %1902 = vmatpush.bf16.msra.mxu3 %v4633_v42  ;;  %1875 = vmatpush.bf16.msra.mxu1 %v4089_v51  ;;  %v5310_v42 = vld [vmem:[#allocation2 + $0x314] sm:$0xf]  ;;  %v4701_v62 = vor.u32 %v5438_v48, %v4698_v49 }
  0xc7   :  { %v5302_v61 = vld [vmem:[#allocation2 + $0x2d4] sm:$0xf] }
  0xc8   :  { %1889 = vmatpush.bf16.msra.mxu2 %v4345_v52  ;;  %1862 = vmatpush.bf16.msra.mxu0 %v3801_v3  ;;  %v4189_v52 = vor.u32 %v5310_v42, %v4186_v45  ;;  %v5366_v1 = vld [vmem:[#allocation2 + $0x4d4] sm:$0xf] }
  0xc9   :  { %v4410_v2 = vld [vmem:[#allocation2 + $0x4f0] sm:$0xf0] }
  0xca   :  { %1903 = vmatpush.bf16.msra.mxu3 %v4601_v57  ;;  %1876 = vmatpush.bf16.msra.mxu1 %v4057_v7  ;;  %v1654_v56 = vpop.f32.mrf.mxu1  ;;  %v5238_v57 = vld [vmem:[#allocation2 + $0xd4] sm:$0xf]  ;;  %v4157_v7 = vor.u32 %v5302_v61, %v4154_v63  ;;  %v5275_v61 = vld [vmem:[#allocation2 + $0x1f4] sm:$0xf0] }
  0xcb   :  { %1863 = vmatmul.bf16.vlgmr.msra.gmra.mxu0 %v5763_v59  ;;  %v5430_v4 = vld [vmem:[#allocation2 + $0x6d4] sm:$0xf]  ;;  %v3901_v6 = vor.u32 %v5238_v57, %v3898_v58  ;;  %v4032_v58 = vld [vmem:[#allocation2 + $0x1d8] sm:$0xf] }
  0xcc   :  { %1890 = vmatpush.bf16.msra.mxu2 %v4313_v8  ;;  %1911 = vmatpush.bf16.msrb.mxu0 %v4029_v12  ;;  %v1640_v51 = vpop.f32.mrf.mxu0  ;;  %v4666_v5 = vld [vmem:[#allocation2 + $0x6f0] sm:$0xf0]  ;;  %v4413_v8 = vor.u32 %v5366_v1, %v4410_v2  ;;  %v5339_v63 = vld [vmem:[#allocation2 + $0x3f4] sm:$0xf0] }
  0xcd   :  { %1877 = vmatmul.bf16.vlgmr.msra.gmra.mxu1 %v5767_v0  ;;  %v1641_v54 = vadd.f32 %v1640_v51, %v315_v43  ;;  %v5230_v10 = vld [vmem:[#allocation2 + $0x94] sm:$0xf]  ;;  %v4544_v1 = vld [vmem:[#allocation2 + $0x5d8] sm:$0xf] }
  0xce   :  { %1904 = vmatpush.bf16.msra.mxu3 %v4569_v11  ;;  %1925 = vmatpush.bf16.msrb.mxu1 %v4285_v13  ;;  %v3866_v11 = vld [vmem:[#allocation2 + $0xb0] sm:$0xf0]  ;;  %v4669_v13 = vor.u32 %v5430_v4, %v4666_v5 }
  0xcf   :  { %1891 = vmatmul.bf16.vlgmr.msra.gmra.mxu2 %v5761_v55  ;;  %v1655_v3 = vadd.f32 %v1654_v56, %v1641_v54  ;;  %v5294_v12 = vld [vmem:[#allocation2 + $0x294] sm:$0xf]  ;;  %v3869_v22 = vor.u32 %v5230_v10, %v3866_v11  ;;  %v5467_v10 = vld [vmem:[#allocation2 + $0x7f4] sm:$0xf0] }
  0xd0   :  { %1939 = vmatpush.bf16.msrb.mxu2 %v4541_v14  ;;  %1912 = vmatpush.bf16.msrb.mxu0 %v3997_v24  ;;  %v4122_v16 = vld [vmem:[#allocation2 + $0x2b0] sm:$0xf0]  ;;  %v4000_v11 = vld [vmem:[#allocation2 + $0x198] sm:$0xf] }
  0xd1   :  { %1905 = vmatmul.bf16.vlgmr.msra.gmra.mxu3 %v5765_v60  ;;  %v5358_v17 = vld [vmem:[#allocation2 + $0x494] sm:$0xf] }
  0xd2   :  { %1953 = vmatpush.bf16.msrb.mxu3 %v4797_v18  ;;  %1926 = vmatpush.bf16.msrb.mxu1 %v4253_v26  ;;  %v1668_v9 = vpop.f32.mrf.mxu2  ;;  %v4378_v18 = vld [vmem:[#allocation2 + $0x4b0] sm:$0xf0]  ;;  %v4125_v26 = vor.u32 %v5294_v12, %v4122_v16  ;;  %v1656_v29 = vpop.f32.mrf.mxu1  ;;  %v5267_v16 = vld [vmem:[#allocation2 + $0x1b4] sm:$0xf0] }
  0xd3   :  { %v1669_v14 = vadd.f32 %v1668_v9, %v1655_v3  ;;  %v5422_v19 = vld [vmem:[#allocation2 + $0x694] sm:$0xf]  ;;  %v4800_v9 = vld [vmem:[#allocation2 + $0x7d8] sm:$0xf] }
  0xd4   :  { %1940 = vmatpush.bf16.msrb.mxu2 %v4509_v27  ;;  %1913 = vmatpush.bf16.msrb.mxu0 %v3965_v37  ;;  %v1682_v15 = vpop.f32.mrf.mxu3  ;;  %v1642_v23 = vpop.f32.mrf.mxu0  ;;  %v5222_v24 = vld [vmem:[#allocation2 + $0x54] sm:$0xf]  ;;  %v4381_v27 = vor.u32 %v5358_v17, %v4378_v18  ;;  %v4637_v35 = vor.u32 %v5422_v19, %v4634_v20  ;;  %v4256_v20 = vld [vmem:[#allocation2 + $0x398] sm:$0xf] }
  0xd5   :  { %v5795_v21 = vadd.f32 %v1682_v15, %v1669_v14  ;;  %v3834_v25 = vld [vmem:[#allocation2 + $0x70] sm:$0xf0]  ;;  %v1643_v28 = vadd.f32 %v1642_v23, %v315_v43  ;;  %v4033_v15 = vor.u32 %v5275_v61, %v4032_v58 }
  0xd6   :  { %1954 = vmatpush.bf16.msrb.mxu3 %v4765_v31  ;;  %1927 = vmatpush.bf16.msrb.mxu1 %v4221_v39  ;;  %v5286_v30 = vld [vmem:[#allocation2 + $0x254] sm:$0xf]  ;;  %v3837_v43 = vor.u32 %v5222_v24, %v3834_v25  ;;  %v4801_v25 = vor.u32 %v5467_v10, %v4800_v9 }
  0xd7   :  { %v4090_v31 = vld [vmem:[#allocation2 + $0x270] sm:$0xf0]  ;;  %v5798_v33 = vmul.f32 0.70710677, %v5795_v21  ;;  %v1657_v38 = vadd.f32 %v1656_v29, %v1643_v28  ;;  %v4768_v28 = vld [vmem:[#allocation2 + $0x798] sm:$0xf] }
  0xd8   :  { %1941 = vmatpush.bf16.msrb.mxu2 %v4477_v40  ;;  %1914 = vmatpush.bf16.msrb.mxu0 %v3933_v50  ;;  %v4346_v36 = vld [vmem:[#allocation2 + $0x470] sm:$0xf0]  ;;  %v4093_v47 = vor.u32 %v5286_v30, %v4090_v31  ;;  %v5459_v30 = vld [vmem:[#allocation2 + $0x7b4] sm:$0xf0] }
  0xd9   :  { %v5414_v37 = vld [vmem:[#allocation2 + $0x654] sm:$0xf]  ;;  %v2111_v42 = vmul.f32 %v5798_v33, %v5798_v33  ;;  %v4349_v48 = vor.u32 %v5350_v32, %v4346_v36  ;;  %v3968_v31 = vld [vmem:[#allocation2 + $0x158] sm:$0xf] }
  0xda   :  { %1955 = vmatpush.bf16.msrb.mxu3 %v4733_v44  ;;  %1928 = vmatpush.bf16.msrb.mxu1 %v4189_v52  ;;  %v4602_v39 = vld [vmem:[#allocation2 + $0x670] sm:$0xf0]  ;;  %v1670_v49 = vpop.f32.mrf.mxu2  ;;  %v5259_v32 = vld [vmem:[#allocation2 + $0x174] sm:$0xf0] }
  0xdb   :  { %v5214_v40 = vld [vmem:[#allocation2 + $0x14] sm:$0xf]  ;;  %v4605_v54 = vor.u32 %v5414_v37, %v4602_v39  ;;  %v1671_v56 = vadd.f32 %v1670_v49, %v1657_v38  ;;  %v4001_v37 = vor.u32 %v5267_v16, %v4000_v11  ;;  %v5815_v38 = vld [vmem:[#allocation2 + $0x358] sm:$0xf]  ;;  %v3969_v61 = vor.u32 %v5259_v32, %v3968_v31 }
  0xdc   :  { %1942 = vmatpush.bf16.msrb.mxu2 %v4445_v53  ;;  %1915 = vmatpush.bf16.msrb.mxu0 %v3901_v6  ;;  %v3802_v41 = vld [vmem:[#allocation2 + $0x30] sm:$0xf0]  ;;  %v5802_v53 = vmin.f32 %v2111_v42, 16.0  ;;  %v1684_v57 = vpop.f32.mrf.mxu3  ;;  %v5403_v6 = vld [vmem:[#allocation2 + $0x5f4] sm:$0xf0] }
  0xdd   :  { %v5278_v44 = vld [vmem:[#allocation2 + $0x214] sm:$0xf]  ;;  %v5806_v4 = vadd.f32 %v1684_v57, %v1671_v56  ;;  %v3805_v5 = vor.u32 %v5214_v40, %v3802_v41  ;;  %v4545_v19 = vor.u32 %v5403_v6, %v4544_v1  ;;  %v5323_v42 = vld [vmem:[#allocation2 + $0x374] sm:$0xf0] }
  0xde   :  { %1956 = vmatpush.bf16.msrb.mxu3 %v4701_v62  ;;  %1929 = vmatpush.bf16.msrb.mxu1 %v4157_v7  ;;  %v4058_v45 = vld [vmem:[#allocation2 + $0x230] sm:$0xf0]  ;;  %v4288_v62 = vld [vmem:[#allocation2 + $0x3d8] sm:$0xf]  ;;  %v2113_v2 = vmul.f32 2.1237322e-06, %v5802_v53 }
  0xdf   :  { %v5342_v46 = vld [vmem:[#allocation2 + $0x414] sm:$0xf]  ;;  %v2124_v3 = vmul.f32 3.8918573e-05, %v5802_v53  ;;  %6941 = vst [vmem:[#allocation12_spill] sm:$0xff] %v5806_v4  ;;  %v4061_v7 = vor.u32 %v5278_v44, %v4058_v45  ;;  %v4289_v18 = vor.u32 %v5339_v63, %v4288_v62  ;;  %v4769_v45 = vor.u32 %v5459_v30, %v4768_v28 }
  0xe0   :  { %1943 = vmatpush.bf16.msrb.mxu2 %v4413_v8  ;;  %1916 = vmatpush.bf16.msrb.mxu0 %v3869_v22  ;;  %v4314_v50 = vld [vmem:[#allocation2 + $0x430] sm:$0xf0]  ;;  %v2114_v12 = vadd.f32 0.00028619796, %v2113_v2  ;;  %v5809_v17 = vmul.f32 0.70710677, %v5806_v4  ;;  %v4225_v62 = vor.u32 %v5323_v42, %v5815_v38 }
  0xe1   :  { %v5406_v51 = vld [vmem:[#allocation2 + $0x614] sm:$0xf]  ;;  %v4317_v8 = vor.u32 %v5342_v46, %v4314_v50  ;;  %v5331_v22 = vld [vmem:[#allocation2 + $0x3b4] sm:$0xf0] }
  0xe2   :  { %1957 = vmatpush.bf16.msrb.mxu3 %v4669_v13  ;;  %1930 = vmatpush.bf16.msrb.mxu1 %v4125_v26  ;;  %v4570_v52 = vld [vmem:[#allocation2 + $0x630] sm:$0xf0]  ;;  %v2125_v13 = vadd.f32 0.001143296, %v2124_v3  ;;  %6942 = vst [vmem:[#allocation13_spill] sm:$0xff] %v5809_v17  ;;  %v2115_v23 = vmul.f32 %v2114_v12, %v5802_v53  ;;  %v2431_v29 = vmul.f32 %v5809_v17, %v5809_v17 }
  0xe3   :  { %v4573_v14 = vor.u32 %v5406_v51, %v4570_v52  ;;  %v4512_v26 = vld [vmem:[#allocation2 + $0x598] sm:$0xf]  ;;  %v4257_v40 = vor.u32 %v5331_v22, %v4256_v20  ;;  %v6044_v17 = vld [vmem:[#allocation2 + $0x75c] sm:$0xf] }
  0xe4   :  { %1944 = vmatpush.bf16.msrb.mxu2 %v4381_v27  ;;  %1917 = vmatpush.bf16.msrb.mxu0 %v3837_v43  ;;  %v2126_v24 = vmul.f32 %v2125_v13, %v5802_v53  ;;  %v5395_v27 = vld [vmem:[#allocation2 + $0x5b4] sm:$0xf0]  ;;  %v5817_v39 = vmin.f32 %v2431_v29, 16.0 }
  0xe5   :  { %v4513_v41 = vor.u32 %v5395_v27, %v4512_v26  ;;  %v4480_v43 = vld [vmem:[#allocation2 + $0x558] sm:$0xf] }
  0xe6   :  { %1958 = vmatpush.bf16.msrb.mxu3 %v4637_v35  ;;  %1931 = vmatpush.bf16.msrb.mxu1 %v4093_v47  ;;  %v2116_v35 = vadd.f32 0.0036580483, %v2115_v23  ;;  %v2127_v36 = vadd.f32 0.014752088, %v2126_v24  ;;  %v5387_v46 = vld [vmem:[#allocation2 + $0x574] sm:$0xf0] }
  0xe7   :  { %v5821_v47 = vld [vmem:[#allocation2 + $0x758] sm:$0xf]  ;;  %v2433_v49 = vmul.f32 2.1237322e-06, %v5817_v39  ;;  %v2444_v50 = vmul.f32 3.8918573e-05, %v5817_v39 }
  0xe8   :  { %1945 = vmatpush.bf16.msrb.mxu2 %v4349_v48  ;;  %1918 = vmatpush.bf16.msrb.mxu0 %v3805_v5  ;;  %v2128_v44 = vmul.f32 %v2127_v36, %v5802_v53  ;;  %v5451_v48 = vld [vmem:[#allocation2 + $0x774] sm:$0xf0]  ;;  %v2117_v57 = vmul.f32 %v2116_v35, %v5802_v53  ;;  %v4481_v5 = vor.u32 %v5387_v46, %v4480_v43 }
  0xe9   :  { %v5827_v51 = vld [vmem:[#allocation2 + $0x118] sm:$0xf]  ;;  %v2434_v2 = vadd.f32 0.00028619796, %v2433_v49  ;;  %v2445_v3 = vadd.f32 0.001143296, %v2444_v50  ;;  %v4737_v10 = vor.u32 %v5451_v48, %v5821_v47 }
  0xea   :  { %1959 = vmatpush.bf16.msrb.mxu3 %v4605_v54  ;;  %1932 = vmatpush.bf16.msrb.mxu1 %v4061_v7  ;;  %v5829_v52 = vld [vmem:[#allocation2 + $0x134] sm:$0xf0]  ;;  %v2129_v58 = vadd.f32 0.112945676, %v2128_v44  ;;  %v2118_v20 = vadd.f32 0.05243302, %v2117_v57  ;;  %v1710_v38 = vpop.f32.mrf.mxu1 }
  0xeb   :  { %1919 = vmatmul.bf16.vlgmr.msrb.gmra.mxu0 %v5763_v59  ;;  %v5831_v54 = vld [vmem:[#allocation2 + $0x318] sm:$0xf]  ;;  %v3937_v23 = vor.u32 %v5829_v52, %v5827_v51 }
  0xec   :  { %1946 = vmatpush.bf16.msrb.mxu2 %v4317_v8  ;;  %1967 = vmatpush.bf16.msra.mxu0 %v4033_v15  ;;  %v5833_v56 = vld [vmem:[#allocation2 + $0x334] sm:$0xf0]  ;;  %v316_v8 = vperm.slane %v5789_v34, 1  ;;  %v2130_v9 = vmul.f32 %v2129_v58, %v5802_v53  ;;  %v2446_v15 = vmul.f32 %v2445_v3, %v5817_v39 }
  0xed   :  { %1933 = vmatmul.bf16.vlgmr.msrb.gmra.mxu1 %v5767_v0  ;;  %v5838_v63 = vld [vmem:[#allocation2 + $0x518] sm:$0xf]  ;;  %v4193_v24 = vor.u32 %v5833_v56, %v5831_v54 }
  0xee   :  { %1960 = vmatpush.bf16.msrb.mxu3 %v4573_v14  ;;  %1981 = vmatpush.bf16.msra.mxu1 %v4289_v18  ;;  %v5840_v1 = vld [vmem:[#allocation2 + $0x534] sm:$0xf0]  ;;  %v2435_v14 = vmul.f32 %v2434_v2, %v5817_v39  ;;  %v2131_v22 = vadd.f32 0.4994258, %v2130_v9  ;;  %v2447_v35 = vadd.f32 0.014752088, %v2446_v15 }
  0xef   :  { %1947 = vmatmul.bf16.vlgmr.msrb.gmra.mxu2 %v5761_v55  ;;  %v5842_v6 = vld [vmem:[#allocation2 + $0x718] sm:$0xf]  ;;  %v4449_v36 = vor.u32 %v5840_v1, %v5838_v63  ;;  %v2119_v1 = vmul.f32 %v2118_v20, %v5802_v53  ;;  %v5945_v20 = vld [vmem:[#allocation2 + $0x1f8] sm:$0xf0] }
  0xf0   :  { %1995 = vmatpush.bf16.msra.mxu2 %v4545_v19  ;;  %1968 = vmatpush.bf16.msra.mxu0 %v4001_v37  ;;  %v5844_v7 = vld [vmem:[#allocation2 + $0x734] sm:$0xf0]  ;;  %v2436_v32 = vadd.f32 0.0036580483, %v2435_v14  ;;  %v2132_v46 = vmul.f32 %v2131_v22, %v5802_v53  ;;  %v2448_v52 = vmul.f32 %v2447_v35, %v5817_v39  ;;  %v5947_v22 = vld [vmem:[#allocation2 + $0x3dc] sm:$0xf] }
  0xf1   :  { %1961 = vmatmul.bf16.vlgmr.msrb.gmra.mxu3 %v5765_v60  ;;  %v5849_v11 = vld [vmem:[#allocation2 + $0xd8] sm:$0xf]  ;;  %v4705_v47 = vor.u32 %v5844_v7, %v5842_v6 }
  0xf2   :  { %2009 = vmatpush.bf16.msra.mxu3 %v4801_v25  ;;  %1982 = vmatpush.bf16.msra.mxu1 %v4257_v40  ;;  %v5851_v12 = vld [vmem:[#allocation2 + $0xf4] sm:$0xf0]  ;;  %v1696_v25 = vpop.f32.mrf.mxu0  ;;  %v5920_v2 = vadd.f32 1.0, %v2132_v46  ;;  %v2437_v3 = vmul.f32 %v2436_v32, %v5817_v39 }
  0xf3   :  { %v5853_v13 = vld [vmem:[#allocation2 + $0x2d8] sm:$0xf]  ;;  %v1697_v37 = vadd.f32 %v1696_v25, %v316_v8  ;;  %v3905_v56 = vor.u32 %v5851_v12, %v5849_v11  ;;  %v2449_v11 = vadd.f32 0.112945676, %v2448_v52 }
  0xf4   :  { %1996 = vmatpush.bf16.msra.mxu2 %v4513_v41  ;;  %v5857_v16 = vld [vmem:[#allocation2 + $0x2f4] sm:$0xf0]  ;;  %1969 = vmatpush.bf16.msra.mxu0 %v3969_v61  ;;  %5574 = vrcp.f32 %v5920_v2  ;;  %vm2139_vm0 = vweird.f32 %v5920_v2 }
  0xf5   :  { %v5859_v18 = vld [vmem:[#allocation2 + $0x4d8] sm:$0xf]  ;;  %v1711_v54 = vadd.f32 %v1710_v38, %v1697_v37  ;;  %v4161_v57 = vor.u32 %v5857_v16, %v5853_v13  ;;  %v1724_v13 = vpop.f32.mrf.mxu2  ;;  %v5969_v37 = vld [vmem:[#allocation2 + $0x7f8] sm:$0xf0] }
  0xf6   :  { %2010 = vmatpush.bf16.msra.mxu3 %v4769_v45  ;;  %v5861_v19 = vld [vmem:[#allocation2 + $0x4f4] sm:$0xf0]  ;;  %1983 = vmatpush.bf16.msra.mxu1 %v4225_v62  ;;  %v5971_v38 = vld [vmem:[#allocation2 + $0x19c] sm:$0xf] }
  0xf7   :  { %v5867_v26 = vld [vmem:[#allocation2 + $0x6d8] sm:$0xf] }
  0xf8   :  { %v5869_v27 = vld [vmem:[#allocation2 + $0x6f4] sm:$0xf0]  ;;  %1997 = vmatpush.bf16.msra.mxu2 %v4481_v5  ;;  %1970 = vmatpush.bf16.msra.mxu0 %v3937_v23  ;;  %v4417_v5 = vor.u32 %v5861_v19, %v5859_v18  ;;  %v5943_v19 = vld [vmem:[#allocation2 + $0x1dc] sm:$0xf]  ;;  %v1738_v23 = vpop.f32.mrf.mxu3 }
  0xf9   :  { %v5871_v28 = vld [vmem:[#allocation2 + $0x98] sm:$0xf]  ;;  %v4673_v12 = vor.u32 %v5869_v27, %v5867_v26  ;;  %v5956_v27 = vld [vmem:[#allocation2 + $0x3f8] sm:$0xf0] }
  0xfa   :  { %v5873_v29 = vld [vmem:[#allocation2 + $0xb4] sm:$0xf0]  ;;  %2011 = vmatpush.bf16.msra.mxu3 %v4737_v10  ;;  %1984 = vmatpush.bf16.msra.mxu1 %v4193_v24  ;;  %v6021_v26 = vld [vmem:[#allocation2 + $0x178] sm:$0xf0] }
  0xfb   :  { %v5875_v30 = vld [vmem:[#allocation2 + $0x298] sm:$0xf]  ;;  %v3873_v14 = vor.u32 %v5873_v29, %v5871_v28  ;;  %v5958_v28 = vld [vmem:[#allocation2 + $0x5dc] sm:$0xf] }
  0xfc   :  { %v5877_v31 = vld [vmem:[#allocation2 + $0x2b4] sm:$0xf0]  ;;  %1998 = vmatpush.bf16.msra.mxu2 %v4449_v36  ;;  %v5960_v29 = vld [vmem:[#allocation2 + $0x5f8] sm:$0xf0]  ;;  %1971 = vmatpush.bf16.msra.mxu0 %v3905_v56 }
  0xfd   :  { %v5883_v40 = vld [vmem:[#allocation2 + $0x498] sm:$0xf]  ;;  %v4129_v15 = vor.u32 %v5877_v31, %v5875_v30  ;;  %v2450_v30 = vmul.f32 %v2449_v11, %v5817_v39  ;;  %v1725_v31 = vadd.f32 %v1724_v13, %v1711_v54  ;;  %v5967_v36 = vld [vmem:[#allocation2 + $0x7dc] sm:$0xf]  ;;  %v1712_v11 = vpop.f32.mrf.mxu1 }
  0xfe   :  { %v5885_v41 = vld [vmem:[#allocation2 + $0x4b4] sm:$0xf0]  ;;  %2012 = vmatpush.bf16.msra.mxu3 %v4705_v47  ;;  %v5977_v47 = vld [vmem:[#allocation2 + $0x1b8] sm:$0xf0]  ;;  %1985 = vmatpush.bf16.msra.mxu1 %v4161_v57  ;;  %v6015_v57 = vpop.eup %5574 }
  0xff   :  { %v5887_v42 = vld [vmem:[#allocation2 + $0x698] sm:$0xf]  ;;  %v4385_v24 = vor.u32 %v5885_v41, %v5883_v40  ;;  %v2120_v40 = vadd.f32 0.18741608, %v2119_v1  ;;  %v2438_v41 = vadd.f32 0.05243302, %v2437_v3  ;;  %v5979_v54 = vadd.f32 %v1738_v23, %v1725_v31 }
 0x100   :  { %v5889_v43 = vld [vmem:[#allocation2 + $0x6b4] sm:$0xf0]  ;;  %v2451_v52 = vadd.f32 0.4994258, %v2450_v30  ;;  %1999 = vmatpush.bf16.msra.mxu2 %v4417_v5  ;;  %v5985_v3 = vld [vmem:[#allocation2 + $0x39c] sm:$0xf]  ;;  %1972 = vmatpush.bf16.msra.mxu0 %v3873_v14  ;;  %vm2140_vm1 = vweird.f32 %v6015_v57 }
 0x101   :  { %v5891_v44 = vld [vmem:[#allocation2 + $0x58] sm:$0xf]  ;;  %v4641_v25 = vor.u32 %v5889_v43, %v5887_v42  ;;  %v1698_v42 = vpop.f32.mrf.mxu0  ;;  %6943 = vst [vmem:[#allocation14_spill] sm:$0xff] %v5979_v54  ;;  %v5987_v13 = vld [vmem:[#allocation2 + $0x3b8] sm:$0xf0]  ;;  %v2121_v43 = vmul.f32 %v2120_v40, %v5802_v53  ;;  %v2439_v35 = vmul.f32 %v2438_v41, %v5817_v39  ;;  %v1726_v53 = vpop.f32.mrf.mxu2  ;;  %vm6100_vm2 = vmor %vm2139_vm0, %vm2140_vm1 }
 0x102   :  { %v5893_v45 = vld [vmem:[#allocation2 + $0x74] sm:$0xf0]  ;;  %2013 = vmatpush.bf16.msra.mxu3 %v4673_v12  ;;  %v1699_v46 = vadd.f32 %v1698_v42, %v316_v8  ;;  %v5997_v30 = vld [vmem:[#allocation2 + $0x59c] sm:$0xf]  ;;  %v2452_v12 = vmul.f32 %v2451_v52, %v5817_v39  ;;  %v6005_v1 = vmul.f32 0.70710677, %v5979_v54  ;;  %v2135_v54 = vmul.f32 %v6015_v57, %v5920_v2  ;;  %1986 = vmatpush.bf16.msra.mxu1 %v4129_v15  ;;  %v1740_v15 = vpop.f32.mrf.mxu3 }
 0x103   :  { %v5898_v48 = vld [vmem:[#allocation2 + $0x258] sm:$0xf]  ;;  %v5999_v31 = vld [vmem:[#allocation2 + $0x5b8] sm:$0xf0] }
 0x104   :  { %v5900_v49 = vld [vmem:[#allocation2 + $0x274] sm:$0xf0]  ;;  %6944 = vst [vmem:[#allocation15_spill] sm:$0xff] %v5999_v31  ;;  %v6001_v56 = vld [vmem:[#allocation2 + $0x79c] sm:$0xf]  ;;  %v1713_v52 = vadd.f32 %v1712_v11, %v1699_v46  ;;  %v6029_v4 = vadd.f32 1.0, %v2452_v12  ;;  %2000 = vmatpush.bf16.msra.mxu2 %v4385_v24  ;;  %v2151_v32 = vmul.f32 %v6005_v1, %v6005_v1 }
 0x105   :  { %v5902_v50 = vld [vmem:[#allocation2 + $0x458] sm:$0xf]  ;;  %6945 = vst [vmem:[#allocation16_spill] sm:$0xff] %v6001_v56  ;;  %v6011_v5 = vld [vmem:[#allocation2 + $0x7b8] sm:$0xf0]  ;;  %v2145_v11 = vand.u32 2147483648, %v5920_v2 }
 0x106   :  { %v5904_v51 = vld [vmem:[#allocation2 + $0x474] sm:$0xf0]  ;;  %6946 = vst [vmem:[#allocation17_spill] sm:$0xff] %v6005_v1  ;;  %v6013_v23 = vld [vmem:[#allocation2 + $0x15c] sm:$0xf]  ;;  %2014 = vmatpush.bf16.msra.mxu3 %v4641_v25  ;;  %v1727_v12 = vadd.f32 %v1726_v53, %v1713_v52  ;;  %v2136_v40 = vsub.f32 1.0, %v2135_v54  ;;  %5576 = vrcp.f32 %v6029_v4  ;;  %vm2459_vm5 = vweird.f32 %v6029_v4 }
 0x107   :  { %v5911_v58 = vld [vmem:[#allocation2 + $0x658] sm:$0xf]  ;;  %6947 = vst [vmem:[#allocation18_spill] sm:$0xff] %v6011_v5  ;;  %v6023_v8 = vld [vmem:[#allocation2 + $0x35c] sm:$0xf]  ;;  %v3973_v34 = vor.u32 %v6013_v23, %v6021_v26  ;;  %v6057_v24 = vmin.f32 %v2151_v32, 16.0  ;;  %v6948_v5 = vor.u32 %v5893_v45, %v5891_v44  ;;  %v6950_v32 = vor.u32 %v5904_v51, %v5902_v50 }
 0x108   :  { %v5913_v61 = vld [vmem:[#allocation2 + $0x674] sm:$0xf0]  ;;  %v6025_v42 = vld [vmem:[#allocation2 + $0x378] sm:$0xf0]  ;;  %v2122_v52 = vadd.f32 1.1283791, %v2121_v43  ;;  %v6062_v54 = vadd.f32 %v1740_v15, %v1727_v12  ;;  %v2137_v56 = vmul.f32 %v6015_v57, %v2136_v40  ;;  %v6949_v43 = vor.u32 %v5900_v49, %v5898_v48 }
 0x109   :  { %v5915_v62 = vld [vmem:[#allocation2 + $0x18] sm:$0xf]  ;;  %v6035_v41 = vld [vmem:[#allocation2 + $0x55c] sm:$0xf]  ;;  %v2440_v53 = vadd.f32 0.18741608, %v2439_v35  ;;  %1973 = vmatpush.bf16.msra.mxu0 %v6948_v5  ;;  %2001 = vmatpush.bf16.msra.mxu2 %v6950_v32  ;;  %v6951_v12 = vor.u32 %v5913_v61, %v5911_v58 }
 0x10a   :  { %v5917_v63 = vld [vmem:[#allocation2 + $0x34] sm:$0xf0]  ;;  %v6037_v46 = vld [vmem:[#allocation2 + $0x578] sm:$0xf0]  ;;  %v2143_v31 = vand.u32 2147483647, %v5920_v2  ;;  %1987 = vmatpush.bf16.msra.mxu1 %v6949_v43  ;;  %v2138_v49 = vadd.f32 %v6015_v57, %v2137_v56  ;;  %v2123_v43 = vmul.f32 %v2122_v52, %v5798_v33 }
 0x10b   :  { %v5925_v6 = vld [vmem:[#allocation2 + $0x218] sm:$0xf]  ;;  %v6046_v14 = vld [vmem:[#allocation2 + $0x778] sm:$0xf0]  ;;  %v2146_v35 = vor.u32 1.1754944e-38, %v2145_v11  ;;  %2015 = vmatpush.bf16.msra.mxu3 %v6951_v12  ;;  %v4485_v48 = vor.u32 %v6035_v41, %v6037_v46  ;;  %v2441_v61 = vmul.f32 %v2440_v53, %v5817_v39  ;;  %v6954_v12 = vor.u32 %v5917_v63, %v5915_v62 }
 0x10c   :  { %v5927_v7 = vld [vmem:[#allocation2 + $0x234] sm:$0xf0]  ;;  %v6053_v1 = vld [vmem:[#allocation2 + $0x11c] sm:$0xf]  ;;  %v2153_v5 = vmul.f32 2.1237322e-06, %v6057_v24  ;;  %v6110_v51 = vpop.eup %5576  ;;  %v2142_v33 = vsel %vm6100_vm2, %v6015_v57, %v2138_v49 }
 0x10d   :  { %v5929_v9 = vld [vmem:[#allocation2 + $0x418] sm:$0xf]  ;;  %v6055_v25 = vld [vmem:[#allocation2 + $0x138] sm:$0xf0]  ;;  %v2164_v40 = vmul.f32 3.8918573e-05, %v6057_v24  ;;  %1974 = vmatpush.bf16.msra.mxu0 %v6954_v12  ;;  %v6955_v39 = vor.u32 %v5927_v7, %v5925_v6  ;;  %vm2460_vm4 = vweird.f32 %v6110_v51 }
 0x10e   :  { %v5931_v10 = vld [vmem:[#allocation2 + $0x434] sm:$0xf0]  ;;  %v6074_v44 = vld [vmem:[#allocation2 + $0x31c] sm:$0xf]  ;;  %v6087_v50 = vmul.f32 0.70710677, %v6062_v54  ;;  %vm6188_vm6 = vmor %vm2459_vm5, %vm2460_vm4 }
 0x10f   :  { %v5939_v16 = vld [vmem:[#allocation2 + $0x618] sm:$0xf]  ;;  %v6076_v45 = vld [vmem:[#allocation2 + $0x338] sm:$0xf0]  ;;  %v2154_v56 = vadd.f32 0.00028619796, %v2153_v5  ;;  %1988 = vmatpush.bf16.msra.mxu1 %v6955_v39  ;;  %v6956_v62 = vor.u32 %v5931_v10, %v5929_v9  ;;  %v2455_v5 = vmul.f32 %v6110_v51, %v6029_v4  ;;  %v6958_v9 = vor.u32 %v5943_v19, %v5945_v20 }
 0x110   :  { %v5941_v18 = vld [vmem:[#allocation2 + $0x634] sm:$0xf0]  ;;  %v6093_v15 = vld [vmem:[#allocation2 + $0x51c] sm:$0xf]  ;;  %v2165_v32 = vadd.f32 0.001143296, %v2164_v40  ;;  %v2471_v2 = vmul.f32 %v6087_v50, %v6087_v50  ;;  %v4197_v63 = vor.u32 %v6074_v44, %v6076_v45  ;;  %v6961_v20 = vor.u32 %v5967_v36, %v5969_v37  ;;  %1975 = vmatmul.bf16.vlgmr.msra.gmra.mxu0 %v5763_v59 }
 0x111   :  { %v6108_v11 = vld [vmem:[#allocation2 + $0x538] sm:$0xf0]  ;;  %vm2144_vm3 = vcmp.eq.f32.partialorder %v2143_v31, 8.507059e+37  ;;  %2002 = vmatpush.bf16.msra.mxu2 %v6956_v62  ;;  %v2079_v57 = vmul.f32 0.5, %v5795_v21  ;;  %v2155_v6 = vmul.f32 %v2154_v56, %v6057_v24  ;;  %v6957_v7 = vor.u32 %v5941_v18, %v5939_v16  ;;  %2023 = vmatpush.bf16.msrb.mxu0 %v6958_v9  ;;  %v6964_v39 = vld [vmem:[#allocation15_spill] sm:$0xff] }
 0x112   :  { %v6125_v52 = vld [vmem:[#allocation2 + $0x71c] sm:$0xf]  ;;  %v2147_v31 = vsel %vm2144_vm3, %v2146_v35, %v2142_v33  ;;  %v2166_v40 = vmul.f32 %v2165_v32, %v6057_v24  ;;  %v6140_v49 = vmin.f32 %v2471_v2, 16.0  ;;  %v6959_v21 = vor.u32 %v5947_v22, %v5956_v27  ;;  %1989 = vmatmul.bf16.vlgmr.msra.gmra.mxu1 %v5767_v0 }
 0x113   :  { %v6127_v53 = vld [vmem:[#allocation2 + $0x738] sm:$0xf0]  ;;  %2016 = vmatpush.bf16.msra.mxu3 %v6957_v7  ;;  %v2148_v10 = vmul.f32 %v2147_v31, %v2123_v43  ;;  %v6960_v35 = vor.u32 %v5958_v28, %v5960_v29  ;;  %v4453_v16 = vor.u32 %v6093_v15, %v6108_v11  ;;  %v2442_v18 = vadd.f32 1.1283791, %v2441_v61  ;;  %v6966_v31 = vld [vmem:[#allocation11_spill] sm:$0xff]  ;;  %v6967_v7 = vld [vmem:[#allocation16_spill] sm:$0xff] }
 0x114   :  { %2037 = vmatpush.bf16.msrb.mxu1 %v6959_v21  ;;  %v2456_v58 = vsub.f32 1.0, %v2455_v5  ;;  %v2156_v19 = vadd.f32 0.0036580483, %v2155_v6  ;;  %2003 = vmatmul.bf16.vlgmr.msra.gmra.mxu2 %v5761_v55  ;;  %v4709_v22 = vor.u32 %v6125_v52, %v6127_v53  ;;  %v2465_v43 = vand.u32 2147483648, %v6029_v4  ;;  %v6968_v9 = vld [vmem:[#allocation18_spill] sm:$0xff]  ;;  %v1794_v45 = vpop.f32.mrf.mxu3 }
 0x115   :  { %2051 = vmatpush.bf16.msrb.mxu2 %v6960_v35  ;;  %v4806_v27 = vclamps-f32 %v2148_v10, 1.0  ;;  %v2167_v28 = vadd.f32 0.014752088, %v2166_v40  ;;  %v2473_v29 = vmul.f32 2.1237322e-06, %v6140_v49  ;;  %v6962_v56 = vor.u32 %v5971_v38, %v5977_v47 }
 0x116   :  { %2017 = vmatmul.bf16.vlgmr.msra.gmra.mxu3 %v5765_v60  ;;  %v2457_v61 = vmul.f32 %v6110_v51, %v2456_v58  ;;  %v2463_v36 = vand.u32 2147483647, %v6029_v4  ;;  %v2484_v37 = vmul.f32 3.8918573e-05, %v6140_v49  ;;  %v6963_v2 = vor.u32 %v5985_v3, %v5987_v13  ;;  %v6182_v40 = vld [vmem:[#allocation2 + $0xdc] sm:$0xf] }
 0x117   :  { %2065 = vmatpush.bf16.msrb.mxu3 %v6961_v20  ;;  %2024 = vmatpush.bf16.msrb.mxu0 %v6962_v56  ;;  %v2751_v32 = vadd.f32 1.0, %v4806_v27  ;;  %v2168_v12 = vmul.f32 %v2167_v28, %v6057_v24  ;;  %v2474_v33 = vadd.f32 0.00028619796, %v2473_v29  ;;  %v6965_v62 = vor.u32 %v5997_v30, %v6964_v39  ;;  %v6184_v3 = vld [vmem:[#allocation2 + $0xf8] sm:$0xf0]  ;;  %v6972_v20 = vld [vmem:[#allocation13_spill] sm:$0xff] }
 0x118   :  { %2038 = vmatpush.bf16.msrb.mxu1 %v6963_v2  ;;  %v317_v5 = vperm.slane %v6966_v31, 2  ;;  %v2458_v6 = vadd.f32 %v6110_v51, %v2457_v61  ;;  %v2157_v38 = vmul.f32 %v2156_v19, %v6057_v24  ;;  %v2485_v47 = vadd.f32 0.001143296, %v2484_v37  ;;  %v6193_v58 = vld [vmem:[#allocation2 + $0x2dc] sm:$0xf]  ;;  %v6975_v39 = vld [vmem:[#allocation12_spill] sm:$0xff] }
 0x119   :  { %2052 = vmatpush.bf16.msrb.mxu2 %v6965_v62  ;;  %v6969_v10 = vor.u32 %v6967_v7, %v6968_v9  ;;  %v2767_v13 = vmul.f32 %v2751_v32, %v2079_v57  ;;  %v2466_v21 = vor.u32 1.1754944e-38, %v2465_v43  ;;  %v2169_v4 = vadd.f32 0.112945676, %v2168_v12  ;;  %v6195_v19 = vld [vmem:[#allocation2 + $0x2f8] sm:$0xf0]  ;;  %v1752_v43 = vpop.f32.mrf.mxu0 }
 0x11a   :  { %v2475_v35 = vmul.f32 %v2474_v33, %v6140_v49  ;;  %v2443_v27 = vmul.f32 %v2442_v18, %v6972_v20  ;;  %v2462_v57 = vsel %vm6188_vm6, %v6110_v51, %v2458_v6  ;;  %vm2464_vm7 = vcmp.eq.f32.partialorder %v2463_v36, 8.507059e+37  ;;  %v5367_v29 = vld [vmem:[#allocation2 + $0x4dc] sm:$0xf]  ;;  %v1766_v51 = vpop.f32.mrf.mxu1 }
 0x11b   :  { %2066 = vmatpush.bf16.msrb.mxu3 %v6969_v10  ;;  %v2486_v28 = vmul.f32 %v2485_v47, %v6140_v49  ;;  %2025 = vmatpush.bf16.msrb.mxu0 %v3973_v34  ;;  %v4418_v61 = vld [vmem:[#allocation2 + $0x4f8] sm:$0xf0]  ;;  %2783 = vst [vmem:[#allocation7] sm:$0xff] %v2767_v13  ;;  %v2467_v37 = vsel %vm2464_vm7, %v2466_v21, %v2462_v57  ;;  %v2158_v34 = vadd.f32 0.05243302, %v2157_v38 }
 0x11c   :  { %v2170_v56 = vmul.f32 %v2169_v4, %v6057_v24  ;;  %v2476_v32 = vadd.f32 0.0036580483, %v2475_v35  ;;  %v6973_v18 = vor.u32 %v6023_v8, %v6025_v42  ;;  %v5431_v36 = vld [vmem:[#allocation2 + $0x6dc] sm:$0xf]  ;;  %v2468_v26 = vmul.f32 %v2467_v37, %v2443_v27 }
 0x11d   :  { %2053 = vmatpush.bf16.msrb.mxu2 %v4485_v48  ;;  %v2487_v23 = vadd.f32 0.014752088, %v2486_v28  ;;  %v6974_v12 = vor.u32 %v6044_v17, %v6046_v14  ;;  %v1753_v33 = vadd.f32 %v1752_v43, %v317_v5  ;;  %v4674_v2 = vld [vmem:[#allocation2 + $0x6f8] sm:$0xf0]  ;;  %v2087_v8 = vmul.f32 0.5, %v6975_v39 }
 0x11e   :  { %2039 = vmatpush.bf16.msrb.mxu1 %v6973_v18  ;;  %v2171_v42 = vadd.f32 0.4994258, %v2170_v56  ;;  %v2477_v62 = vmul.f32 %v2476_v32, %v6140_v49  ;;  %v3909_v41 = vor.u32 %v6182_v40, %v6184_v3  ;;  %v5231_v46 = vld [vmem:[#allocation2 + $0x9c] sm:$0xf]  ;;  %v4814_v48 = vclamps-f32 %v2468_v26, 1.0 }
 0x11f   :  { %2067 = vmatpush.bf16.msrb.mxu3 %v6974_v12  ;;  %v2488_v6 = vmul.f32 %v2487_v23, %v6140_v49  ;;  %v6976_v17 = vor.u32 %v6053_v1, %v6055_v25  ;;  %v1767_v14 = vadd.f32 %v1766_v51, %v1753_v33  ;;  %v4165_v38 = vor.u32 %v6193_v58, %v6195_v19  ;;  %v3874_v47 = vld [vmem:[#allocation2 + $0xb8] sm:$0xf0]  ;;  %v1780_v1 = vpop.f32.mrf.mxu2 }
 0x120   :  { %v5295_v7 = vld [vmem:[#allocation2 + $0x29c] sm:$0xf]  ;;  %v2172_v9 = vmul.f32 %v2171_v42, %v6057_v24  ;;  %v4421_v10 = vor.u32 %v5367_v29, %v4418_v61  ;;  %v4677_v40 = vor.u32 %v5431_v36, %v4674_v2  ;;  %v2759_v30 = vadd.f32 1.0, %v4814_v48 }
 0x121   :  { %2026 = vmatpush.bf16.msrb.mxu0 %v6976_v17  ;;  %2054 = vmatpush.bf16.msrb.mxu2 %v4453_v16  ;;  %v4130_v25 = vld [vmem:[#allocation2 + $0x2b8] sm:$0xf0]  ;;  %v2159_v21 = vmul.f32 %v2158_v34, %v6057_v24  ;;  %v2489_v4 = vadd.f32 0.112945676, %v2488_v6  ;;  %v1781_v44 = vadd.f32 %v1780_v1, %v1767_v14  ;;  %v2478_v11 = vadd.f32 0.05243302, %v2477_v62  ;;  %v1754_v27 = vpop.f32.mrf.mxu0 }
 0x122   :  { %2040 = vmatpush.bf16.msrb.mxu1 %v4197_v63  ;;  %v5359_v3 = vld [vmem:[#allocation2 + $0x49c] sm:$0xf]  ;;  %v6238_v35 = vadd.f32 1.0, %v2172_v9  ;;  %v2775_v16 = vmul.f32 %v2759_v30, %v2087_v8  ;;  %v3877_v20 = vor.u32 %v5231_v46, %v3874_v47  ;;  %v4133_v52 = vor.u32 %v5295_v7, %v4130_v25  ;;  %v1796_v25 = vpop.f32.mrf.mxu3 }
 0x123   :  { %v4386_v13 = vld [vmem:[#allocation2 + $0x4b8] sm:$0xf0]  ;;  %2068 = vmatpush.bf16.msrb.mxu3 %v4709_v22  ;;  %v2490_v58 = vmul.f32 %v2489_v4, %v6140_v49  ;;  %v6241_v19 = vadd.f32 %v1794_v45, %v1781_v44  ;;  %v1768_v22 = vpop.f32.mrf.mxu1  ;;  %v2160_v56 = vadd.f32 0.18741608, %v2159_v21  ;;  %v1755_v51 = vadd.f32 %v1754_v27, %v317_v5 }
 0x124   :  { %v5423_v63 = vld [vmem:[#allocation2 + $0x69c] sm:$0xf]  ;;  %5578 = vrcp.f32 %v6238_v35  ;;  %v4389_v53 = vor.u32 %v5359_v3, %v4386_v13  ;;  %2789 = vst [vmem:[#allocation7 + $0x30] sm:$0xff] %v2775_v16  ;;  %v2479_v36 = vmul.f32 %v2478_v11, %v6140_v49  ;;  %vm2179_vm8 = vweird.f32 %v6238_v35 }
 0x125   :  { %v4642_v15 = vld [vmem:[#allocation2 + $0x6b8] sm:$0xf0]  ;;  %2027 = vmatpush.bf16.msrb.mxu0 %v3909_v41  ;;  %2055 = vmatpush.bf16.msrb.mxu2 %v4421_v10  ;;  %v2491_v32 = vadd.f32 0.4994258, %v2490_v58  ;;  %v6248_v26 = vmul.f32 0.70710677, %v6241_v19  ;;  %v1769_v33 = vadd.f32 %v1768_v22, %v1755_v51  ;;  %v2161_v17 = vmul.f32 %v2160_v56, %v6057_v24 }
 0x126   :  { %v5223_v57 = vld [vmem:[#allocation2 + $0x5c] sm:$0xf]  ;;  %2041 = vmatpush.bf16.msrb.mxu1 %v4165_v38  ;;  %v4645_v18 = vor.u32 %v5423_v63, %v4642_v15  ;;  %v2185_v24 = vand.u32 2147483648, %v6238_v35  ;;  %v2183_v16 = vand.u32 2147483647, %v6238_v35  ;;  %v6978_v56 = vld [vmem:[#allocation17_spill] sm:$0xff] }
 0x127   :  { %v3842_v28 = vld [vmem:[#allocation2 + $0x78] sm:$0xf0]  ;;  %2069 = vmatpush.bf16.msrb.mxu3 %v4677_v40  ;;  %v2492_v12 = vmul.f32 %v2491_v32, %v6140_v49  ;;  %v2191_v62 = vmul.f32 %v6248_v26, %v6248_v26  ;;  %v1782_v41 = vpop.f32.mrf.mxu2  ;;  %v2480_v40 = vadd.f32 0.18741608, %v2479_v36  ;;  %v2162_v45 = vadd.f32 1.1283791, %v2161_v17 }
 0x128   :  { %v5287_v43 = vld [vmem:[#allocation2 + $0x25c] sm:$0xf]  ;;  %v3845_v2 = vor.u32 %v5223_v57, %v3842_v28  ;;  %v1783_v47 = vadd.f32 %v1782_v41, %v1769_v33  ;;  %vm2184_vm11 = vcmp.eq.f32.partialorder %v2183_v16, 8.507059e+37 }
 0x129   :  { %v4098_v29 = vld [vmem:[#allocation2 + $0x278] sm:$0xf0]  ;;  %2028 = vmatpush.bf16.msrb.mxu0 %v3877_v20  ;;  %2056 = vmatpush.bf16.msrb.mxu2 %v4389_v53  ;;  %v6254_v14 = vadd.f32 1.0, %v2492_v12  ;;  %v6256_v1 = vmin.f32 %v2191_v62, 16.0  ;;  %v2481_v58 = vmul.f32 %v2480_v40, %v6140_v49  ;;  %v2163_v32 = vmul.f32 %v2162_v45, %v6978_v56 }
 0x12a   :  { %v5351_v61 = vld [vmem:[#allocation2 + $0x45c] sm:$0xf]  ;;  %2042 = vmatpush.bf16.msrb.mxu1 %v4133_v52  ;;  %v4101_v31 = vor.u32 %v5287_v43, %v4098_v29  ;;  %v5579_v10 = vpop.eup %5578  ;;  %v6263_v15 = vadd.f32 %v1796_v25, %v1783_v47  ;;  %v2186_v43 = vor.u32 1.1754944e-38, %v2185_v24 }
 0x12b   :  { %v4354_v37 = vld [vmem:[#allocation2 + $0x478] sm:$0xf0]  ;;  %2070 = vmatpush.bf16.msrb.mxu3 %v4645_v18  ;;  %v2175_v3 = vmul.f32 %v5579_v10, %v6238_v35  ;;  %5580 = vrcp.f32 %v6254_v14  ;;  %v2193_v21 = vmul.f32 2.1237322e-06, %v6256_v1  ;;  %v2204_v11 = vmul.f32 3.8918573e-05, %v6256_v1 }
 0x12c   :  { %v5415_v34 = vld [vmem:[#allocation2 + $0x65c] sm:$0xf]  ;;  %v4357_v5 = vor.u32 %v5351_v61, %v4354_v37  ;;  %vm2180_vm9 = vweird.f32 %v5579_v10  ;;  %v6269_v28 = vmul.f32 0.70710677, %v6263_v15  ;;  %v2503_v35 = vand.u32 2147483647, %v6254_v14 }
 0x12d   :  { %v4610_v23 = vld [vmem:[#allocation2 + $0x678] sm:$0xf0]  ;;  %2029 = vmatpush.bf16.msrb.mxu0 %v3845_v2  ;;  %v2176_v63 = vsub.f32 1.0, %v2175_v3  ;;  %v2194_v20 = vadd.f32 0.00028619796, %v2193_v21  ;;  %vm2181_vm10 = vmor %vm2179_vm8, %vm2180_vm9  ;;  %vm2499_vm13 = vweird.f32 %v6254_v14 }
 0x12e   :  { %v5215_v39 = vld [vmem:[#allocation2 + $0x1c] sm:$0xf]  ;;  %v4613_v38 = vor.u32 %v5415_v34, %v4610_v23  ;;  %2043 = vmatpush.bf16.msrb.mxu1 %v4101_v31  ;;  %2057 = vmatpush.bf16.msrb.mxu2 %v4357_v5  ;;  %v2205_v57 = vadd.f32 0.001143296, %v2204_v11  ;;  %v2511_v49 = vmul.f32 %v6269_v28, %v6269_v28  ;;  %v2482_v34 = vadd.f32 1.1283791, %v2481_v58 }
 0x12f   :  { %v3810_v8 = vld [vmem:[#allocation2 + $0x38] sm:$0xf0]  ;;  %v2177_v27 = vmul.f32 %v5579_v10, %v2176_v63  ;;  %v2195_v52 = vmul.f32 %v2194_v20, %v6256_v1  ;;  %vm2504_vm14 = vcmp.eq.f32.partialorder %v2503_v35, 8.507059e+37 }
 0x130   :  { %v5279_v42 = vld [vmem:[#allocation2 + $0x21c] sm:$0xf]  ;;  %v3813_v13 = vor.u32 %v5215_v39, %v3810_v8  ;;  %2071 = vmatpush.bf16.msrb.mxu3 %v4613_v38  ;;  %v2206_v37 = vmul.f32 %v2205_v57, %v6256_v1  ;;  %v6282_v12 = vmin.f32 %v2511_v49, 16.0  ;;  %v2505_v39 = vand.u32 2147483648, %v6254_v14 }
 0x131   :  { %v4066_v46 = vld [vmem:[#allocation2 + $0x238] sm:$0xf0]  ;;  %v5581_v53 = vpop.eup %5580  ;;  %v2178_v61 = vadd.f32 %v5579_v10, %v2177_v27  ;;  %v2196_v51 = vadd.f32 0.0036580483, %v2195_v52 }
 0x132   :  { %v5343_v48 = vld [vmem:[#allocation2 + $0x41c] sm:$0xf]  ;;  %v4069_v30 = vor.u32 %v5279_v42, %v4066_v46  ;;  %2030 = vmatpush.bf16.msrb.mxu0 %v3813_v13  ;;  %v2495_v18 = vmul.f32 %v5581_v53, %v6254_v14  ;;  %v2207_v23 = vadd.f32 0.014752088, %v2206_v37  ;;  %v2513_v42 = vmul.f32 2.1237322e-06, %v6282_v12  ;;  %v1822_v13 = vpop.f32.mrf.mxu1  ;;  %v1836_v20 = vpop.f32.mrf.mxu2 }
 0x133   :  { %v4322_v6 = vld [vmem:[#allocation2 + $0x438] sm:$0xf0]  ;;  %v2182_v36 = vsel %vm2181_vm10, %v5579_v10, %v2178_v61  ;;  %v2524_v62 = vmul.f32 3.8918573e-05, %v6282_v12  ;;  %vm2500_vm12 = vweird.f32 %v5581_v53  ;;  %v2506_v47 = vor.u32 1.1754944e-38, %v2505_v39  ;;  %v1808_v10 = vpop.f32.mrf.mxu0 }
 0x134   :  { %v5407_v7 = vld [vmem:[#allocation2 + $0x61c] sm:$0xf]  ;;  %v4325_v4 = vor.u32 %v5343_v48, %v4322_v6  ;;  %2044 = vmatpush.bf16.msrb.mxu1 %v4069_v30  ;;  %v2187_v33 = vsel %vm2184_vm11, %v2186_v43, %v2182_v36  ;;  %v2496_v2 = vsub.f32 1.0, %v2495_v18  ;;  %v2514_v48 = vadd.f32 0.00028619796, %v2513_v42  ;;  %vm2501_vm15 = vmor %vm2499_vm13, %vm2500_vm12  ;;  %v1850_v52 = vpop.f32.mrf.mxu3 }
 0x135   :  { %v4578_v9 = vld [vmem:[#allocation2 + $0x638] sm:$0xf0]  ;;  %2031 = vmatmul.bf16.vlgmr.msrb.gmra.mxu0 %v5763_v59  ;;  %v2188_v8 = vmul.f32 %v2187_v33, %v2163_v32  ;;  %v2208_v59 = vmul.f32 %v2207_v23, %v6256_v1  ;;  %v2525_v17 = vadd.f32 0.001143296, %v2524_v62 }
 0x136   :  { %v4581_v44 = vor.u32 %v5407_v7, %v4578_v9  ;;  %2058 = vmatpush.bf16.msrb.mxu2 %v4325_v4  ;;  %v6977_v22 = vld [vmem:[#allocation14_spill] sm:$0xff]  ;;  %v2497_v31 = vmul.f32 %v5581_v53, %v2496_v2  ;;  %v2515_v9 = vmul.f32 %v2514_v48, %v6282_v12 }
 0x137   :  { %v2080_v29 = vmul.f32 0.5, %v6977_v22  ;;  %2045 = vmatmul.bf16.vlgmr.msrb.gmra.mxu1 %v5767_v0  ;;  %v2197_v0 = vmul.f32 %v2196_v51, %v6256_v1  ;;  %v4807_v41 = vclamps-f32 %v2188_v8, 1.0  ;;  %v2209_v46 = vadd.f32 0.112945676, %v2208_v59 }
 0x138   :  { %2072 = vmatpush.bf16.msrb.mxu3 %v4581_v44  ;;  %v2498_v6 = vadd.f32 %v5581_v53, %v2497_v31  ;;  %v2526_v3 = vmul.f32 %v2525_v17, %v6282_v12  ;;  %v2516_v14 = vadd.f32 0.0036580483, %v2515_v9 }
 0x139   :  { %2059 = vmatmul.bf16.vlgmr.msrb.gmra.mxu2 %v5761_v55  ;;  %v6296_v55 = vld [vmem:[%s6927_s2] sm:$0xff]  ;;  %v2752_v38 = vadd.f32 1.0, %v4807_v41  ;;  %v2210_v7 = vmul.f32 %v2209_v46, %v6256_v1  ;;  %v2198_v25 = vadd.f32 0.05243302, %v2197_v0 }
 0x13a   :  { %v318_v5 = vperm.slane %v6296_v55, 3  ;;  %v2502_v40 = vsel %vm2501_vm15, %v5581_v53, %v2498_v6  ;;  %v2527_v44 = vadd.f32 0.014752088, %v2526_v3  ;;  %v2517_v57 = vmul.f32 %v2516_v14, %v6282_v12  ;;  %v1824_v18 = vpop.f32.mrf.mxu1  ;;  %v1838_v35 = vpop.f32.mrf.mxu2 }
 0x13b   :  { %2073 = vmatmul.bf16.vlgmr.msrb.gmra.mxu3 %v5765_v60  ;;  %v2483_v60 = vmul.f32 %v2482_v34, %v6087_v50  ;;  %v2768_v30 = vmul.f32 %v2752_v38, %v2080_v29  ;;  %v2507_v24 = vsel %vm2504_vm14, %v2506_v47, %v2502_v40  ;;  %v2211_v21 = vadd.f32 0.4994258, %v2210_v7  ;;  %v1810_v61 = vpop.f32.mrf.mxu0 }
 0x13c   :  { %v1809_v50 = vadd.f32 %v1808_v10, %v318_v5  ;;  %v2199_v16 = vmul.f32 %v2198_v25, %v6256_v1  ;;  %v2528_v58 = vmul.f32 %v2527_v44, %v6282_v12  ;;  %v2088_v53 = vmul.f32 0.5, %v6062_v54  ;;  %v1852_v62 = vpop.f32.mrf.mxu3 }
 0x13d   :  { %v2508_v4 = vmul.f32 %v2507_v24, %v2483_v60  ;;  %2784 = vst [vmem:[#allocation7 + $0x8] sm:$0xff] %v2768_v30  ;;  %v2212_v63 = vmul.f32 %v2211_v21, %v6256_v1  ;;  %v2518_v51 = vadd.f32 0.05243302, %v2517_v57  ;;  %v1811_v36 = vadd.f32 %v1810_v61, %v318_v5 }
 0x13e   :  { %v1823_v45 = vadd.f32 %v1822_v13, %v1809_v50  ;;  %v2529_v29 = vadd.f32 0.112945676, %v2528_v58  ;;  %v2200_v49 = vadd.f32 0.18741608, %v2199_v16  ;;  %v2081_v44 = vmul.f32 0.5, %v6241_v19 }
 0x13f   :  { %v4815_v11 = vclamps-f32 %v2508_v4, 1.0  ;;  %v2213_v27 = vadd.f32 1.0, %v2212_v63  ;;  %v1825_v33 = vadd.f32 %v1824_v18, %v1811_v36  ;;  %v2519_v8 = vmul.f32 %v2518_v51, %v6282_v12 }
 0x140   :  { %v1837_v43 = vadd.f32 %v1836_v20, %v1823_v45  ;;  %v2530_v56 = vmul.f32 %v2529_v29, %v6282_v12  ;;  %v2201_v54 = vmul.f32 %v2200_v49, %v6256_v1 }
 0x141   :  { %v2760_v22 = vadd.f32 1.0, %v4815_v11  ;;  %5582 = vrcp.f32 %v2213_v27  ;;  %v1839_v42 = vadd.f32 %v1838_v35, %v1825_v33  ;;  %v2225_v5 = vand.u32 2147483648, %v2213_v27 }
 0x142   :  { %v6310_v32 = vadd.f32 %v1850_v52, %v1837_v43  ;;  %v2531_v34 = vadd.f32 0.4994258, %v2530_v56  ;;  %v2202_v1 = vadd.f32 1.1283791, %v2201_v54  ;;  %vm2219_vm0 = vweird.f32 %v2213_v27 }
 0x143   :  { %v2776_v37 = vmul.f32 %v2760_v22, %v2088_v53  ;;  %v6324_v60 = vadd.f32 %v1852_v62, %v1839_v42  ;;  %v2223_v48 = vand.u32 2147483647, %v2213_v27  ;;  %v2520_v6 = vadd.f32 0.18741608, %v2519_v8 }
 0x144   :  { %v6313_v23 = vmul.f32 0.70710677, %v6310_v32  ;;  %v2532_v2 = vmul.f32 %v2531_v34, %v6282_v12  ;;  %v2226_v9 = vor.u32 1.1754944e-38, %v2225_v5  ;;  %v2203_v50 = vmul.f32 %v2202_v1, %v6248_v26 }
 0x145   :  { %2790 = vst [vmem:[#allocation7 + $0x38] sm:$0xff] %v2776_v37  ;;  %v6330_v7 = vmul.f32 0.70710677, %v6324_v60  ;;  %v2521_v13 = vmul.f32 %v2520_v6, %v6282_v12  ;;  %vm2224_vm3 = vcmp.eq.f32.partialorder %v2223_v48, 8.507059e+37  ;;  %v319_v43 = vperm.slane %v6296_v55, 4 }
 0x146   :  { %v2231_v59 = vmul.f32 %v6313_v23, %v6313_v23  ;;  %v6320_v0 = vadd.f32 1.0, %v2532_v2 }
 0x147   :  { %v5583_v39 = vpop.eup %5582  ;;  %v2551_v3 = vmul.f32 %v6330_v7, %v6330_v7  ;;  %v2522_v20 = vadd.f32 1.1283791, %v2521_v13  ;;  %v2089_v13 = vmul.f32 0.5, %v6263_v15 }
 0x148   :  { %v2215_v31 = vmul.f32 %v5583_v39, %v2213_v27  ;;  %v6322_v41 = vmin.f32 %v2231_v59, 16.0  ;;  %5584 = vrcp.f32 %v6320_v0  ;;  %vm2220_vm1 = vweird.f32 %v5583_v39  ;;  %v1864_v54 = vpop.f32.mrf.mxu0 }
 0x149   :  { %vm2221_vm2 = vmor %vm2219_vm0, %vm2220_vm1  ;;  %v6338_v4 = vmin.f32 %v2551_v3, 16.0  ;;  %v2545_v57 = vand.u32 2147483648, %v6320_v0  ;;  %v2543_v61 = vand.u32 2147483647, %v6320_v0  ;;  %v2523_v36 = vmul.f32 %v2522_v20, %v6269_v28 }
 0x14a   :  { %v2216_v46 = vsub.f32 1.0, %v2215_v31  ;;  %v2233_v17 = vmul.f32 2.1237322e-06, %v6322_v41  ;;  %v2244_v47 = vmul.f32 3.8918573e-05, %v6322_v41  ;;  %vm2539_vm5 = vweird.f32 %v6320_v0  ;;  %v1878_v59 = vpop.f32.mrf.mxu1 }
 0x14b   :  { %v2553_v58 = vmul.f32 2.1237322e-06, %v6338_v4  ;;  %v2564_v12 = vmul.f32 3.8918573e-05, %v6338_v4  ;;  %v2546_v33 = vor.u32 1.1754944e-38, %v2545_v57  ;;  %vm2544_vm7 = vcmp.eq.f32.partialorder %v2543_v61, 8.507059e+37 }
 0x14c   :  { %v2217_v38 = vmul.f32 %v5583_v39, %v2216_v46  ;;  %v2234_v10 = vadd.f32 0.00028619796, %v2233_v17  ;;  %v2245_v25 = vadd.f32 0.001143296, %v2244_v47  ;;  %v1865_v31 = vadd.f32 %v1864_v54, %v319_v43 }
 0x14d   :  { %v2554_v19 = vadd.f32 0.00028619796, %v2553_v58  ;;  %v2565_v22 = vadd.f32 0.001143296, %v2564_v12 }
 0x14e   :  { %v2218_v40 = vadd.f32 %v5583_v39, %v2217_v38  ;;  %v2235_v30 = vmul.f32 %v2234_v10, %v6322_v41  ;;  %v5585_v24 = vpop.eup %5584  ;;  %v2246_v14 = vmul.f32 %v2245_v25, %v6322_v41  ;;  %v1879_v48 = vadd.f32 %v1878_v59, %v1865_v31 }
 0x14f   :  { %v2535_v63 = vmul.f32 %v5585_v24, %v6320_v0  ;;  %vm2540_vm4 = vweird.f32 %v5585_v24  ;;  %v2555_v18 = vmul.f32 %v2554_v19, %v6338_v4  ;;  %v2566_v51 = vmul.f32 %v2565_v22, %v6338_v4 }
 0x150   :  { %v2222_v21 = vsel %vm2221_vm2, %v5583_v39, %v2218_v40  ;;  %v2236_v11 = vadd.f32 0.0036580483, %v2235_v30  ;;  %v2247_v26 = vadd.f32 0.014752088, %v2246_v14  ;;  %vm2541_vm6 = vmor %vm2539_vm5, %vm2540_vm4  ;;  %v2082_v59 = vmul.f32 0.5, %v6310_v32 }
 0x151   :  { %v2227_v45 = vsel %vm2224_vm3, %v2226_v9, %v2222_v21  ;;  %v2536_v27 = vsub.f32 1.0, %v2535_v63  ;;  %v2556_v39 = vadd.f32 0.0036580483, %v2555_v18  ;;  %v2567_v8 = vadd.f32 0.014752088, %v2566_v51  ;;  %v1866_v21 = vpop.f32.mrf.mxu0 }
 0x152   :  { %v2228_v16 = vmul.f32 %v2227_v45, %v2203_v50  ;;  %v2248_v53 = vmul.f32 %v2247_v26, %v6322_v41  ;;  %v2237_v37 = vmul.f32 %v2236_v11, %v6322_v41  ;;  %v1892_v38 = vpop.f32.mrf.mxu2  ;;  %v1880_v63 = vpop.f32.mrf.mxu1  ;;  %v1867_v26 = vadd.f32 %v1866_v21, %v319_v43 }
 0x153   :  { %v2537_v29 = vmul.f32 %v5585_v24, %v2536_v27  ;;  %v2557_v28 = vmul.f32 %v2556_v39, %v6338_v4  ;;  %v2568_v0 = vmul.f32 %v2567_v8, %v6338_v4  ;;  %v1893_v10 = vadd.f32 %v1892_v38, %v1879_v48 }
 0x154   :  { %v4808_v52 = vclamps-f32 %v2228_v16, 1.0  ;;  %v2249_v56 = vadd.f32 0.112945676, %v2248_v53  ;;  %v2238_v62 = vadd.f32 0.05243302, %v2237_v37  ;;  %v1906_v40 = vpop.f32.mrf.mxu3  ;;  %v1881_v12 = vadd.f32 %v1880_v63, %v1867_v26 }
 0x155   :  { %v2538_v34 = vadd.f32 %v5585_v24, %v2537_v29  ;;  %v2569_v17 = vadd.f32 0.112945676, %v2568_v0  ;;  %v2558_v3 = vadd.f32 0.05243302, %v2557_v28 }
 0x156   :  { %v2753_v49 = vadd.f32 1.0, %v4808_v52  ;;  %v2250_v35 = vmul.f32 %v2249_v56, %v6322_v41  ;;  %v2239_v9 = vmul.f32 %v2238_v62, %v6322_v41 }
 0x157   :  { %v2542_v42 = vsel %vm2541_vm6, %v5585_v24, %v2538_v34  ;;  %v2570_v50 = vmul.f32 %v2569_v17, %v6338_v4  ;;  %v6360_v24 = vadd.f32 %v1906_v40, %v1893_v10  ;;  %v2559_v11 = vmul.f32 %v2558_v3, %v6338_v4 }
 0x158   :  { %v2769_v2 = vmul.f32 %v2753_v49, %v2081_v44  ;;  %v2547_v5 = vsel %vm2544_vm7, %v2546_v33, %v2542_v42  ;;  %v2251_v1 = vadd.f32 0.4994258, %v2250_v35  ;;  %v2240_v44 = vadd.f32 0.18741608, %v2239_v9 }
 0x159   :  { %v2548_v46 = vmul.f32 %v2547_v5, %v2523_v36  ;;  %v2571_v45 = vadd.f32 0.4994258, %v2570_v50  ;;  %v6364_v16 = vmul.f32 0.70710677, %v6360_v24  ;;  %v2560_v53 = vadd.f32 0.18741608, %v2559_v11 }
 0x15a   :  { %2785 = vst [vmem:[#allocation7 + $0x10] sm:$0xff] %v2769_v2  ;;  %v2252_v6 = vmul.f32 %v2251_v1, %v6322_v41  ;;  %v1894_v20 = vpop.f32.mrf.mxu2  ;;  %v2241_v27 = vmul.f32 %v2240_v44, %v6322_v41  ;;  %v320_v3 = vperm.slane %v6296_v55, 5 }
 0x15b   :  { %v4816_v47 = vclamps-f32 %v2548_v46, 1.0  ;;  %v2572_v58 = vmul.f32 %v2571_v45, %v6338_v4  ;;  %v2271_v15 = vmul.f32 %v6364_v16, %v6364_v16  ;;  %v1895_v22 = vadd.f32 %v1894_v20, %v1881_v12 }
 0x15c   :  { %v2253_v25 = vadd.f32 1.0, %v2252_v6  ;;  %v1908_v29 = vpop.f32.mrf.mxu3  ;;  %v2242_v49 = vadd.f32 1.1283791, %v2241_v27  ;;  %v2561_v36 = vmul.f32 %v2560_v53, %v6338_v4 }
 0x15d   :  { %v2761_v30 = vadd.f32 1.0, %v4816_v47  ;;  %v6370_v57 = vadd.f32 1.0, %v2572_v58  ;;  %v6372_v19 = vmin.f32 %v2271_v15, 16.0  ;;  %v6377_v51 = vadd.f32 %v1908_v29, %v1895_v22 }
 0x15e   :  { %5586 = vrcp.f32 %v2253_v25  ;;  %v2265_v43 = vand.u32 2147483648, %v2253_v25  ;;  %vm2259_vm8 = vweird.f32 %v2253_v25  ;;  %v2263_v41 = vand.u32 2147483647, %v2253_v25 }
 0x15f   :  { %v2777_v14 = vmul.f32 %v2761_v30, %v2089_v13  ;;  %5588 = vrcp.f32 %v6370_v57  ;;  %v2273_v37 = vmul.f32 2.1237322e-06, %v6372_v19  ;;  %v2284_v18 = vmul.f32 3.8918573e-05, %v6372_v19 }
 0x160   :  { %v6381_v2 = vmul.f32 0.70710677, %v6377_v51  ;;  %v2266_v35 = vor.u32 1.1754944e-38, %v2265_v43  ;;  %v2243_v4 = vmul.f32 %v2242_v49, %v6313_v23  ;;  %vm2264_vm11 = vcmp.eq.f32.partialorder %v2263_v41, 8.507059e+37 }
 0x161   :  { %2791 = vst [vmem:[#allocation7 + $0x40] sm:$0xff] %v2777_v14  ;;  %v2274_v34 = vadd.f32 0.00028619796, %v2273_v37  ;;  %v2285_v54 = vadd.f32 0.001143296, %v2284_v18  ;;  %v2585_v17 = vand.u32 2147483648, %v6370_v57  ;;  %vm2579_vm13 = vweird.f32 %v6370_v57 }
 0x162   :  { %v2591_v31 = vmul.f32 %v6381_v2, %v6381_v2  ;;  %v2562_v0 = vadd.f32 1.1283791, %v2561_v36 }
 0x163   :  { %v2275_v39 = vmul.f32 %v2274_v34, %v6372_v19  ;;  %v2286_v62 = vmul.f32 %v2285_v54, %v6372_v19  ;;  %v2586_v44 = vor.u32 1.1754944e-38, %v2585_v17 }
 0x164   :  { %v5587_v52 = vpop.eup %5586  ;;  %v6391_v48 = vmin.f32 %v2591_v31, 16.0  ;;  %v2563_v13 = vmul.f32 %v2562_v0, %v6330_v7 }
 0x165   :  { %v2255_v61 = vmul.f32 %v5587_v52, %v2253_v25  ;;  %vm2260_vm9 = vweird.f32 %v5587_v52  ;;  %v5589_v8 = vpop.eup %5588  ;;  %v2276_v1 = vadd.f32 0.0036580483, %v2275_v39  ;;  %v2287_v46 = vadd.f32 0.014752088, %v2286_v62 }
 0x166   :  { %vm2261_vm10 = vmor %vm2259_vm8, %vm2260_vm9  ;;  %v2575_v5 = vmul.f32 %v5589_v8, %v6370_v57  ;;  %v2593_v9 = vmul.f32 2.1237322e-06, %v6391_v48  ;;  %v2604_v10 = vmul.f32 3.8918573e-05, %v6391_v48  ;;  %vm2580_vm12 = vweird.f32 %v5589_v8 }
 0x167   :  { %v2256_v56 = vsub.f32 1.0, %v2255_v61  ;;  %v2277_v38 = vmul.f32 %v2276_v1, %v6372_v19  ;;  %v2288_v23 = vmul.f32 %v2287_v46, %v6372_v19  ;;  %v2583_v25 = vand.u32 2147483647, %v6370_v57  ;;  %vm2581_vm14 = vmor %vm2579_vm13, %vm2580_vm12 }
 0x168   :  { %v2576_v6 = vsub.f32 1.0, %v2575_v5  ;;  %v2594_v21 = vadd.f32 0.00028619796, %v2593_v9  ;;  %v2605_v45 = vadd.f32 0.001143296, %v2604_v10  ;;  %v1920_v15 = vpop.f32.mrf.mxu0  ;;  %v2090_v39 = vmul.f32 0.5, %v6324_v60 }
 0x169   :  { %v2257_v33 = vmul.f32 %v5587_v52, %v2256_v56  ;;  %v2289_v30 = vadd.f32 0.112945676, %v2288_v23  ;;  %v2278_v11 = vadd.f32 0.05243302, %v2277_v38  ;;  %vm2584_vm15 = vcmp.eq.f32.partialorder %v2583_v25, 8.507059e+37 }
 0x16a   :  { %v2577_v40 = vmul.f32 %v5589_v8, %v2576_v6  ;;  %v2595_v58 = vmul.f32 %v2594_v21, %v6391_v48  ;;  %v2606_v20 = vmul.f32 %v2605_v45, %v6391_v48  ;;  %v1921_v7 = vadd.f32 %v1920_v15, %v320_v3  ;;  %v1934_v27 = vpop.f32.mrf.mxu1  ;;  %v4992_v38 = vld [vmem:[#allocation5 + $0x150] sm:$0xf]  ;;  %v5510_v25 = vld [vmem:[#allocation5 + $0x154] sm:$0xf] }
 0x16b   :  { %v2258_v42 = vadd.f32 %v5587_v52, %v2257_v33  ;;  %v2290_v26 = vmul.f32 %v2289_v30, %v6372_v19  ;;  %v2279_v37 = vmul.f32 %v2278_v11, %v6372_v19 }
 0x16c   :  { %v2578_v14 = vadd.f32 %v5589_v8, %v2577_v40  ;;  %v2596_v57 = vadd.f32 0.0036580483, %v2595_v58  ;;  %v2607_v61 = vadd.f32 0.014752088, %v2606_v20  ;;  %v1935_v43 = vadd.f32 %v1934_v27, %v1921_v7  ;;  %v4968_v20 = vld [vmem:[#allocation5 + $0x120] sm:$0xf] }
 0x16d   :  { %v2262_v28 = vsel %vm2261_vm10, %v5587_v52, %v2258_v42  ;;  %v2291_v22 = vadd.f32 0.4994258, %v2290_v26  ;;  %v2280_v42 = vadd.f32 0.18741608, %v2279_v37  ;;  %v5507_v7 = vld [vmem:[#allocation5 + $0x134] sm:$0xf0] }
 0x16e   :  { %v2267_v32 = vsel %vm2264_vm11, %v2266_v35, %v2262_v28  ;;  %v2582_v12 = vsel %vm2581_vm14, %v5589_v8, %v2578_v14  ;;  %v2597_v56 = vmul.f32 %v2596_v57, %v6391_v48  ;;  %v2608_v41 = vmul.f32 %v2607_v61, %v6391_v48  ;;  %v5504_v61 = vld [vmem:[#allocation5 + $0x124] sm:$0xf] }
 0x16f   :  { %v2268_v47 = vmul.f32 %v2267_v32, %v2243_v4  ;;  %v2587_v53 = vsel %vm2584_vm15, %v2586_v44, %v2582_v12  ;;  %v2292_v49 = vmul.f32 %v2291_v22, %v6372_v19  ;;  %v2281_v60 = vmul.f32 %v2280_v42, %v6372_v19  ;;  %v5498_v42 = vld [vmem:[#allocation5 + $0xf4] sm:$0xf] }
 0x170   :  { %v2588_v29 = vmul.f32 %v2587_v53, %v2563_v13  ;;  %v2598_v33 = vadd.f32 0.05243302, %v2597_v56  ;;  %v1922_v62 = vpop.f32.mrf.mxu0  ;;  %v6427_v44 = vmul.f32 0.5, %v6360_v24  ;;  %v321_v24 = vperm.slane %v6296_v55, 6 }
 0x171   :  { %v4809_v50 = vclamps-f32 %v2268_v47, 1.0  ;;  %v6409_v34 = vadd.f32 1.0, %v2292_v49  ;;  %v1923_v0 = vadd.f32 %v1922_v62, %v320_v3  ;;  %v5513_v47 = vld [vmem:[#allocation5 + $0x164] sm:$0xf0]  ;;  %v2282_v11 = vadd.f32 1.1283791, %v2281_v60 }
 0x172   :  { %v4817_v18 = vclamps-f32 %v2588_v29, 1.0  ;;  %v1948_v36 = vpop.f32.mrf.mxu2  ;;  %v2599_v4 = vmul.f32 %v2598_v33, %v6391_v48  ;;  %v1936_v28 = vpop.f32.mrf.mxu1  ;;  %v4993_v40 = vor.u32 %v5513_v47, %v4992_v38  ;;  %v4969_v29 = vor.u32 %v5507_v7, %v4968_v20  ;;  %v4970_v49 = vld [vmem:[#allocation5 + $0x138] sm:$0xf0]  ;;  %v4944_v33 = vld [vmem:[#allocation5 + $0xf0] sm:$0xf] }
 0x173   :  { %v2754_v63 = vadd.f32 1.0, %v4809_v50  ;;  %v1949_v54 = vadd.f32 %v1948_v36, %v1935_v43  ;;  %5590 = vrcp.f32 %v6409_v34  ;;  %v1937_v17 = vadd.f32 %v1936_v28, %v1923_v0  ;;  %v4994_v50 = vld [vmem:[#allocation5 + $0x168] sm:$0xf0] }
 0x174   :  { %v1962_v35 = vpop.f32.mrf.mxu3  ;;  %v2762_v8 = vadd.f32 1.0, %v4817_v18  ;;  %v2600_v46 = vadd.f32 0.18741608, %v2599_v4  ;;  %v2303_v23 = vand.u32 2147483647, %v6409_v34  ;;  %v2305_v13 = vand.u32 2147483648, %v6409_v34  ;;  %3387 = vmatpush.bf16.msra.mxu0 %v4993_v40 }
 0x175   :  { %v2770_v52 = vmul.f32 %v2754_v63, %v2082_v59  ;;  %v2609_v59 = vadd.f32 0.112945676, %v2608_v41  ;;  %v6415_v1 = vadd.f32 %v1962_v35, %v1949_v54  ;;  %v4997_v14 = vor.u32 %v5510_v25, %v4994_v50  ;;  %v5501_v54 = vld [vmem:[#allocation5 + $0x104] sm:$0xf0]  ;;  %v4946_v62 = vld [vmem:[#allocation5 + $0x108] sm:$0xf0] }
 0x176   :  { %v2778_v31 = vmul.f32 %v2762_v8, %v2090_v39  ;;  %v2601_v26 = vmul.f32 %v2600_v46, %v6391_v48  ;;  %vm2299_vm0 = vweird.f32 %v6409_v34  ;;  %vm6440_vm2 = vcmp.eq.f32.partialorder %v2303_v23, 8.507059e+37  ;;  %v4920_v40 = vld [vmem:[#allocation5 + $0xc0] sm:$0xf]  ;;  %v5495_v25 = vld [vmem:[#allocation5 + $0xd4] sm:$0xf0] }
 0x177   :  { %2786 = vst [vmem:[#allocation7 + $0x18] sm:$0xff] %v2770_v52  ;;  %v2610_v5 = vmul.f32 %v2609_v59, %v6391_v48  ;;  %v6419_v6 = vmul.f32 0.70710677, %v6415_v1  ;;  %3415 = vmatpush.bf16.msra.mxu2 %v4997_v14  ;;  %v4973_v36 = vor.u32 %v5504_v61, %v4970_v49  ;;  %v2283_v35 = vmul.f32 %v2282_v11, %v6364_v16  ;;  %v4922_v11 = vld [vmem:[#allocation5 + $0xd8] sm:$0xf0] }
 0x178   :  { %2792 = vst [vmem:[#allocation7 + $0x48] sm:$0xff] %v2778_v31  ;;  %v6449_v43 = vadd.f32 1.1283791, %v2601_v26  ;;  %3388 = vmatpush.bf16.msra.mxu0 %v4969_v29  ;;  %v4945_v59 = vor.u32 %v5501_v54, %v4944_v33  ;;  %v4949_v0 = vor.u32 %v5498_v42, %v4946_v62  ;;  %v4921_v14 = vor.u32 %v5495_v25, %v4920_v40  ;;  %v4896_v29 = vld [vmem:[#allocation5 + $0x90] sm:$0xf] }
 0x179   :  { %v2611_v32 = vadd.f32 0.4994258, %v2610_v5  ;;  %v5591_v3 = vpop.eup %5590  ;;  %v2311_v19 = vmul.f32 %v6419_v6, %v6419_v6  ;;  %v4872_v62 = vld [vmem:[#allocation5 + $0x60] sm:$0xf] }
 0x17a   :  { %v1950_v10 = vpop.f32.mrf.mxu2  ;;  %v2295_v45 = vmul.f32 %v5591_v3, %v6409_v34  ;;  %vm2300_vm1 = vweird.f32 %v5591_v3 }
 0x17b   :  { %v2612_v9 = vmul.f32 %v2611_v32, %v6391_v48  ;;  %v1951_v30 = vadd.f32 %v1950_v10, %v1937_v17  ;;  %v6433_v58 = vmin.f32 %v2311_v19, 16.0  ;;  %v2306_v48 = vor.u32 1.1754944e-38, %v2305_v13  ;;  %vm2301_vm3 = vmor %vm2299_vm0, %vm2300_vm1  ;;  %3416 = vmatpush.bf16.msra.mxu2 %v4973_v36 }
 0x17c   :  { %v1964_v21 = vpop.f32.mrf.mxu3  ;;  %v2296_v12 = vsub.f32 1.0, %v2295_v45  ;;  %3389 = vmatpush.bf16.msra.mxu0 %v4945_v59  ;;  %v5492_v45 = vld [vmem:[#allocation5 + $0xc4] sm:$0xf]  ;;  %v2603_v36 = vmul.f32 %v6449_v43, %v6381_v2 }
 0x17d   :  { %v6430_v63 = vadd.f32 1.0, %v2612_v9  ;;  %v6435_v15 = vadd.f32 %v1964_v21, %v1951_v30  ;;  %v2313_v52 = vmul.f32 2.1237322e-06, %v6433_v58  ;;  %v2324_v22 = vmul.f32 3.8918573e-05, %v6433_v58 }
 0x17e   :  { %v2297_v53 = vmul.f32 %v5591_v3, %v2296_v12 }
 0x17f   :  { %5592 = vrcp.f32 %v6430_v63  ;;  %v6447_v57 = vmul.f32 0.70710677, %v6435_v15  ;;  %v2314_v37 = vadd.f32 0.00028619796, %v2313_v52  ;;  %v2325_v18 = vadd.f32 0.001143296, %v2324_v22  ;;  %3417 = vmatpush.bf16.msra.mxu2 %v4949_v0 }
 0x180   :  { %v2298_v56 = vadd.f32 %v5591_v3, %v2297_v53  ;;  %v2623_v39 = vand.u32 2147483647, %v6430_v63  ;;  %v2625_v46 = vand.u32 2147483648, %v6430_v63  ;;  %vm2619_vm4 = vweird.f32 %v6430_v63  ;;  %3390 = vmatpush.bf16.msra.mxu0 %v4921_v14  ;;  %v5480_v0 = vld [vmem:[#allocation5 + $0x64] sm:$0xf] }
 0x181   :  { %v2631_v41 = vmul.f32 %v6447_v57, %v6447_v57  ;;  %v2315_v8 = vmul.f32 %v2314_v37, %v6433_v58  ;;  %v2326_v5 = vmul.f32 %v2325_v18, %v6433_v58  ;;  %v4925_v22 = vor.u32 %v5492_v45, %v4922_v11  ;;  %v5474_v11 = vld [vmem:[#allocation5 + $0x34] sm:$0xf] }
 0x182   :  { %v2302_v4 = vsel %vm2301_vm3, %v5591_v3, %v2298_v56  ;;  %vm6469_vm5 = vcmp.eq.f32.partialorder %v2623_v39, 8.507059e+37  ;;  %v4898_v39 = vld [vmem:[#allocation5 + $0xa8] sm:$0xf0] }
 0x183   :  { %v6460_v28 = vmin.f32 %v2631_v41, 16.0  ;;  %v2307_v16 = vsel %vm6440_vm2, %v2306_v48, %v2302_v4  ;;  %v2316_v32 = vadd.f32 0.0036580483, %v2315_v8  ;;  %v2327_v17 = vadd.f32 0.014752088, %v2326_v5  ;;  %3418 = vmatpush.bf16.msra.mxu2 %v4925_v22 }
 0x184   :  { %v2308_v60 = vmul.f32 %v2307_v16, %v2283_v35  ;;  %v2626_v48 = vor.u32 1.1754944e-38, %v2625_v46  ;;  %v5489_v41 = vld [vmem:[#allocation5 + $0xa4] sm:$0xf0]  ;;  %v5483_v5 = vld [vmem:[#allocation5 + $0x74] sm:$0xf0] }
 0x185   :  { %v5593_v31 = vpop.eup %5592  ;;  %v2633_v38 = vmul.f32 2.1237322e-06, %v6460_v28  ;;  %v2644_v47 = vmul.f32 3.8918573e-05, %v6460_v28  ;;  %v2317_v10 = vmul.f32 %v2316_v32, %v6433_v58  ;;  %v2328_v3 = vmul.f32 %v2327_v17, %v6433_v58  ;;  %v4874_v16 = vld [vmem:[#allocation5 + $0x78] sm:$0xf0] }
 0x186   :  { %v2615_v34 = vmul.f32 %v5593_v31, %v6430_v63  ;;  %v4810_v50 = vclamps-f32 %v2308_v60, 1.0  ;;  %vm2620_vm6 = vweird.f32 %v5593_v31  ;;  %v4873_v9 = vor.u32 %v5483_v5, %v4872_v62 }
 0x187   :  { %v2634_v13 = vadd.f32 0.00028619796, %v2633_v38  ;;  %v2645_v19 = vadd.f32 0.001143296, %v2644_v47  ;;  %v2318_v21 = vadd.f32 0.05243302, %v2317_v10  ;;  %vm2621_vm7 = vmor %vm2619_vm4, %vm2620_vm6 }
 0x188   :  { %v2616_v23 = vsub.f32 1.0, %v2615_v34  ;;  %v2755_v26 = vadd.f32 1.0, %v4810_v50  ;;  %v2329_v12 = vadd.f32 0.112945676, %v2328_v3  ;;  %v4877_v50 = vor.u32 %v5480_v0, %v4874_v16  ;;  %v4848_v3 = vld [vmem:[#allocation5 + $0x30] sm:$0xf] }
 0x189   :  { %v2635_v20 = vmul.f32 %v2634_v13, %v6460_v28  ;;  %v2646_v7 = vmul.f32 %v2645_v19, %v6460_v28  ;;  %v2319_v52 = vmul.f32 %v2318_v21, %v6433_v58  ;;  %v5477_v13 = vld [vmem:[#allocation5 + $0x44] sm:$0xf0]  ;;  %v322_v62 = vperm.slane %v6296_v55, 7  ;;  %v5000_v16 = vld [vmem:[#allocation5 + $0x158] sm:$0xf] }
 0x18a   :  { %v2617_v30 = vmul.f32 %v5593_v31, %v2616_v23  ;;  %v2771_v61 = vmul.f32 %v2755_v26, %v6427_v44  ;;  %v2330_v37 = vmul.f32 %v2329_v12, %v6433_v58  ;;  %v5486_v44 = vld [vmem:[#allocation5 + $0x94] sm:$0xf]  ;;  %v4850_v26 = vld [vmem:[#allocation5 + $0x48] sm:$0xf0]  ;;  %v5066_v55 = vld [vmem:[#allocation5 + $0x1f8] sm:$0xf0] }
 0x18b   :  { %v2636_v49 = vadd.f32 0.0036580483, %v2635_v20  ;;  %v2647_v56 = vadd.f32 0.014752088, %v2646_v7  ;;  %v2320_v54 = vadd.f32 0.18741608, %v2319_v52  ;;  %v4901_v17 = vor.u32 %v5486_v44, %v4898_v39 }
 0x18c   :  { %v2618_v27 = vadd.f32 %v5593_v31, %v2617_v30  ;;  %2787 = vst [vmem:[#allocation7 + $0x20] sm:$0xff] %v2771_v61  ;;  %v2331_v8 = vadd.f32 0.4994258, %v2330_v37  ;;  %v6499_v30 = vmul.f32 0.5, %v6415_v1  ;;  %v4853_v37 = vor.u32 %v5474_v11, %v4850_v26 }
 0x18d   :  { %v1976_v53 = vpop.f32.mrf.mxu0  ;;  %v2637_v59 = vmul.f32 %v2636_v49, %v6460_v28  ;;  %v2648_v42 = vmul.f32 %v2647_v56, %v6460_v28  ;;  %v2321_v2 = vmul.f32 %v2320_v54, %v6433_v58  ;;  %3419 = vmatpush.bf16.msra.mxu2 %v4901_v17  ;;  %v5471_v49 = vld [vmem:[#allocation5 + $0x14] sm:$0xf0]  ;;  %v5468_v56 = vld [vmem:[#allocation5 + $0x4] sm:$0xf]  ;;  %v5184_v54 = vld [vmem:[#allocation5 + $0x2d0] sm:$0xf] }
 0x18e   :  { %v2622_v33 = vsel %vm2621_vm7, %v5593_v31, %v2618_v27  ;;  %v1977_v35 = vadd.f32 %v1976_v53, %v321_v24  ;;  %v4897_v31 = vor.u32 %v5489_v41, %v4896_v29  ;;  %v2332_v34 = vmul.f32 %v2331_v8, %v6433_v58  ;;  %v4824_v53 = vld [vmem:[#allocation5] sm:$0xf]  ;;  %v5002_v17 = vld [vmem:[#allocation5 + $0x170] sm:$0xf0] }
 0x18f   :  { %v1990_v18 = vpop.f32.mrf.mxu1  ;;  %v2627_v63 = vsel %vm6469_vm5, %v2626_v48, %v2622_v33  ;;  %v2638_v46 = vadd.f32 0.05243302, %v2637_v59  ;;  %v2649_v32 = vadd.f32 0.112945676, %v2648_v42  ;;  %v2091_v58 = vmul.f32 0.5, %v6377_v51 }
 0x190   :  { %v2628_v4 = vmul.f32 %v2627_v63, %v2603_v36  ;;  %v1991_v43 = vadd.f32 %v1990_v18, %v1977_v35  ;;  %3391 = vmatpush.bf16.msra.mxu0 %v4897_v31  ;;  %v6493_v10 = vadd.f32 1.0, %v2332_v34  ;;  %v2322_v45 = vadd.f32 1.1283791, %v2321_v2  ;;  %v4826_v33 = vld [vmem:[#allocation5 + $0x18] sm:$0xf0] }
 0x191   :  { %v2639_v40 = vmul.f32 %v2638_v46, %v6460_v28  ;;  %v2650_v25 = vmul.f32 %v2649_v32, %v6460_v28  ;;  %v4849_v48 = vor.u32 %v5477_v13, %v4848_v3  ;;  %3420 = vmatpush.bf16.msra.mxu2 %v4877_v50  ;;  %v4825_v39 = vor.u32 %v5471_v49, %v4824_v53  ;;  %v5558_v2 = vld [vmem:[#allocation5 + $0x2d4] sm:$0xf]  ;;  %v5514_v34 = vld [vmem:[#allocation5 + $0x16c] sm:$0xf0]  ;;  %v5511_v46 = vld [vmem:[#allocation5 + $0x15c] sm:$0xf] }
 0x192   :  { %v4818_v38 = vclamps-f32 %v2628_v4, 1.0  ;;  %5594 = vrcp.f32 %v6493_v10  ;;  %v2343_v51 = vand.u32 2147483647, %v6493_v10  ;;  %v2345_v22 = vand.u32 2147483648, %v6493_v10  ;;  %v5555_v13 = vld [vmem:[#allocation5 + $0x2b4] sm:$0xf0] }
 0x193   :  { %v2640_v20 = vadd.f32 0.18741608, %v2639_v40  ;;  %v2651_v7 = vadd.f32 0.4994258, %v2650_v25  ;;  %v4829_v4 = vor.u32 %v5468_v56, %v4826_v33  ;;  %v6523_v31 = vmul.f32 %v2322_v45, %v6419_v6  ;;  %v5160_v40 = vld [vmem:[#allocation5 + $0x2a0] sm:$0xf] }
 0x194   :  { %v2763_v19 = vadd.f32 1.0, %v4818_v38  ;;  %3392 = vmatpush.bf16.msra.mxu0 %v4873_v9  ;;  %vm6527_vm8 = vcmp.eq.f32.partialorder %v2343_v51, 8.507059e+37  ;;  %vm2339_vm9 = vweird.f32 %v6493_v10  ;;  %v2346_v32 = vor.u32 1.1754944e-38, %v2345_v22  ;;  %v5136_v33 = vld [vmem:[#allocation5 + $0x270] sm:$0xf] }
 0x195   :  { %v1978_v14 = vpop.f32.mrf.mxu0  ;;  %v2641_v29 = vmul.f32 %v2640_v20, %v6460_v28  ;;  %v2652_v61 = vmul.f32 %v2651_v7, %v6460_v28  ;;  %3421 = vmatpush.bf16.msra.mxu2 %v4853_v37  ;;  %v5001_v3 = vor.u32 %v5514_v34, %v5000_v16  ;;  %v5161_v20 = vor.u32 %v5555_v13, %v5160_v40  ;;  %v5552_v7 = vld [vmem:[#allocation5 + $0x2a4] sm:$0xf]  ;;  %v5496_v49 = vld [vmem:[#allocation5 + $0xdc] sm:$0xf0] }
 0x196   :  { %v2779_v12 = vmul.f32 %v2763_v19, %v2091_v58  ;;  %v1979_v1 = vadd.f32 %v1978_v14, %v321_v24  ;;  %v5561_v24 = vld [vmem:[#allocation5 + $0x2e4] sm:$0xf0]  ;;  %v4978_v37 = vld [vmem:[#allocation5 + $0x140] sm:$0xf0] }
 0x197   :  { %v2004_v60 = vpop.f32.mrf.mxu2  ;;  %v1992_v27 = vpop.f32.mrf.mxu1  ;;  %v2642_v35 = vadd.f32 1.1283791, %v2641_v29  ;;  %v6515_v44 = vadd.f32 1.0, %v2652_v61  ;;  %v5185_v63 = vor.u32 %v5561_v24, %v5184_v54  ;;  %v5505_v61 = vld [vmem:[#allocation5 + $0x12c] sm:$0xf] }
 0x198   :  { %v2005_v47 = vadd.f32 %v2004_v60, %v1991_v43  ;;  %2793 = vst [vmem:[#allocation7 + $0x50] sm:$0xff] %v2779_v12  ;;  %v1993_v41 = vadd.f32 %v1992_v27, %v1979_v1  ;;  %3393 = vmatpush.bf16.msra.mxu0 %v4849_v48  ;;  %v6517_v8 = vpop.eup %5594  ;;  %v5186_v43 = vld [vmem:[#allocation5 + $0x2e8] sm:$0xf0]  ;;  %v5005_v12 = vor.u32 %v5511_v46, %v5002_v17  ;;  %v5162_v27 = vld [vmem:[#allocation5 + $0x2b8] sm:$0xf0] }
 0x199   :  { %v2018_v23 = vpop.f32.mrf.mxu3  ;;  %v2335_v5 = vmul.f32 %v6517_v8, %v6493_v10  ;;  %5596 = vrcp.f32 %v6515_v44  ;;  %3401 = vmatpush.bf16.msra.mxu1 %v5185_v63  ;;  %v2665_v60 = vand.u32 2147483648, %v6515_v44  ;;  %v5189_v9 = vor.u32 %v5558_v2, %v5186_v43  ;;  %3422 = vmatpush.bf16.msra.mxu2 %v4829_v4  ;;  %v4976_v48 = vld [vmem:[#allocation5 + $0x128] sm:$0xf]  ;;  %v5546_v63 = vld [vmem:[#allocation5 + $0x274] sm:$0xf] }
 0x19a   :  { %v6501_v21 = vadd.f32 %v2018_v23, %v2005_v47  ;;  %vm2340_vm10 = vweird.f32 %v6517_v8  ;;  %v2663_v25 = vand.u32 2147483647, %v6515_v44  ;;  %v6547_v11 = vmul.f32 %v2642_v35, %v6447_v57  ;;  %v5508_v57 = vld [vmem:[#allocation5 + $0x13c] sm:$0xf0]  ;;  %v5549_v54 = vld [vmem:[#allocation5 + $0x284] sm:$0xf0] }
 0x19b   :  { %v2336_v38 = vsub.f32 1.0, %v2335_v5  ;;  %v6541_v19 = vor.u32 1.1754944e-38, %v2665_v60  ;;  %3429 = vmatpush.bf16.msra.mxu3 %v5189_v9  ;;  %v5165_v29 = vor.u32 %v5552_v7, %v5162_v27  ;;  %vm6560_vm11 = vmor %vm2339_vm9, %vm2340_vm10  ;;  %v5137_v2 = vor.u32 %v5549_v54, %v5136_v33  ;;  %v5138_v43 = vld [vmem:[#allocation5 + $0x288] sm:$0xf0]  ;;  %v4952_v5 = vld [vmem:[#allocation5 + $0xf8] sm:$0xf] }
 0x19c   :  { %v6506_v52 = vmul.f32 0.70710677, %v6501_v21  ;;  %3394 = vmatpush.bf16.msra.mxu0 %v4825_v39  ;;  %vm6567_vm13 = vcmp.eq.f32.partialorder %v2663_v25, 8.507059e+37  ;;  %v4981_v39 = vor.u32 %v5505_v61, %v4978_v37  ;;  %v5502_v60 = vld [vmem:[#allocation5 + $0x10c] sm:$0xf0]  ;;  %vm2659_vm14 = vweird.f32 %v6515_v44 }
 0x19d   :  { %v2337_v58 = vmul.f32 %v6517_v8, %v2336_v38  ;;  %3471 = vmatpush.bf16.msrb.mxu2 %v5005_v12  ;;  %3402 = vmatpush.bf16.msra.mxu1 %v5161_v20  ;;  %v4953_v17 = vor.u32 %v5502_v60, %v4952_v5  ;;  %v5499_v38 = vld [vmem:[#allocation5 + $0xfc] sm:$0xf]  ;;  %v4928_v37 = vld [vmem:[#allocation5 + $0xc8] sm:$0xf]  ;;  %v5493_v54 = vld [vmem:[#allocation5 + $0xcc] sm:$0xf] }
 0x19e   :  { %v2351_v18 = vmul.f32 %v6506_v52, %v6506_v52 }
 0x19f   :  { %v2006_v36 = vpop.f32.mrf.mxu2  ;;  %v6550_v51 = vpop.eup %5596  ;;  %v2338_v1 = vadd.f32 %v6517_v8, %v2337_v58  ;;  %3430 = vmatpush.bf16.msra.mxu3 %v5165_v29 }
 0x1a0   :  { %v6519_v28 = vmin.f32 %v2351_v18, 16.0  ;;  %v2007_v59 = vadd.f32 %v2006_v36, %v1993_v41  ;;  %3443 = vmatpush.bf16.msrb.mxu0 %v5001_v3  ;;  %v2655_v56 = vmul.f32 %v6550_v51, %v6515_v44  ;;  %vm2660_vm12 = vweird.f32 %v6550_v51  ;;  %v5534_v18 = vld [vmem:[#allocation5 + $0x214] sm:$0xf] }
 0x1a1   :  { %v2020_v42 = vpop.f32.mrf.mxu3  ;;  %v4977_v36 = vor.u32 %v5508_v57, %v4976_v48  ;;  %v2342_v10 = vsel %vm6560_vm11, %v6517_v8, %v2338_v1  ;;  %3472 = vmatpush.bf16.msrb.mxu2 %v4981_v39  ;;  %3403 = vmatpush.bf16.msra.mxu1 %v5137_v2  ;;  %vm6590_vm15 = vmor %vm2659_vm14, %vm2660_vm12  ;;  %v5540_v1 = vld [vmem:[#allocation5 + $0x244] sm:$0xf]  ;;  %v5537_v2 = vld [vmem:[#allocation5 + $0x224] sm:$0xf0] }
 0x1a2   :  { %v2353_v6 = vmul.f32 2.1237322e-06, %v6519_v28  ;;  %v2364_v47 = vmul.f32 3.8918573e-05, %v6519_v28  ;;  %v6536_v23 = vadd.f32 %v2020_v42, %v2007_v59  ;;  %v2347_v59 = vsel %vm6527_vm8, %v2346_v32, %v2342_v10  ;;  %v4930_v39 = vld [vmem:[#allocation5 + $0xe0] sm:$0xf0] }
 0x1a3   :  { %v2656_v42 = vsub.f32 1.0, %v2655_v56  ;;  %v2348_v16 = vmul.f32 %v2347_v59, %v6523_v31  ;;  %v5141_v32 = vor.u32 %v5546_v63, %v5138_v43  ;;  %v5088_v63 = vld [vmem:[#allocation5 + $0x210] sm:$0xf] }
 0x1a4   :  { %v2354_v50 = vadd.f32 0.00028619796, %v2353_v6  ;;  %v2365_v14 = vadd.f32 0.001143296, %v2364_v47  ;;  %v6544_v45 = vmul.f32 0.70710677, %v6536_v23  ;;  %3444 = vmatpush.bf16.msrb.mxu0 %v4977_v36 }
 0x1a5   :  { %v2657_v6 = vmul.f32 %v6550_v51, %v2656_v42  ;;  %v4954_v47 = vld [vmem:[#allocation5 + $0x110] sm:$0xf0]  ;;  %v4811_v9 = vclamps-f32 %v2348_v16, 1.0  ;;  %3431 = vmatpush.bf16.msra.mxu3 %v5141_v32 }
 0x1a6   :  { %v2355_v26 = vmul.f32 %v2354_v50, %v6519_v28  ;;  %v2366_v53 = vmul.f32 %v2365_v14, %v6519_v28  ;;  %v2671_v22 = vmul.f32 %v6544_v45, %v6544_v45  ;;  %v4957_v50 = vor.u32 %v5499_v38, %v4954_v47  ;;  %v5112_v14 = vld [vmem:[#allocation5 + $0x240] sm:$0xf] }
 0x1a7   :  { %v2658_v3 = vadd.f32 %v6550_v51, %v2657_v6  ;;  %v2756_v12 = vadd.f32 1.0, %v4811_v9  ;;  %v2092_v38 = vmul.f32 0.5, %v6435_v15  ;;  %v5064_v15 = vld [vmem:[#allocation5 + $0x1e0] sm:$0xf] }
 0x1a8   :  { %v2356_v41 = vadd.f32 0.0036580483, %v2355_v26  ;;  %v2367_v24 = vadd.f32 0.014752088, %v2366_v53  ;;  %v6574_v35 = vmin.f32 %v2671_v22, 16.0  ;;  %3445 = vmatpush.bf16.msrb.mxu0 %v4953_v17  ;;  %3473 = vmatpush.bf16.msrb.mxu2 %v4957_v50 }
 0x1a9   :  { %v5543_v26 = vld [vmem:[#allocation5 + $0x254] sm:$0xf0]  ;;  %v5114_v53 = vld [vmem:[#allocation5 + $0x258] sm:$0xf0]  ;;  %v2662_v22 = vsel %vm6590_vm15, %v6550_v51, %v2658_v3  ;;  %v2772_v56 = vmul.f32 %v2756_v12, %v6499_v30  ;;  %v4929_v30 = vor.u32 %v5496_v49, %v4928_v37  ;;  %v5484_v37 = vld [vmem:[#allocation5 + $0x7c] sm:$0xf0] }
 0x1aa   :  { %v2357_v4 = vmul.f32 %v2356_v41, %v6519_v28  ;;  %v2368_v8 = vmul.f32 %v2367_v24, %v6519_v28  ;;  %v2673_v34 = vmul.f32 2.1237322e-06, %v6574_v35  ;;  %v2684_v46 = vmul.f32 3.8918573e-05, %v6574_v35  ;;  %v4904_v17 = vld [vmem:[#allocation5 + $0x98] sm:$0xf] }
 0x1ab   :  { %v5113_v48 = vor.u32 %v5543_v26, %v5112_v14  ;;  %v2667_v41 = vsel %vm6567_vm13, %v6541_v19, %v2662_v22  ;;  %v5117_v24 = vor.u32 %v5540_v1, %v5114_v53  ;;  %2788 = vst [vmem:[#allocation7 + $0x28] sm:$0xff] %v2772_v56  ;;  %v4906_v14 = vld [vmem:[#allocation5 + $0xb0] sm:$0xf0]  ;;  %v5531_v26 = vld [vmem:[#allocation5 + $0x1f4] sm:$0xf0] }
 0x1ac   :  { %v2358_v0 = vadd.f32 0.05243302, %v2357_v4  ;;  %v2369_v40 = vadd.f32 0.112945676, %v2368_v8  ;;  %v2674_v25 = vadd.f32 0.00028619796, %v2673_v34  ;;  %v2668_v51 = vmul.f32 %v2667_v41, %v6547_v11  ;;  %3446 = vmatpush.bf16.msrb.mxu0 %v4929_v30 }
 0x1ad   :  { %v2685_v13 = vadd.f32 0.001143296, %v2684_v46  ;;  %3404 = vmatpush.bf16.msra.mxu1 %v5113_v48  ;;  %v4933_v4 = vor.u32 %v5493_v54, %v4930_v39  ;;  %3432 = vmatpush.bf16.msra.mxu3 %v5117_v24  ;;  %v5089_v11 = vor.u32 %v5537_v2, %v5088_v63  ;;  %v5090_v8 = vld [vmem:[#allocation5 + $0x228] sm:$0xf0]  ;;  %v4882_v54 = vld [vmem:[#allocation5 + $0x80] sm:$0xf0] }
 0x1ae   :  { %v2370_v7 = vmul.f32 %v2369_v40, %v6519_v28  ;;  %v2675_v27 = vmul.f32 %v2674_v25, %v6574_v35  ;;  %v2359_v29 = vmul.f32 %v2358_v0, %v6519_v28  ;;  %v4819_v19 = vclamps-f32 %v2668_v51, 1.0  ;;  %v5490_v40 = vld [vmem:[#allocation5 + $0xac] sm:$0xf0]  ;;  %v5042_v30 = vld [vmem:[#allocation5 + $0x1c8] sm:$0xf0] }
 0x1af   :  { %v2686_v57 = vmul.f32 %v2685_v13, %v6574_v35  ;;  %3474 = vmatpush.bf16.msrb.mxu2 %v4933_v4  ;;  %v5093_v32 = vor.u32 %v5534_v18, %v5090_v8  ;;  %v5040_v51 = vld [vmem:[#allocation5 + $0x1b0] sm:$0xf]  ;;  %v4856_v8 = vld [vmem:[#allocation5 + $0x38] sm:$0xf] }
 0x1b0   :  { %v2371_v36 = vadd.f32 0.4994258, %v2370_v7  ;;  %v2676_v33 = vadd.f32 0.0036580483, %v2675_v27  ;;  %v2360_v43 = vadd.f32 0.18741608, %v2359_v29  ;;  %v4905_v7 = vor.u32 %v5490_v40, %v4904_v17 }
 0x1b1   :  { %v2687_v10 = vadd.f32 0.014752088, %v2686_v57  ;;  %v2764_v47 = vadd.f32 1.0, %v4819_v19  ;;  %3405 = vmatpush.bf16.msra.mxu1 %v5089_v11  ;;  %3433 = vmatpush.bf16.msra.mxu3 %v5093_v32  ;;  %v5528_v27 = vld [vmem:[#allocation5 + $0x1e4] sm:$0xf]  ;;  %v5065_v57 = vor.u32 %v5531_v26, %v5064_v15 }
 0x1b2   :  { %v2032_v31 = vpop.f32.mrf.mxu0  ;;  %v2372_v59 = vmul.f32 %v2371_v36, %v6519_v28  ;;  %v2677_v42 = vmul.f32 %v2676_v33, %v6574_v35  ;;  %v2361_v12 = vmul.f32 %v2360_v43, %v6519_v28  ;;  %3447 = vmatpush.bf16.msrb.mxu0 %v4905_v7  ;;  %v4880_v28 = vld [vmem:[#allocation5 + $0x68] sm:$0xf]  ;;  %v5481_v33 = vld [vmem:[#allocation5 + $0x6c] sm:$0xf]  ;;  %v4858_v32 = vld [vmem:[#allocation5 + $0x50] sm:$0xf0] }
 0x1b3   :  { %v2033_v58 = vadd.f32 %v2032_v31, %v322_v62  ;;  %v2688_v5 = vmul.f32 %v2687_v10, %v6574_v35  ;;  %v5487_v31 = vld [vmem:[#allocation5 + $0x9c] sm:$0xf]  ;;  %v2780_v50 = vmul.f32 %v2764_v47, %v2092_v38  ;;  %v4881_v36 = vor.u32 %v5484_v37, %v4880_v28  ;;  %v5016_v47 = vld [vmem:[#allocation5 + $0x180] sm:$0xf]  ;;  %v5516_v15 = vld [vmem:[#allocation5 + $0x184] sm:$0xf] }
 0x1b4   :  { %v2046_v44 = vpop.f32.mrf.mxu1  ;;  %v6609_v34 = vadd.f32 1.0, %v2372_v59  ;;  %v2678_v46 = vadd.f32 0.05243302, %v2677_v42  ;;  %v4909_v53 = vor.u32 %v5487_v31, %v4906_v14  ;;  %v4885_v63 = vor.u32 %v5481_v33, %v4882_v54  ;;  %v5525_v59 = vld [vmem:[#allocation5 + $0x1c4] sm:$0xf0] }
 0x1b5   :  { %v2047_v61 = vadd.f32 %v2046_v44, %v2033_v58  ;;  %v2689_v9 = vadd.f32 0.112945676, %v2688_v5  ;;  %2794 = vst [vmem:[#allocation7 + $0x58] sm:$0xff] %v2780_v50  ;;  %3406 = vmatpush.bf16.msra.mxu1 %v5065_v57  ;;  %v5522_v42 = vld [vmem:[#allocation5 + $0x1b4] sm:$0xf] }
 0x1b6   :  { %5598 = vrcp.f32 %v6609_v34  ;;  %v2679_v3 = vmul.f32 %v2678_v46, %v6574_v35  ;;  %v2383_v20 = vand.u32 2147483647, %v6609_v34  ;;  %3475 = vmatpush.bf16.msrb.mxu2 %v4909_v53  ;;  %v2362_v4 = vadd.f32 1.1283791, %v2361_v12  ;;  %3448 = vmatpush.bf16.msrb.mxu0 %v4881_v36  ;;  %v5478_v46 = vld [vmem:[#allocation5 + $0x4c] sm:$0xf0] }
 0x1b7   :  { %v2690_v13 = vmul.f32 %v2689_v9, %v6574_v35  ;;  %v5045_v11 = vor.u32 %v5522_v42, %v5042_v30  ;;  %v4857_v31 = vor.u32 %v5478_v46, %v4856_v8  ;;  %v5519_v50 = vld [vmem:[#allocation5 + $0x194] sm:$0xf0]  ;;  %vm2379_vm2 = vweird.f32 %v6609_v34  ;;  %v4834_v53 = vld [vmem:[#allocation5 + $0x20] sm:$0xf0]  ;;  %v5559_v54 = vld [vmem:[#allocation5 + $0x2dc] sm:$0xf] }
 0x1b8   :  { %v2680_v44 = vadd.f32 0.18741608, %v2679_v3  ;;  %vm6633_vm0 = vcmp.eq.f32.partialorder %v2383_v20, 8.507059e+37 }
 0x1b9   :  { %v2691_v48 = vadd.f32 0.4994258, %v2690_v13 }
 0x1ba   :  { %v2034_v0 = vpop.f32.mrf.mxu0  ;;  %v2681_v49 = vmul.f32 %v2680_v44, %v6574_v35  ;;  %3476 = vmatpush.bf16.msrb.mxu2 %v4885_v63  ;;  %3449 = vmatpush.bf16.msrb.mxu0 %v4857_v31  ;;  %v5170_v31 = vld [vmem:[#allocation5 + $0x2c0] sm:$0xf0] }
 0x1bb   :  { %v2035_v25 = vadd.f32 %v2034_v0, %v322_v62  ;;  %v2385_v62 = vand.u32 2147483648, %v6609_v34  ;;  %v2692_v56 = vmul.f32 %v2691_v48, %v6574_v35  ;;  %v5475_v0 = vld [vmem:[#allocation5 + $0x3c] sm:$0xf]  ;;  %v5472_v48 = vld [vmem:[#allocation5 + $0x1c] sm:$0xf0] }
 0x1bc   :  { %v2060_v16 = vpop.f32.mrf.mxu2  ;;  %v2048_v1 = vpop.f32.mrf.mxu1  ;;  %v6645_v17 = vadd.f32 1.1283791, %v2681_v49  ;;  %v4861_v14 = vor.u32 %v5475_v0, %v4858_v32  ;;  %v5192_v49 = vld [vmem:[#allocation5 + $0x2d8] sm:$0xf]  ;;  %v5168_v32 = vld [vmem:[#allocation5 + $0x2a8] sm:$0xf] }
 0x1bd   :  { %v2061_v60 = vadd.f32 %v2060_v16, %v2047_v61  ;;  %v2049_v29 = vadd.f32 %v2048_v1, %v2035_v25  ;;  %v5069_v61 = vor.u32 %v5528_v27, %v5066_v55  ;;  %v6627_v10 = vpop.eup %5598  ;;  %v6637_v18 = vadd.f32 1.0, %v2692_v56  ;;  %v4832_v55 = vld [vmem:[#allocation5 + $0x8] sm:$0xf]  ;;  %v5469_v1 = vld [vmem:[#allocation5 + $0xc] sm:$0xf] }
 0x1be   :  { %v2074_v6 = vpop.f32.mrf.mxu3  ;;  %v2375_v35 = vmul.f32 %v6627_v10, %v6609_v34  ;;  %v5041_v16 = vor.u32 %v5525_v59, %v5040_v51  ;;  %vm2380_vm1 = vweird.f32 %v6627_v10  ;;  %v5017_v27 = vor.u32 %v5519_v50, %v5016_v47  ;;  %v5018_v34 = vld [vmem:[#allocation5 + $0x198] sm:$0xf0]  ;;  %3477 = vmatpush.bf16.msrb.mxu2 %v4861_v14  ;;  %v5562_v56 = vld [vmem:[#allocation5 + $0x2ec] sm:$0xf0]  ;;  %v5194_v51 = vld [vmem:[#allocation5 + $0x2f0] sm:$0xf0] }
 0x1bf   :  { %v6617_v58 = vadd.f32 %v2074_v6, %v2061_v60  ;;  %3434 = vmatpush.bf16.msra.mxu3 %v5069_v61  ;;  %v2386_v6 = vor.u32 1.1754944e-38, %v2385_v62  ;;  %5600 = vrcp.f32 %v6637_v18  ;;  %v2703_v3 = vand.u32 2147483647, %v6637_v18  ;;  %vm6658_vm3 = vmor %vm2379_vm2, %vm2380_vm1 }
 0x1c0   :  { %v2376_v60 = vsub.f32 1.0, %v2375_v35  ;;  %3407 = vmatpush.bf16.msra.mxu1 %v5041_v16  ;;  %v5021_v44 = vor.u32 %v5516_v15, %v5018_v34  ;;  %v4833_v37 = vor.u32 %v5472_v48, %v4832_v55  ;;  %v2705_v42 = vand.u32 2147483648, %v6637_v18  ;;  %v5550_v55 = vld [vmem:[#allocation5 + $0x28c] sm:$0xf0] }
 0x1c1   :  { %v6623_v22 = vmul.f32 0.70710677, %v6617_v58  ;;  %v4837_v30 = vor.u32 %v5469_v1, %v4834_v53  ;;  %v5193_v35 = vor.u32 %v5562_v56, %v5192_v49  ;;  %vm6679_vm5 = vcmp.eq.f32.partialorder %v2703_v3, 8.507059e+37 }
 0x1c2   :  { %v2377_v9 = vmul.f32 %v6627_v10, %v2376_v60  ;;  %3450 = vmatpush.bf16.msrb.mxu0 %v4833_v37  ;;  %vm2699_vm6 = vweird.f32 %v6637_v18  ;;  %v2706_v3 = vor.u32 1.1754944e-38, %v2705_v42  ;;  %v5515_v37 = vld [vmem:[#allocation5 + $0x174] sm:$0xf0] }
 0x1c3   :  { %v2391_v24 = vmul.f32 %v6623_v22, %v6623_v22  ;;  %3435 = vmatpush.bf16.msra.mxu3 %v5045_v11  ;;  %3478 = vmatpush.bf16.msrb.mxu2 %v4837_v30  ;;  %v5541_v30 = vld [vmem:[#allocation5 + $0x24c] sm:$0xf] }
 0x1c4   :  { %v2062_v41 = vpop.f32.mrf.mxu2  ;;  %v2378_v26 = vadd.f32 %v6627_v10, %v2377_v9  ;;  %3408 = vmatpush.bf16.msra.mxu1 %v5017_v27  ;;  %v5556_v9 = vld [vmem:[#allocation5 + $0x2bc] sm:$0xf0]  ;;  %v5144_v27 = vld [vmem:[#allocation5 + $0x278] sm:$0xf] }
 0x1c5   :  { %v2063_v39 = vadd.f32 %v2062_v41, %v2049_v29  ;;  %v6639_v43 = vmin.f32 %v2391_v24, 16.0  ;;  %v5601_v29 = vpop.eup %5600  ;;  %v2363_v24 = vmul.f32 %v2362_v4, %v6506_v52  ;;  %v5197_v4 = vor.u32 %v5559_v54, %v5194_v51  ;;  %v5512_v51 = vld [vmem:[#allocation5 + $0x164] sm:$0xf] }
 0x1c6   :  { %v2076_v19 = vpop.f32.mrf.mxu3  ;;  %v2382_v57 = vsel %vm6658_vm3, %v6627_v10, %v2378_v26  ;;  %v2695_v36 = vmul.f32 %v5601_v29, %v6637_v18  ;;  %vm2700_vm4 = vweird.f32 %v5601_v29  ;;  %v5169_v12 = vor.u32 %v5556_v9, %v5168_v32  ;;  %v4986_v32 = vld [vmem:[#allocation5 + $0x148] sm:$0xf0]  ;;  %v5535_v9 = vld [vmem:[#allocation5 + $0x21c] sm:$0xf] }
 0x1c7   :  { %v6641_v5 = vadd.f32 %v2076_v19, %v2063_v39  ;;  %v2393_v38 = vmul.f32 2.1237322e-06, %v6639_v43  ;;  %v2404_v40 = vmul.f32 3.8918573e-05, %v6639_v43  ;;  %v2387_v41 = vsel %vm6633_vm0, %v2386_v6, %v2382_v57  ;;  %3436 = vmatpush.bf16.msra.mxu3 %v5021_v44  ;;  %vm2701_vm7 = vmor %vm2699_vm6, %vm2700_vm4  ;;  %v5146_v44 = vld [vmem:[#allocation5 + $0x290] sm:$0xf0] }
 0x1c8   :  { %v2696_v59 = vsub.f32 1.0, %v2695_v36  ;;  %v2388_v2 = vmul.f32 %v2387_v41, %v2363_v24  ;;  %3457 = vmatpush.bf16.msrb.mxu1 %v5193_v35  ;;  %v5145_v49 = vor.u32 %v5550_v55, %v5144_v27  ;;  %v2085_v41 = vmul.f32 0.5, %v6501_v21  ;;  %v5010_v24 = vld [vmem:[#allocation5 + $0x178] sm:$0xf0]  ;;  %v5532_v27 = vld [vmem:[#allocation5 + $0x1fc] sm:$0xf0] }
 0x1c9   :  { %v6651_v25 = vmul.f32 0.70710677, %v6641_v5  ;;  %v2394_v13 = vadd.f32 0.00028619796, %v2393_v38  ;;  %v2405_v20 = vadd.f32 0.001143296, %v2404_v40  ;;  %v2683_v38 = vmul.f32 %v6645_v17, %v6544_v45 }
 0x1ca   :  { %v2697_v8 = vmul.f32 %v5601_v29, %v2696_v59  ;;  %v5553_v40 = vld [vmem:[#allocation5 + $0x2ac] sm:$0xf]  ;;  %v4812_v50 = vclamps-f32 %v2388_v2, 1.0  ;;  %v5544_v59 = vld [vmem:[#allocation5 + $0x25c] sm:$0xf0]  ;;  %v5013_v52 = vor.u32 %v5512_v51, %v5010_v24 }
 0x1cb   :  { %v2711_v7 = vmul.f32 %v6651_v25, %v6651_v25  ;;  %v2395_v62 = vmul.f32 %v2394_v13, %v6639_v43  ;;  %v2406_v61 = vmul.f32 %v2405_v20, %v6639_v43  ;;  %3485 = vmatpush.bf16.msrb.mxu3 %v5197_v4  ;;  %v5173_v20 = vor.u32 %v5553_v40, %v5170_v31  ;;  %v4984_v4 = vld [vmem:[#allocation5 + $0x130] sm:$0xf]  ;;  %v5098_v40 = vld [vmem:[#allocation5 + $0x230] sm:$0xf0]  ;;  %v5523_v24 = vld [vmem:[#allocation5 + $0x1bc] sm:$0xf] }
 0x1cc   :  { %v2698_v47 = vadd.f32 %v5601_v29, %v2697_v8  ;;  %3458 = vmatpush.bf16.msrb.mxu1 %v5169_v12  ;;  %v2757_v48 = vadd.f32 1.0, %v4812_v50  ;;  %v5526_v51 = vld [vmem:[#allocation5 + $0x1cc] sm:$0xf0] }
 0x1cd   :  { %v6669_v28 = vmin.f32 %v2711_v7, 16.0  ;;  %v2396_v33 = vadd.f32 0.0036580483, %v2395_v62  ;;  %v2407_v10 = vadd.f32 0.014752088, %v2406_v61 }
 0x1ce   :  { %v2702_v15 = vsel %vm2701_vm7, %v5601_v29, %v2698_v47  ;;  %v5547_v62 = vld [vmem:[#allocation5 + $0x27c] sm:$0xf]  ;;  %v5008_v61 = vld [vmem:[#allocation5 + $0x160] sm:$0xf]  ;;  %v2773_v42 = vmul.f32 %v2757_v48, %v2085_v41  ;;  %v5538_v47 = vld [vmem:[#allocation5 + $0x22c] sm:$0xf0] }
 0x1cf   :  { %v2713_v39 = vmul.f32 2.1237322e-06, %v6669_v28  ;;  %v2724_v63 = vmul.f32 3.8918573e-05, %v6669_v28  ;;  %v2408_v19 = vmul.f32 %v2407_v10, %v6639_v43  ;;  %v2397_v46 = vmul.f32 %v2396_v33, %v6639_v43  ;;  %3486 = vmatpush.bf16.msrb.mxu3 %v5173_v20  ;;  %v5503_v20 = vld [vmem:[#allocation5 + $0x114] sm:$0xf0] }
 0x1d0   :  { %v2707_v45 = vsel %vm6679_vm5, %v2706_v3, %v2702_v15  ;;  %v5149_v56 = vor.u32 %v5547_v62, %v5146_v44  ;;  %v2093_v10 = vmul.f32 0.5, %v6536_v23  ;;  %3459 = vmatpush.bf16.msrb.mxu1 %v5145_v49  ;;  %v5009_v8 = vor.u32 %v5515_v37, %v5008_v61  ;;  %v4960_v3 = vld [vmem:[#allocation5 + $0x100] sm:$0xf]  ;;  %v5074_v48 = vld [vmem:[#allocation5 + $0x200] sm:$0xf0] }
 0x1d1   :  { %v2714_v16 = vadd.f32 0.00028619796, %v2713_v39  ;;  %v2725_v11 = vadd.f32 0.001143296, %v2724_v63  ;;  %v2409_v60 = vadd.f32 0.112945676, %v2408_v19  ;;  %v2708_v34 = vmul.f32 %v2707_v45, %v2683_v38 }
 0x1d2   :  { %v2398_v17 = vadd.f32 0.05243302, %v2397_v46  ;;  %v5120_v63 = vld [vmem:[#allocation5 + $0x248] sm:$0xf]  ;;  %v5096_v38 = vld [vmem:[#allocation5 + $0x218] sm:$0xf]  ;;  %v4961_v37 = vor.u32 %v5503_v20, %v4960_v3 }
 0x1d3   :  { %v2715_v6 = vmul.f32 %v2714_v16, %v6669_v28  ;;  %v2726_v0 = vmul.f32 %v2725_v11, %v6669_v28  ;;  %v2410_v13 = vmul.f32 %v2409_v60, %v6639_v43  ;;  %v4820_v29 = vclamps-f32 %v2708_v34, 1.0  ;;  %3487 = vmatpush.bf16.msrb.mxu3 %v5149_v56  ;;  %v5122_v16 = vld [vmem:[#allocation5 + $0x260] sm:$0xf0]  ;;  %v5509_v46 = vld [vmem:[#allocation5 + $0x144] sm:$0xf0] }
 0x1d4   :  { %v2399_v36 = vmul.f32 %v2398_v17, %v6639_v43  ;;  %v5121_v19 = vor.u32 %v5544_v59, %v5120_v63  ;;  %v5125_v23 = vor.u32 %v5541_v30, %v5122_v16  ;;  %v5500_v45 = vld [vmem:[#allocation5 + $0x104] sm:$0xf]  ;;  %v4962_v17 = vld [vmem:[#allocation5 + $0x118] sm:$0xf0]  ;;  %v5529_v34 = vld [vmem:[#allocation5 + $0x1ec] sm:$0xf] }
 0x1d5   :  { %v2727_v14 = vadd.f32 0.014752088, %v2726_v0  ;;  %v2716_v26 = vadd.f32 0.0036580483, %v2715_v6  ;;  %v2411_v18 = vadd.f32 0.4994258, %v2410_v13  ;;  %v5097_v13 = vor.u32 %v5538_v47, %v5096_v38 }
 0x1d6   :  { %v2765_v39 = vadd.f32 1.0, %v4820_v29  ;;  %v2400_v11 = vadd.f32 0.18741608, %v2399_v36  ;;  %v5506_v0 = vld [vmem:[#allocation5 + $0x134] sm:$0xf]  ;;  %3460 = vmatpush.bf16.msrb.mxu1 %v5121_v19  ;;  %v5077_v61 = vor.u32 %v5529_v34, %v5074_v48  ;;  %v4965_v49 = vor.u32 %v5500_v45, %v4962_v17 }
 0x1d7   :  { %v2728_v7 = vmul.f32 %v2727_v14, %v6669_v28  ;;  %v2412_v1 = vmul.f32 %v2411_v18, %v6639_v43  ;;  %v2717_v57 = vmul.f32 %v2716_v26, %v6669_v28  ;;  %3488 = vmatpush.bf16.msrb.mxu3 %v5125_v23  ;;  %v5101_v14 = vor.u32 %v5535_v9, %v5098_v40  ;;  %v4936_v29 = vld [vmem:[#allocation5 + $0xd0] sm:$0xf]  ;;  %v5497_v56 = vld [vmem:[#allocation5 + $0xe4] sm:$0xf0]  ;;  %v5494_v41 = vld [vmem:[#allocation5 + $0xd4] sm:$0xf] }
 0x1d8   :  { %v2781_v21 = vmul.f32 %v2765_v39, %v2093_v10  ;;  %v4985_v26 = vor.u32 %v5509_v46, %v4984_v4  ;;  %v4989_v12 = vor.u32 %v5506_v0, %v4986_v32  ;;  %v2401_v55 = vmul.f32 %v2400_v11, %v6639_v43  ;;  %v4938_v43 = vld [vmem:[#allocation5 + $0xe8] sm:$0xf0]  ;;  %v4912_v39 = vld [vmem:[#allocation5 + $0xa0] sm:$0xf]  ;;  %v5050_v59 = vld [vmem:[#allocation5 + $0x1d0] sm:$0xf0] }
 0x1d9   :  { %v2729_v53 = vadd.f32 0.112945676, %v2728_v7  ;;  %v6698_v33 = vadd.f32 1.0, %v2412_v1  ;;  %v2718_v35 = vadd.f32 0.05243302, %v2717_v57  ;;  %v5053_v16 = vor.u32 %v5523_v24, %v5050_v59 }
 0x1da   :  { %v6703_v60 = vpack.c.bf16 %v2781_v21, %v2773_v42  ;;  %3461 = vmatpush.bf16.msrb.mxu1 %v5097_v13  ;;  %v5072_v7 = vld [vmem:[#allocation5 + $0x1e8] sm:$0xf]  ;;  %v2402_v10 = vadd.f32 1.1283791, %v2401_v55  ;;  %v5491_v19 = vld [vmem:[#allocation5 + $0xb4] sm:$0xf0] }
 0x1db   :  { %v2730_v54 = vmul.f32 %v2729_v53, %v6669_v28  ;;  %5602 = vrcp.f32 %v6698_v33  ;;  %v2719_v31 = vmul.f32 %v2718_v35, %v6669_v28  ;;  %v2423_v62 = vand.u32 2147483647, %v6698_v33  ;;  %3489 = vmatpush.bf16.msrb.mxu3 %v5101_v14  ;;  %v5024_v11 = vld [vmem:[#allocation5 + $0x188] sm:$0xf]  ;;  %v5520_v4 = vld [vmem:[#allocation5 + $0x19c] sm:$0xf0] }
 0x1dc   :  { %3395 = vmatmul.bf16.vlgmr.msra.gmra.mxu0 %v6703_v60  ;;  %3423 = vmatmul.bf16.vlgmr.msra.gmra.mxu2 %v6703_v60  ;;  %v2425_v44 = vand.u32 2147483648, %v6698_v33  ;;  %v5073_v57 = vor.u32 %v5532_v27, %v5072_v7  ;;  %vm2419_vm9 = vweird.f32 %v6698_v33  ;;  %v5517_v46 = vld [vmem:[#allocation5 + $0x18c] sm:$0xf]  ;;  %v5026_v23 = vld [vmem:[#allocation5 + $0x1a0] sm:$0xf0]  ;;  %v2403_v38 = vmul.f32 %v2402_v10, %v6623_v22 }
 0x1dd   :  { %v2731_v2 = vadd.f32 0.4994258, %v2730_v54  ;;  %3499 = vmatpush.bf16.msra.mxu0 %v5009_v8  ;;  %3527 = vmatpush.bf16.msra.mxu2 %v5013_v52  ;;  %v2720_v53 = vadd.f32 0.18741608, %v2719_v31  ;;  %v5048_v54 = vld [vmem:[#allocation5 + $0x1b8] sm:$0xf]  ;;  %v4937_v8 = vor.u32 %v5497_v56, %v4936_v29  ;;  %v4941_v52 = vor.u32 %v5494_v41, %v4938_v43 }
 0x1de   :  { %3462 = vmatpush.bf16.msrb.mxu1 %v5073_v57  ;;  %v5049_v63 = vor.u32 %v5526_v51, %v5048_v54  ;;  %v2426_v35 = vor.u32 1.1754944e-38, %v2425_v44  ;;  %vm2424_vm11 = vcmp.eq.f32.partialorder %v2423_v62, 8.507059e+37  ;;  %v5488_v0 = vld [vmem:[#allocation5 + $0xa4] sm:$0xf]  ;;  %v4914_v32 = vld [vmem:[#allocation5 + $0xb8] sm:$0xf0]  ;;  %v5029_v40 = vor.u32 %v5517_v46, %v5026_v23 }
 0x1df   :  { %v2732_v6 = vmul.f32 %v2731_v2, %v6669_v28  ;;  %3490 = vmatpush.bf16.msrb.mxu3 %v5077_v61  ;;  %v2721_v2 = vmul.f32 %v2720_v53, %v6669_v28  ;;  %v5025_v28 = vor.u32 %v5520_v4, %v5024_v11  ;;  %v4913_v14 = vor.u32 %v5491_v19, %v4912_v39  ;;  %v4888_v20 = vld [vmem:[#allocation5 + $0x70] sm:$0xf]  ;;  %v5485_v45 = vld [vmem:[#allocation5 + $0x84] sm:$0xf0]  ;;  %v5482_v17 = vld [vmem:[#allocation5 + $0x74] sm:$0xf] }
 0x1e0   :  { %v4890_v22 = vld [vmem:[#allocation5 + $0x88] sm:$0xf0]  ;;  %v4889_v62 = vor.u32 %v5485_v45, %v4888_v20  ;;  %v4864_v48 = vld [vmem:[#allocation5 + $0x40] sm:$0xf]  ;;  %v5479_v53 = vld [vmem:[#allocation5 + $0x54] sm:$0xf0] }
 0x1e1   :  { %v6707_v50 = vadd.f32 1.0, %v2732_v6  ;;  %v6711_v15 = vpop.eup %5602  ;;  %3500 = vmatpush.bf16.msra.mxu0 %v4985_v26  ;;  %3528 = vmatpush.bf16.msra.mxu2 %v4989_v12  ;;  %v2722_v31 = vadd.f32 1.1283791, %v2721_v2  ;;  %v4893_v44 = vor.u32 %v5482_v17, %v4890_v22  ;;  %v4866_v29 = vld [vmem:[#allocation5 + $0x58] sm:$0xf0]  ;;  %v2094_v54 = vmul.f32 0.5, %v6641_v5 }
 0x1e2   :  { %v2415_v18 = vmul.f32 %v6711_v15, %v6698_v33  ;;  %vm2420_vm8 = vweird.f32 %v6711_v15  ;;  %3463 = vmatpush.bf16.msrb.mxu1 %v5049_v63  ;;  %v4840_v41 = vld [vmem:[#allocation5 + $0x10] sm:$0xf]  ;;  %v5473_v43 = vld [vmem:[#allocation5 + $0x24] sm:$0xf0]  ;;  %v4842_v24 = vld [vmem:[#allocation5 + $0x28] sm:$0xf0] }
 0x1e3   :  { %5604 = vrcp.f32 %v6707_v50  ;;  %vm6725_vm10 = vmor %vm2419_vm9, %vm2420_vm8  ;;  %3491 = vmatpush.bf16.msrb.mxu3 %v5053_v16  ;;  %v2743_v3 = vand.u32 2147483647, %v6707_v50  ;;  %v2745_v13 = vand.u32 2147483648, %v6707_v50  ;;  %vm2739_vm13 = vweird.f32 %v6707_v50  ;;  %v5200_v10 = vld [vmem:[#allocation5 + $0x2e0] sm:$0xf] }
 0x1e4   :  { %v2416_v1 = vsub.f32 1.0, %v2415_v18  ;;  %v2723_v7 = vmul.f32 %v2722_v31, %v6651_v25  ;;  %v2086_v25 = vmul.f32 0.5, %v6617_v58  ;;  %v5563_v39 = vld [vmem:[#allocation5 + $0x2f4] sm:$0xf0]  ;;  %v5560_v63 = vld [vmem:[#allocation5 + $0x2e4] sm:$0xf]  ;;  %v4841_v58 = vor.u32 %v5473_v43, %v4840_v41 }
 0x1e5   :  { %3501 = vmatpush.bf16.msra.mxu0 %v4961_v37  ;;  %3529 = vmatpush.bf16.msra.mxu2 %v4965_v49  ;;  %vm2744_vm15 = vcmp.eq.f32.partialorder %v2743_v3, 8.507059e+37  ;;  %v2746_v27 = vor.u32 1.1754944e-38, %v2745_v13  ;;  %v4865_v49 = vor.u32 %v5479_v53, %v4864_v48  ;;  %v5202_v59 = vld [vmem:[#allocation5 + $0x2f8] sm:$0xf0]  ;;  %v5201_v2 = vor.u32 %v5563_v39, %v5200_v10  ;;  %v5176_v16 = vld [vmem:[#allocation5 + $0x2b0] sm:$0xf] }
 0x1e6   :  { %v2417_v36 = vmul.f32 %v6711_v15, %v2416_v1  ;;  %3464 = vmatpush.bf16.msrb.mxu1 %v5025_v28  ;;  %v5205_v19 = vor.u32 %v5560_v63, %v5202_v59  ;;  %v5557_v11 = vld [vmem:[#allocation5 + $0x2c4] sm:$0xf0]  ;;  %v5178_v5 = vld [vmem:[#allocation5 + $0x2c8] sm:$0xf0]  ;;  %v5152_v4 = vld [vmem:[#allocation5 + $0x280] sm:$0xf] }
 0x1e7   :  { %3492 = vmatpush.bf16.msrb.mxu3 %v5029_v40  ;;  %v5551_v46 = vld [vmem:[#allocation5 + $0x294] sm:$0xf0]  ;;  %v5548_v23 = vld [vmem:[#allocation5 + $0x284] sm:$0xf]  ;;  %v5128_v28 = vld [vmem:[#allocation5 + $0x250] sm:$0xf] }
 0x1e8   :  { %v2418_v30 = vadd.f32 %v6711_v15, %v2417_v36  ;;  %v5470_v36 = vld [vmem:[#allocation5 + $0x14] sm:$0xf]  ;;  %v5104_v3 = vld [vmem:[#allocation5 + $0x220] sm:$0xf]  ;;  %v5539_v13 = vld [vmem:[#allocation5 + $0x234] sm:$0xf0] }
 0x1e9   :  { %v5605_v42 = vpop.eup %5604  ;;  %3502 = vmatpush.bf16.msra.mxu0 %v4937_v8  ;;  %3530 = vmatpush.bf16.msra.mxu2 %v4941_v52  ;;  %v4845_v21 = vor.u32 %v5470_v36, %v4842_v24  ;;  %v5177_v8 = vor.u32 %v5557_v11, %v5176_v16  ;;  %v5533_v20 = vld [vmem:[#allocation5 + $0x204] sm:$0xf0]  ;;  %v5530_v45 = vld [vmem:[#allocation5 + $0x1f4] sm:$0xf]  ;;  %v5082_v17 = vld [vmem:[#allocation5 + $0x208] sm:$0xf0] }
 0x1ea   :  { %v2735_v33 = vmul.f32 %v5605_v42, %v6707_v50  ;;  %v2422_v6 = vsel %vm6725_vm10, %v6711_v15, %v2418_v30  ;;  %vm2740_vm12 = vweird.f32 %v5605_v42  ;;  %v4917_v15 = vor.u32 %v5488_v0, %v4914_v32  ;;  %v5476_v50 = vld [vmem:[#allocation5 + $0x44] sm:$0xf]  ;;  %v5032_v48 = vld [vmem:[#allocation5 + $0x190] sm:$0xf]  ;;  %v5518_v53 = vld [vmem:[#allocation5 + $0x194] sm:$0xf] }
 0x1eb   :  { %v2427_v47 = vsel %vm2424_vm11, %v2426_v35, %v2422_v6  ;;  %vm2741_vm14 = vmor %vm2739_vm13, %vm2740_vm12  ;;  %v4869_v56 = vor.u32 %v5476_v50, %v4866_v29  ;;  %v5154_v6 = vld [vmem:[#allocation5 + $0x298] sm:$0xf0]  ;;  %v5153_v0 = vor.u32 %v5551_v46, %v5152_v4  ;;  %v5034_v50 = vld [vmem:[#allocation5 + $0x1a8] sm:$0xf0] }
 0x1ec   :  { %v2736_v9 = vsub.f32 1.0, %v2735_v33  ;;  %v2428_v26 = vmul.f32 %v2427_v47, %v2403_v38  ;;  %3451 = vmatmul.bf16.vlgmr.msrb.gmra.mxu0 %v6703_v60  ;;  %3479 = vmatmul.bf16.vlgmr.msrb.gmra.mxu2 %v6703_v60  ;;  %v5554_v33 = vld [vmem:[#allocation5 + $0x2b4] sm:$0xf]  ;;  %v5157_v32 = vor.u32 %v5548_v23, %v5154_v6  ;;  %v5545_v38 = vld [vmem:[#allocation5 + $0x264] sm:$0xf0] }
 0x1ed   :  { %3503 = vmatpush.bf16.msra.mxu0 %v4913_v14  ;;  %3531 = vmatpush.bf16.msra.mxu2 %v4917_v15  ;;  %v5181_v52 = vor.u32 %v5554_v33, %v5178_v5  ;;  %v5542_v47 = vld [vmem:[#allocation5 + $0x254] sm:$0xf]  ;;  %v5129_v40 = vor.u32 %v5545_v38, %v5128_v28  ;;  %v5536_v14 = vld [vmem:[#allocation5 + $0x224] sm:$0xf]  ;;  %v5080_v15 = vld [vmem:[#allocation5 + $0x1f0] sm:$0xf] }
 0x1ee   :  { %v2737_v12 = vmul.f32 %v5605_v42, %v2736_v9  ;;  %v4813_v34 = vclamps-f32 %v2428_v26, 1.0  ;;  %v5130_v9 = vld [vmem:[#allocation5 + $0x268] sm:$0xf0]  ;;  %v5106_v26 = vld [vmem:[#allocation5 + $0x238] sm:$0xf0]  ;;  %v5081_v22 = vor.u32 %v5533_v20, %v5080_v15 }
 0x1ef   :  { %v5133_v31 = vor.u32 %v5542_v47, %v5130_v9  ;;  %v6756_v39 = vld [vmem:[%s6929_s4] ss:$4 sm:$0x3f] }
 0x1f0   :  { %v2738_v18 = vadd.f32 %v5605_v42, %v2737_v12  ;;  %v2758_v61 = vadd.f32 1.0, %v4813_v34  ;;  %v5105_v12 = vor.u32 %v5539_v13, %v5104_v3  ;;  %v5524_v34 = vld [vmem:[#allocation5 + $0x1c4] sm:$0xf]  ;;  %v2896_v63 = vperm.slane %v6756_v39, 1 }
 0x1f1   :  { %3504 = vmatpush.bf16.msra.mxu0 %v4889_v62  ;;  %3532 = vmatpush.bf16.msra.mxu2 %v4893_v44  ;;  %v2899_v33 = vperm.slane %v6756_v39, 4  ;;  %v2900_v28 = vperm.slane %v6756_v39, 5 }
 0x1f2   :  { %v2742_v55 = vsel %vm2741_vm14, %v5605_v42, %v2738_v18  ;;  %v2774_v42 = vmul.f32 %v2758_v61, %v2086_v25  ;;  %v5085_v18 = vor.u32 %v5530_v45, %v5082_v17 }
 0x1f3   :  { %v2747_v1 = vsel %vm2744_vm15, %v2746_v27, %v2742_v55  ;;  %v5527_v27 = vld [vmem:[#allocation5 + $0x1d4] sm:$0xf0]  ;;  %v5058_v55 = vld [vmem:[#allocation5 + $0x1d8] sm:$0xf0] }
 0x1f4   :  { %v2748_v57 = vmul.f32 %v2747_v1, %v2723_v7  ;;  %v5056_v7 = vld [vmem:[#allocation5 + $0x1c0] sm:$0xf]  ;;  %v5061_v44 = vor.u32 %v5524_v34, %v5058_v55  ;;  %v5521_v1 = vld [vmem:[#allocation5 + $0x1a4] sm:$0xf0] }
 0x1f5   :  { %3505 = vmatpush.bf16.msra.mxu0 %v4865_v49  ;;  %3533 = vmatpush.bf16.msra.mxu2 %v4869_v56  ;;  %v5057_v62 = vor.u32 %v5527_v27, %v5056_v7  ;;  %v5033_v29 = vor.u32 %v5521_v1, %v5032_v48 }
 0x1f6   :  { %v4821_v37 = vclamps-f32 %v2748_v57, 1.0  ;;  %v5037_v57 = vor.u32 %v5518_v53, %v5034_v50 }
 0x1f8   :  { %v2766_v51 = vadd.f32 1.0, %v4821_v37 }
 0x1f9   :  { %3506 = vmatpush.bf16.msra.mxu0 %v4841_v58  ;;  %3534 = vmatpush.bf16.msra.mxu2 %v4845_v21  ;;  %v2897_v58 = vperm.slane %v6756_v39, 2 }
 0x1fa   :  { %v2782_v30 = vmul.f32 %v2766_v51, %v2094_v54 }
 0x1fc   :  { %v6743_v35 = vpack.c.bf16 %v2782_v30, %v2774_v42  ;;  %3507 = vmatmul.bf16.vlgmr.msra.gmra.mxu0 %v6703_v60  ;;  %3535 = vmatmul.bf16.vlgmr.msra.gmra.mxu2 %v6703_v60  ;;  %v5109_v60 = vor.u32 %v5536_v14, %v5106_v26  ;;  %v2895_v30 = vperm.slane %v6756_v39, 0 }
 0x1fe   :  { %3409 = vmatmul.bf16.vlgmr.msra.gmra.mxu1 %v6743_v35  ;;  %3437 = vmatmul.bf16.vlgmr.msra.gmra.mxu3 %v6743_v35 }
 0x1ff   :  { %3513 = vmatpush.bf16.msra.mxu1 %v5201_v2  ;;  %3541 = vmatpush.bf16.msra.mxu3 %v5205_v19  ;;  %v2898_v2 = vperm.slane %v6756_v39, 3 }
 0x203   :  { %3514 = vmatpush.bf16.msra.mxu1 %v5177_v8  ;;  %3542 = vmatpush.bf16.msra.mxu3 %v5181_v52 }
 0x207   :  { %3515 = vmatpush.bf16.msra.mxu1 %v5153_v0  ;;  %3543 = vmatpush.bf16.msra.mxu3 %v5157_v32 }
 0x20b   :  { %3516 = vmatpush.bf16.msra.mxu1 %v5129_v40  ;;  %3544 = vmatpush.bf16.msra.mxu3 %v5133_v31 }
 0x20e   :  { %3465 = vmatmul.bf16.vlgmr.msrb.gmra.mxu1 %v6743_v35  ;;  %3493 = vmatmul.bf16.vlgmr.msrb.gmra.mxu3 %v6743_v35 }
 0x20f   :  { %3517 = vmatpush.bf16.msra.mxu1 %v5105_v12  ;;  %3545 = vmatpush.bf16.msra.mxu3 %v5109_v60 }
 0x213   :  { %3518 = vmatpush.bf16.msra.mxu1 %v5081_v22  ;;  %3546 = vmatpush.bf16.msra.mxu3 %v5085_v18 }
 0x217   :  { %3519 = vmatpush.bf16.msra.mxu1 %v5057_v62  ;;  %3547 = vmatpush.bf16.msra.mxu3 %v5061_v44 }
 0x21b   :  { %3520 = vmatpush.bf16.msra.mxu1 %v5033_v29  ;;  %3548 = vmatpush.bf16.msra.mxu3 %v5037_v57 }
 0x21e   :  { %3521 = vmatmul.bf16.vlgmr.msra.gmra.mxu1 %v6743_v35  ;;  %3549 = vmatmul.bf16.vlgmr.msra.gmra.mxu3 %v6743_v35 }
 0x259   :  { %v3396_v25 = vpop.f32.mrf.mxu0 }
 0x25a   :  { %v3397_v16 = vadd.f32 %v3396_v25, %v2895_v30 }
 0x25f   :  { %v3424_v61 = vpop.f32.mrf.mxu2 }
 0x260   :  { %v3425_v35 = vadd.f32 %v3424_v61, %v2896_v63 }
 0x261   :  { %v3398_v37 = vpop.f32.mrf.mxu0 }
 0x262   :  { %v3399_v13 = vadd.f32 %v3398_v37, %v2895_v30 }
 0x267   :  { %v3426_v56 = vpop.f32.mrf.mxu2 }
 0x268   :  { %v3427_v32 = vadd.f32 %v3426_v56, %v2896_v63 }
 0x269   :  { %v3452_v41 = vpop.f32.mrf.mxu0 }
 0x26a   :  { %v3453_v11 = vadd.f32 %v3452_v41, %v2897_v58 }
 0x26f   :  { %v3480_v54 = vpop.f32.mrf.mxu2 }
 0x270   :  { %v3481_v8 = vadd.f32 %v3480_v54, %v2898_v2 }
 0x271   :  { %v3454_v24 = vpop.f32.mrf.mxu0 }
 0x272   :  { %v3455_v14 = vadd.f32 %v3454_v24, %v2897_v58 }
 0x277   :  { %v3482_v42 = vpop.f32.mrf.mxu2 }
 0x278   :  { %v3483_v45 = vadd.f32 %v3482_v42, %v2898_v2 }
 0x279   :  { %v3508_v19 = vpop.f32.mrf.mxu0 }
 0x27a   :  { %v3509_v23 = vadd.f32 %v3508_v19, %v2899_v33 }
 0x27b   :  { %v3410_v49 = vpop.f32.mrf.mxu1 }
 0x27c   :  { %v6765_v52 = vadd.f32 %v3410_v49, %v3397_v16 }
 0x27e   :  { %v3578_v9 = vmul.f32 %v6765_v52, %v6765_v52 }
 0x27f   :  { %v3536_v38 = vpop.f32.mrf.mxu2 }
 0x280   :  { %v3537_v18 = vadd.f32 %v3536_v38, %v2900_v28 }
 0x281   :  { %v3438_v43 = vpop.f32.mrf.mxu3  ;;  %v3510_v60 = vpop.f32.mrf.mxu0 }
 0x282   :  { %v6763_v5 = vadd.f32 %v3438_v43, %v3425_v35  ;;  %v3511_v55 = vadd.f32 %v3510_v60, %v2899_v33 }
 0x283   :  { %v3412_v36 = vpop.f32.mrf.mxu1 }
 0x284   :  { %v3579_v6 = vmul.f32 %v6763_v5, %v6763_v5  ;;  %v3555_v40 = vadd.f32 %v6763_v5, %v6765_v52  ;;  %v6787_v17 = vadd.f32 %v3412_v36, %v3399_v13 }
 0x286   :  { %v3590_v12 = vadd.f32 %v3579_v6, %v3578_v9  ;;  %v3584_v29 = vmul.f32 %v6787_v17, %v6787_v17 }
 0x287   :  { %v3538_v43 = vpop.f32.mrf.mxu2 }
 0x289   :  { %v3440_v51 = vpop.f32.mrf.mxu3 }
 0x28a   :  { %v6782_v26 = vadd.f32 %v3440_v51, %v3427_v32 }
 0x28b   :  { %v3466_v10 = vpop.f32.mrf.mxu1 }
 0x28c   :  { %v6767_v4 = vadd.f32 %v3466_v10, %v3453_v11  ;;  %v3585_v62 = vmul.f32 %v6782_v26, %v6782_v26  ;;  %v3562_v57 = vadd.f32 %v6782_v26, %v6787_v17  ;;  %v3539_v10 = vadd.f32 %v3538_v43, %v2900_v28 }
 0x28d   :  { %v5697_v11 = vmov 768.0  }
 0x28e   :  { %v3580_v31 = vmul.f32 %v6767_v4, %v6767_v4  ;;  %v3556_v15 = vadd.f32 %v3555_v40, %v6767_v4  ;;  %v3597_v36 = vadd.f32 %v3585_v62, %v3584_v29  ;;  %5606 = vrcp.f32 %v5697_v11 }
 0x290   :  { %v3591_v34 = vadd.f32 %v3590_v12, %v3580_v31 }
 0x291   :  { %v3494_v59 = vpop.f32.mrf.mxu3 }
 0x292   :  { %v6771_v0 = vadd.f32 %v3494_v59, %v3481_v8 }
 0x293   :  { %v3468_v21 = vpop.f32.mrf.mxu1 }
 0x294   :  { %v3581_v20 = vmul.f32 %v6771_v0, %v6771_v0  ;;  %v6789_v22 = vadd.f32 %v3468_v21, %v3455_v14  ;;  %v3557_v7 = vadd.f32 %v3556_v15, %v6771_v0  ;;  %v5607_v33 = vpop.eup %5606 }
 0x295   :  { %v3570_v8 = vmul.f32 768.0, %v5607_v33  ;;  %vm3574_vm0 = vweird.f32 %v5607_v33 }
 0x296   :  { %v3592_v50 = vadd.f32 %v3591_v34, %v3581_v20  ;;  %v3586_v25 = vmul.f32 %v6789_v22, %v6789_v22  ;;  %v3563_v54 = vadd.f32 %v3562_v57, %v6789_v22 }
 0x298   :  { %v3598_v39 = vadd.f32 %v3597_v36, %v3586_v25 }
 0x299   :  { %v3496_v46 = vpop.f32.mrf.mxu3 }
 0x29a   :  { %v6796_v48 = vadd.f32 %v3496_v46, %v3483_v45  ;;  %v3571_v46 = vsub.f32 1.0, %v3570_v8 }
 0x29b   :  { %v3522_v47 = vpop.f32.mrf.mxu1 }
 0x29c   :  { %v6780_v3 = vadd.f32 %v3522_v47, %v3509_v23  ;;  %v3587_v51 = vmul.f32 %v6796_v48, %v6796_v48  ;;  %v3564_v63 = vadd.f32 %v3563_v54, %v6796_v48  ;;  %v3572_v23 = vmul.f32 %v5607_v33, %v3571_v46 }
 0x29e   :  { %v3582_v27 = vmul.f32 %v6780_v3, %v6780_v3  ;;  %v3558_v53 = vadd.f32 %v3557_v7, %v6780_v3  ;;  %v3599_v21 = vadd.f32 %v3598_v39, %v3587_v51  ;;  %v3573_v6 = vadd.f32 %v5607_v33, %v3572_v23 }
 0x2a0   :  { %v3593_v41 = vadd.f32 %v3592_v50, %v3582_v27  ;;  %v3575_v32 = vsel %vm3574_vm0, %v5607_v33, %v3573_v6  ;;  %v6833_v27 = vld [vmem:[%s6929_s4 + $0x1] ss:$4 sm:$0x3f] }
 0x2a1   :  { %v3550_v44 = vpop.f32.mrf.mxu3  ;;  %v3661_v50 = vperm.slane %v6833_v27, 2  ;;  %v3662_v29 = vperm.slane %v6833_v27, 3  ;;  %v3663_v25 = vperm.slane %v6833_v27, 4 }
 0x2a2   :  { %v6798_v1 = vadd.f32 %v3550_v44, %v3537_v18  ;;  %v3659_v44 = vperm.slane %v6833_v27, 0 }
 0x2a3   :  { %v3524_v61 = vpop.f32.mrf.mxu1 }
 0x2a4   :  { %v6807_v37 = vadd.f32 %v3524_v61, %v3511_v55  ;;  %v3559_v49 = vadd.f32 %v3558_v53, %v6798_v1  ;;  %v3583_v56 = vmul.f32 %v6798_v1, %v6798_v1  ;;  %v6839_v55 = vld [vmem:[%s6929_s4 + $0x2] ss:$4 sm:$0x3f]  ;;  %v3660_v53 = vperm.slane %v6833_v27, 1  ;;  %s5698_s4 = smov [#allocation7]  }
 0x2a5   :  { %v3664_v61 = vperm.slane %v6833_v27, 5  ;;  %v3689_v43 = vperm.slane %v6839_v55, 3  ;;  %v3690_v51 = vperm.slane %v6839_v55, 4  ;;  %s3750_s29 = sshll.u32 %s5698_s4, 4  ;;  %s3751_s29 = int_to_ptr.vmem [resolvable:$true] %s3750_s29 }
 0x2a6   :  { %3560 = vadd.xlane.f32.xlu0 %v3559_v49  ;;  %v3594_v24 = vadd.f32 %v3593_v41, %v3583_v56  ;;  %v3588_v59 = vmul.f32 %v6807_v37, %v6807_v37  ;;  %v3565_v58 = vadd.f32 %v3564_v63, %v6807_v37  ;;  %v3686_v49 = vperm.slane %v6839_v55, 0 }
 0x2a7   :  { %v3687_v56 = vperm.slane %v6839_v55, 1  ;;  %v3688_v41 = vperm.slane %v6839_v55, 2 }
 0x2a8   :  { %3595 = vadd.xlane.f32.xlu1 %v3594_v24  ;;  %v3600_v19 = vadd.f32 %v3599_v21, %v3588_v59  ;;  %v3691_v24 = vperm.slane %v6839_v55, 5 }
 0x2a9   :  { %v3552_v42 = vpop.f32.mrf.mxu3 }
 0x2aa   :  { %v6818_v30 = vadd.f32 %v3552_v42, %v3539_v10 }
 0x2ac   :  { %v3566_v35 = vadd.f32 %v3565_v58, %v6818_v30  ;;  %v3589_v2 = vmul.f32 %v6818_v30, %v6818_v30 }
 0x2ae   :  { %3567 = vadd.xlane.f32.xlu0 %v3566_v35  ;;  %v3601_v16 = vadd.f32 %v3600_v19, %v3589_v2 }
 0x2b0   :  { %3602 = vadd.xlane.f32.xlu1 %v3601_v16 }
 0x319   :  { %v3561_v28 = vpop.xlane.xlu0 %3560 }
 0x31a   :  { %v3576_v38 = vmul.f32 %v3575_v32, %v3561_v28 }
 0x31b   :  { %v3596_v47 = vpop.xlane.xlu1 %3595 }
 0x31c   :  { %v3604_v9 = vmul.f32 %v3596_v47, %v3575_v32  ;;  %v3606_v40 = vmul.f32 %v3576_v38, %v3576_v38  ;;  %v3610_v10 = vsub.f32 %v6765_v52, %v3576_v38  ;;  %v3611_v39 = vsub.f32 %v6763_v5, %v3576_v38 }
 0x31d   :  { %v3612_v63 = vsub.f32 %v6767_v4, %v3576_v38  ;;  %v3613_v58 = vsub.f32 %v6771_v0, %v3576_v38  ;;  %v3614_v21 = vsub.f32 %v6780_v3, %v3576_v38  ;;  %v3615_v35 = vsub.f32 %v6798_v1, %v3576_v38 }
 0x31e   :  { %v3608_v31 = vsub.f32 %v3604_v9, %v3606_v40 }
 0x320   :  { %v3622_v13 = vadd.f32 1e-05, %v3608_v31 }
 0x321   :  { %v3568_v14 = vpop.xlane.xlu0 %3567 }
 0x322   :  { %5608 = vrsqrt.f32 %v3622_v13  ;;  %v6824_v12 = vmul.f32 %v3575_v32, %v3568_v14  ;;  %vm3630_vm2 = vweird.f32 %v3622_v13  ;;  %v3711_v14 = vld [vmem:[#allocation7 + $0x8] sm:$0xff] }
 0x323   :  { %v3603_v60 = vpop.xlane.xlu1 %3602 }
 0x324   :  { %v3605_v15 = vmul.f32 %v3603_v60, %v3575_v32  ;;  %v3607_v20 = vmul.f32 %v6824_v12, %v6824_v12  ;;  %v3616_v2 = vsub.f32 %v6787_v17, %v6824_v12  ;;  %v3617_v5 = vsub.f32 %v6782_v26, %v6824_v12  ;;  %v3712_v60 = vld [vmem:[#allocation7 + $0x10] sm:$0xff] }
 0x325   :  { %v3618_v52 = vsub.f32 %v6789_v22, %v6824_v12  ;;  %v3619_v1 = vsub.f32 %v6796_v48, %v6824_v12 }
 0x326   :  { %v3609_v45 = vsub.f32 %v3605_v15, %v3607_v20  ;;  %v3713_v20 = vld [vmem:[#allocation7 + $0x18] sm:$0xff] }
 0x328   :  { %v5609_v18 = vpop.eup %5608  ;;  %v6828_v7 = vadd.f32 1e-05, %v3609_v45  ;;  %v3714_v45 = vld [vmem:[#allocation7 + $0x20] sm:$0xff] }
 0x329   :  { %v3625_v34 = vmul.f32 %v5609_v18, %v3622_v13  ;;  %vm3631_vm1 = vweird.f32 %v5609_v18  ;;  %v3710_v13 = vld [vmem:[#allocation7] sm:$0xff] }
 0x32a   :  { %5610 = vrsqrt.f32 %v6828_v7  ;;  %vm3632_vm3 = vmor %vm3630_vm2, %vm3631_vm1  ;;  %vm3640_vm5 = vweird.f32 %v6828_v7 }
 0x32b   :  { %v3626_v62 = vmul.f32 %v5609_v18, %v3625_v34 }
 0x32d   :  { %v3627_v57 = vmul.f32 0.5, %v3626_v62 }
 0x32f   :  { %v3628_v36 = vsub.f32 1.5, %v3627_v57  ;;  %v3620_v57 = vsub.f32 %v6807_v37, %v6824_v12 }
 0x330   :  { %v5611_v54 = vpop.eup %5610 }
 0x331   :  { %v3629_v59 = vmul.f32 %v5609_v18, %v3628_v36  ;;  %v3635_v42 = vmul.f32 %v5611_v54, %v6828_v7  ;;  %vm3641_vm4 = vweird.f32 %v5611_v54 }
 0x332   :  { %vm3642_vm6 = vmor %vm3640_vm5, %vm3641_vm4 }
 0x333   :  { %v3633_v19 = vsel %vm3632_vm3, %v5609_v18, %v3629_v59  ;;  %v3636_v4 = vmul.f32 %v5611_v54, %v3635_v42  ;;  %v3715_v59 = vld [vmem:[#allocation7 + $0x28] sm:$0xff] }
 0x334   :  { %v3644_v16 = vmul.f32 %v3633_v19, %v3610_v10  ;;  %v3645_v11 = vmul.f32 %v3633_v19, %v3611_v39  ;;  %v3646_v33 = vmul.f32 %v3633_v19, %v3612_v63  ;;  %v3647_v0 = vmul.f32 %v3633_v19, %v3613_v58 }
 0x335   :  { %v3648_v8 = vmul.f32 %v3633_v19, %v3614_v21  ;;  %v3649_v3 = vmul.f32 %v3633_v19, %v3615_v35  ;;  %v3637_v46 = vmul.f32 0.5, %v3636_v4  ;;  %v3621_v39 = vsub.f32 %v6818_v30, %v6824_v12 }
 0x336   :  { %v3671_v17 = vmul.f32 %v3659_v44, %v3644_v16  ;;  %v3672_v26 = vmul.f32 %v3660_v53, %v3645_v11  ;;  %v3673_v22 = vmul.f32 %v3661_v50, %v3646_v33  ;;  %v3674_v23 = vmul.f32 %v3662_v29, %v3647_v0  ;;  %v3720_v0 = vld [vmem:[#allocation7 + $0x50] sm:$0xff] }
 0x337   :  { %v3675_v6 = vmul.f32 %v3663_v25, %v3648_v8  ;;  %v3676_v32 = vmul.f32 %v3664_v61, %v3649_v3  ;;  %v3638_v48 = vsub.f32 1.5, %v3637_v46 }
 0x338   :  { %v3698_v28 = vadd.f32 %v3686_v49, %v3671_v17  ;;  %v3699_v38 = vadd.f32 %v3687_v56, %v3672_v26  ;;  %v3700_v47 = vadd.f32 %v3688_v41, %v3673_v22  ;;  %v3701_v9 = vadd.f32 %v3689_v43, %v3674_v23 }
 0x339   :  { %v3702_v40 = vadd.f32 %v3690_v51, %v3675_v6  ;;  %v3703_v31 = vadd.f32 %v3691_v24, %v3676_v32  ;;  %v3639_v15 = vmul.f32 %v5611_v54, %v3638_v48 }
 0x33a   :  { %v3722_v18 = vadd.f32 %v3710_v13, %v3698_v28  ;;  %v3723_v34 = vadd.f32 %v3711_v14, %v3699_v38  ;;  %v3724_v62 = vadd.f32 %v3712_v60, %v3700_v47  ;;  %v3725_v36 = vadd.f32 %v3713_v20, %v3701_v9 }
 0x33b   :  { %v3726_v10 = vadd.f32 %v3714_v45, %v3702_v40  ;;  %v3643_v63 = vsel %vm3642_vm6, %v5611_v54, %v3639_v15  ;;  %v3727_v35 = vadd.f32 %v3715_v59, %v3703_v31 }
 0x33c   :  { %3734 = vst [vmem:[#allocation7] sm:$0xff] %v3722_v18  ;;  %v3650_v42 = vmul.f32 %v3643_v63, %v3616_v2  ;;  %v3651_v7 = vmul.f32 %v3643_v63, %v3617_v5  ;;  %v3652_v58 = vmul.f32 %v3643_v63, %v3618_v52  ;;  %v3653_v21 = vmul.f32 %v3643_v63, %v3619_v1  ;;  %v3717_v5 = vld [vmem:[#allocation7 + $0x38] sm:$0xff]  ;;  %v3718_v52 = vld [vmem:[#allocation7 + $0x40] sm:$0xff] }
 0x33d   :  { %3735 = vst [vmem:[#allocation7 + $0x8] sm:$0xff] %v3723_v34  ;;  %v3654_v19 = vmul.f32 %v3643_v63, %v3620_v57  ;;  %v3655_v4 = vmul.f32 %v3643_v63, %v3621_v39 }
 0x33e   :  { %3736 = vst [vmem:[#allocation7 + $0x10] sm:$0xff] %v3724_v62  ;;  %v3677_v37 = vmul.f32 %v3659_v44, %v3650_v42  ;;  %v3678_v16 = vmul.f32 %v3660_v53, %v3651_v7  ;;  %v3679_v30 = vmul.f32 %v3661_v50, %v3652_v58  ;;  %v3680_v12 = vmul.f32 %v3662_v29, %v3653_v21 }
 0x33f   :  { %3737 = vst [vmem:[#allocation7 + $0x18] sm:$0xff] %v3725_v36  ;;  %v3681_v54 = vmul.f32 %v3663_v25, %v3654_v19  ;;  %v3682_v2 = vmul.f32 %v3664_v61, %v3655_v4  ;;  %v3716_v61 = vld [vmem:[#allocation7 + $0x30] sm:$0xff] }
 0x340   :  { %3738 = vst [vmem:[#allocation7 + $0x20] sm:$0xff] %v3726_v10  ;;  %v3704_v44 = vadd.f32 %v3686_v49, %v3677_v37  ;;  %v3705_v53 = vadd.f32 %v3687_v56, %v3678_v16  ;;  %v3706_v50 = vadd.f32 %v3688_v41, %v3679_v30  ;;  %v3707_v29 = vadd.f32 %v3689_v43, %v3680_v12  ;;  %v3719_v49 = vld [vmem:[#allocation7 + $0x48] sm:$0xff]  ;;  %v3721_v41 = vld [vmem:[#allocation7 + $0x58] sm:$0xff] }
 0x341   :  { %3739 = vst [vmem:[#allocation7 + $0x28] sm:$0xff] %v3727_v35  ;;  %v3708_v25 = vadd.f32 %v3690_v51, %v3681_v54  ;;  %v3709_v27 = vadd.f32 %v3691_v24, %v3682_v2 }
 0x342   :  { %v3728_v11 = vadd.f32 %v3716_v61, %v3704_v44  ;;  %v3729_v33 = vadd.f32 %v3717_v5, %v3705_v53  ;;  %v3730_v56 = vadd.f32 %v3718_v52, %v3706_v50  ;;  %v3731_v8 = vadd.f32 %v3719_v49, %v3707_v29 }
 0x343   :  { %v3732_v43 = vadd.f32 %v3720_v0, %v3708_v25  ;;  %v3733_v55 = vadd.f32 %v3721_v41, %v3709_v27 }
 0x344   :  { %3740 = vst [vmem:[#allocation7 + $0x30] sm:$0xff] %v3728_v11 }
 0x345   :  { %3741 = vst [vmem:[#allocation7 + $0x38] sm:$0xff] %v3729_v33 }
 0x346   :  { %3742 = vst [vmem:[#allocation7 + $0x40] sm:$0xff] %v3730_v56 }
 0x347   :  { %3743 = vst [vmem:[#allocation7 + $0x48] sm:$0xff] %v3731_v8 }
 0x348   :  { %3744 = vst [vmem:[#allocation7 + $0x50] sm:$0xff] %v3732_v43 }
 0x349   :  { %3745 = vst [vmem:[#allocation7 + $0x58] sm:$0xff] %v3733_v55 }
 0x34a   :  { %3758 = dma.vmem_to_hbm [thread:$0]  %s3751_s29, 1536, %s3753_s1, [#allocation4], %s5699_s3, %s5699_s3, %s5700_s7  }
 0x34b   :  { %5689 = dma.done.wait [#allocation4], 1536  }
 0x34c   :  { %5690 = vsyncadd [#allocation4], 4294965760 }
 0x34d   :  { %3763 = vsyncpa [#allocation3], 1 }
 0x34e   :  { %3764 = vsyncpa [#allocation6], 1 }
 0x34f   :  { %3765 = vsyncpa [#allocation4], 1 }

</bundles_post_ra>
